<compile_context>
chip_gen: v7x
topology: tpu7x:2x2x1
jax: 0.10.0
libtpu: 0.0.40
codegen_flags: <defaults>
</compile_context>

<pallas_src>
import jax
import jax.numpy as jnp
from jax import lax
from jax.experimental import pallas as pl
from jax.experimental.pallas import tpu as pltpu

LANES = 128  # TPU vreg lane width.


def _round_up(c, m):
    return ((c + m - 1) // m) * m


def _relu6(x):
    return jnp.minimum(jnp.maximum(x, 0.0), 6.0)


def _fold_bn(gamma, beta, mean, var, eps=1e-5):
    scale = gamma / jnp.sqrt(var + eps)
    bias = beta - mean * scale
    return (scale.reshape(1, -1).astype(jnp.float32),
            bias.reshape(1, -1).astype(jnp.float32))


def _pad_last(a, to):
    pad = to - a.shape[-1]
    if pad == 0:
        return a
    return jnp.pad(a, [(0, 0)] * (a.ndim - 1) + [(0, pad)])


def _pad_rows(a, to):
    pad = to - a.shape[0]
    if pad == 0:
        return a
    return jnp.pad(a, ((0, pad), (0, 0)))


def _full_spec(a):
    zeros = (0,) * a.ndim
    return pl.BlockSpec(a.shape, lambda n, _z=zeros: _z)


def _num_tensorcores():
    try:
        return max(1, int(getattr(jax.devices()[0], "num_cores", 1)))
    except Exception:
        return 1


def _vmem_bytes_per_image(H, W, Ho, Wo, Cin, Cout, Cph, has_expand,
                          compute_dtype):
    """Per-image VMEM footprint: double-buffered in/out blocks, the padded
    depthwise scratch and the large in-kernel temporaries (lane/sublane
    rounded, tracking compute_dtype)."""
    f32 = 4
    cb = jnp.dtype(compute_dtype).itemsize
    lane = lambda c: _round_up(c, LANES)
    sub = lambda s: _round_up(s, 8)
    total = 0
    total += 2 * H * sub(W) * lane(Cin) * f32           # input block, 2 buffers
    total += 2 * Ho * sub(Wo) * lane(Cout) * f32        # output block, 2 buffers
    total += (H + 2) * sub(W + 2) * lane(Cph) * cb      # padded dw scratch
    if has_expand:
        total += H * sub(W) * lane(Cph) * (f32 + cb)    # expand act + cdt cast
    total += Ho * sub(Wo) * lane(Cph) * (f32 + cb)      # dw accumulator + tap
    total += Ho * sub(Wo) * lane(Cout) * f32            # projected output
    return total


def _pick_batch_tile(n, bytes_per_image, budget, min_steps):
    """Largest divisor of n whose tile fits `budget`; among those, prefer one
    that still yields >= min_steps grid steps (multi-TensorCore chips)."""
    fitting = [bt for bt in range(1, n + 1)
               if n % bt == 0 and bt * bytes_per_image <= budget]
    if not fitting:
        return 1
    split = [bt for bt in fitting if n // bt >= min_steps]
    return max(split) if split else max(fitting)


def _make_kernel(BT, H, W, Ho, Wo, Cin, Cout, Cph, stride, has_expand,
                 addition, compute_dtype):
    cdt = compute_dtype

    def zero_halo(pad_ref):
        # Only the 1-wide spatial halo is zeroed (4 thin slab stores) instead
        # of the whole scratch.  It is done every grid step — not once under
        # pl.when(program_id == 0) — so the kernel stays correct when the
        # "parallel" batch axis is split across TensorCores (a core starting
        # at a non-zero program id would otherwise see stale VMEM).
        pad_ref[:, 0:1, :, :] = jnp.zeros((BT, 1, W + 2, Cph), cdt)
        pad_ref[:, H + 1:H + 2, :, :] = jnp.zeros((BT, 1, W + 2, Cph), cdt)
        pad_ref[:, :, 0:1, :] = jnp.zeros((BT, H + 2, 1, Cph), cdt)
        pad_ref[:, :, W + 1:W + 2, :] = jnp.zeros((BT, H + 2, 1, Cph), cdt)

    def dwconv3x3(pad_ref, dwk):
        """Depthwise 3x3, pad=1, stride=`stride`; dwk: (3, 3, Cph) in cdt."""
        def tap(dy, dx):
            if stride == 1:
                t = pad_ref[:, dy:dy + Ho, dx:dx + Wo, :]
            else:
                # TODO(synk): stride-2 taps use sublane-strided reads; an
                # up-front even/odd de-interleave of the scratch would amortize
                # that cost but is not implemented here.
                t = pad_ref[:, pl.ds(dy, Ho, stride), pl.ds(dx, Wo, stride), :]
            w = dwk[dy:dy + 1, dx:dx + 1, :].reshape(1, 1, 1, Cph)
            return t * w
        # Initialise the accumulator from the (0, 0) tap product (saves a
        # full-tensor zero-fill + add in the VALU-bound stage).
        acc = tap(0, 0).astype(jnp.float32)
        for dy in range(3):
            for dx in range(3):
                if dy == 0 and dx == 0:
                    continue
                acc = acc + tap(dy, dx).astype(jnp.float32)
        return acc

    def project_and_store(d, w3, b3, x_ref, o_ref):
        # 1x1 project conv: MXU matmul with bf16 (or f32) operands, f32 acc.
        y = jnp.dot(d.reshape(BT * Ho * Wo, Cph).astype(w3.dtype), w3,
                    preferred_element_type=jnp.float32)
        y = y + b3
        if addition:
            # Residual add re-reads the (already VMEM-resident) input block.
            y = y + x_ref[...].astype(jnp.float32).reshape(BT * H * W, Cin)
        o_ref[...] = y.reshape(BT, Ho, Wo, Cout).astype(o_ref.dtype)

    if has_expand:
        def kernel(x_ref, w1_ref, b1_ref, dw_ref, b2_ref, w3_ref, b3_ref,
                   o_ref, pad_ref):
            zero_halo(pad_ref)
            # 1x1 expand conv on the MXU; K = true Cin (no padded channels).
            w1 = w1_ref[...]
            h = jnp.dot(x_ref[...].reshape(BT * H * W, Cin).astype(w1.dtype),
                        w1, preferred_element_type=jnp.float32)
            h = _relu6(h + b1_ref[...])
            pad_ref[:, 1:H + 1, 1:W + 1, :] = (
                h.reshape(BT, H, W, Cph).astype(cdt))
            d = dwconv3x3(pad_ref, dw_ref[...])
            d = _relu6(d + b2_ref[...].reshape(1, 1, 1, Cph))
            project_and_store(d, w3_ref[...], b3_ref[...], x_ref, o_ref)
    else:
        def kernel(x_ref, dw_ref, b2_ref, w3_ref, b3_ref, o_ref, pad_ref):
            zero_halo(pad_ref)
            pad_ref[:, 1:H + 1, 1:W + 1, :] = x_ref[...].astype(cdt)
            d = dwconv3x3(pad_ref, dw_ref[...])
            d = _relu6(d + b2_ref[...].reshape(1, 1, 1, Cph))
            project_and_store(d, w3_ref[...], b3_ref[...], x_ref, o_ref)

    return kernel


def bottleneck_forward_nhwc(x_nhwc, params, *, expansion_factor, in_filters,
                            out_filters, stride, compute_dtype=jnp.float32,
                            mxu_dtype=jnp.bfloat16):
    """NHWC fast path: (N, H, W, Cin) f32 -> (N, Ho, Wo, Cout) f32.

    mxu_dtype controls the 1x1-conv MXU operand dtype (bf16 default: native
    MXU mode on all generations, f32 accumulation).  compute_dtype controls
    the depthwise/VPU path and scratch (keep f32 on v5e; bf16 halves the VALU
    and scratch cost on v6e/v7x).
    """
    N, H, W, C = x_nhwc.shape
    assert C == in_filters
    Chid = expansion_factor * in_filters
    addition = (in_filters == out_filters) and (stride == 1)
    has_expand = expansion_factor != 1
    Ho = (H + 2 - 3) // stride + 1
    Wo = (W + 2 - 3) // stride + 1
    # Hidden channels are padded to a lane-dense width only when they come out
    # of the expand matmul; the padding exists purely on-chip (never in HBM).
    Cph = _round_up(Chid, LANES) if has_expand else Chid
    Cin, Cout = in_filters, out_filters

    # Fold BN scales into conv weights at trace time; cast MXU weights to the
    # MXU operand dtype and the depthwise weight to the VPU compute dtype.
    weight_args = []
    if has_expand:
        weight_args.append(
            _pad_last(params["w1"] * params["s1"], Cph).astype(mxu_dtype))
        weight_args.append(_pad_last(params["b1"], Cph))
    weight_args.append(
        _pad_last(params["dw"] * params["s2"].reshape(1, 1, Chid),
                  Cph).astype(compute_dtype))
    weight_args.append(_pad_last(params["b2"], Cph))
    weight_args.append(
        _pad_rows(params["w3"] * params["s3"], Cph).astype(mxu_dtype))
    weight_args.append(params["b3"])

    try:
        vmem_cap = int(pltpu.get_tpu_info().vmem_capacity_bytes)
    except Exception:
        vmem_cap = 128 * 1024 * 1024
    # ~3/4 of per-core capacity: ~48 MiB on v7x, ~96 MiB on v5e/v6e.
    vmem_limit = (vmem_cap * 3) // 4

    per_image = _vmem_bytes_per_image(H, W, Ho, Wo, Cin, Cout, Cph,
                                      has_expand, compute_dtype)
    BT = _pick_batch_tile(N, per_image, budget=vmem_limit // 2,
                          min_steps=min(N, _num_tensorcores()))

    kernel = _make_kernel(BT, H, W, Ho, Wo, Cin, Cout, Cph, stride,
                          has_expand, addition, compute_dtype)

    # Input/output blocks use the TRUE channel extent (full last dim), so HBM
    # traffic is not inflated by channel padding.
    in_specs = [pl.BlockSpec((BT, H, W, Cin), lambda n: (n, 0, 0, 0))]
    in_specs += [_full_spec(a) for a in weight_args]

    return pl.pallas_call(
        kernel,
        out_shape=jax.ShapeDtypeStruct((N, Ho, Wo, Cout), x_nhwc.dtype),
        grid=(N // BT,),
        in_specs=in_specs,
        out_specs=pl.BlockSpec((BT, Ho, Wo, Cout), lambda n: (n, 0, 0, 0)),
        scratch_shapes=[pltpu.VMEM((BT, H + 2, W + 2, Cph), compute_dtype)],
        compiler_params=pltpu.CompilerParams(
            dimension_semantics=("parallel",),
            vmem_limit_bytes=int(vmem_limit)),
    )(x_nhwc, *weight_args)


def bottleneck_forward(x_nchw, params, *, expansion_factor, in_filters,
                       out_filters, stride, compute_dtype=jnp.float32,
                       mxu_dtype=jnp.bfloat16):
    """PyTorch-compatible wrapper: NCHW in / NCHW out.  The transposes operate
    on true-channel-count tensors; prefer bottleneck_forward_nhwc to avoid
    them entirely."""
    x_nhwc = jnp.transpose(x_nchw, (0, 2, 3, 1))
    out = bottleneck_forward_nhwc(x_nhwc, params,
                                  expansion_factor=expansion_factor,
                                  in_filters=in_filters,
                                  out_filters=out_filters, stride=stride,
                                  compute_dtype=compute_dtype,
                                  mxu_dtype=mxu_dtype)
    return jnp.transpose(out, (0, 3, 1, 2))


def init_params(key, expansion_factor, in_filters, out_filters):
    Chid = expansion_factor * in_filters
    ks = jax.random.split(key, 9)

    def bn(kg, kb, c):
        gamma = jax.random.uniform(kg, (c,), jnp.float32, 0.5, 1.5)
        beta = jax.random.normal(kb, (c,), jnp.float32) * 0.1
        mean = jnp.zeros((c,), jnp.float32)   # PyTorch running_mean init
        var = jnp.ones((c,), jnp.float32)     # PyTorch running_var init
        return _fold_bn(gamma, beta, mean, var)

    p = {}
    if expansion_factor != 1:
        # 1x1 expand conv, stored (Cin, Chid) == torch weight (Chid, Cin, 1, 1).T
        p["w1"] = jax.random.normal(ks[0], (in_filters, Chid), jnp.float32) * 0.2
        p["s1"], p["b1"] = bn(ks[1], ks[2], Chid)
    # depthwise 3x3, stored (3, 3, Chid) == torch weight (Chid, 1, 3, 3) permuted
    p["dw"] = jax.random.normal(ks[3], (3, 3, Chid), jnp.float32) * 0.2
    p["s2"], p["b2"] = bn(ks[4], ks[5], Chid)
    # 1x1 project conv, stored (Chid, Cout)
    p["w3"] = jax.random.normal(ks[6], (Chid, out_filters), jnp.float32) * 0.2
    p["s3"], p["b3"] = bn(ks[7], ks[8], out_filters)
    return p


def reference_forward(x_nchw, params, *, expansion_factor, in_filters,
                      out_filters, stride):
    """Plain-JAX (lax.conv, f32) reference mirroring the PyTorch module."""
    Chid = expansion_factor * in_filters
    addition = (in_filters == out_filters) and (stride == 1)
    dn = ("NCHW", "OIHW", "NCHW")
    prec = lax.Precision.HIGHEST
    h = x_nchw.astype(jnp.float32)
    if expansion_factor != 1:
        w1 = params["w1"].T.reshape(Chid, in_filters, 1, 1)
        h = lax.conv_general_dilated(h, w1, (1, 1), "VALID",
                                     dimension_numbers=dn, precision=prec)
        h = (h * params["s1"].reshape(1, Chid, 1, 1)
             + params["b1"].reshape(1, Chid, 1, 1))
        h = jnp.clip(h, 0.0, 6.0)
    dw = jnp.transpose(params["dw"], (2, 0, 1)).reshape(Chid, 1, 3, 3)
    h = lax.conv_general_dilated(h, dw, (stride, stride), ((1, 1), (1, 1)),
                                 dimension_numbers=dn,
                                 feature_group_count=Chid, precision=prec)
    h = (h * params["s2"].reshape(1, Chid, 1, 1)
         + params["b2"].reshape(1, Chid, 1, 1))
    h = jnp.clip(h, 0.0, 6.0)
    w3 = params["w3"].T.reshape(out_filters, Chid, 1, 1)
    h = lax.conv_general_dilated(h, w3, (1, 1), "VALID",
                                 dimension_numbers=dn, precision=prec)
    h = (h * params["s3"].reshape(1, out_filters, 1, 1)
         + params["b3"].reshape(1, out_filters, 1, 1))
    if addition:
        h = h + x_nchw.astype(jnp.float32)
    return h


if __name__ == "__main__":
    key = jax.random.PRNGKey(0)
    N, H, W = 2, 16, 16
    configs = [
        # (expansion_factor, in_filters, out_filters, stride)
        (2, 4, 4, 1),   # expand path + residual add
        (1, 8, 8, 1),   # expansion_factor == 1 path (no expand conv) + residual
    ]
    for (expansion_factor, in_filters, out_filters, stride) in configs:
        key, kx, kp = jax.random.split(key, 3)
        x = jax.random.normal(kx, (N, in_filters, H, W), jnp.float32)  # NCHW
        params = init_params(kp, expansion_factor, in_filters, out_filters)

        ref = reference_forward(x, params,
                                expansion_factor=expansion_factor,
                                in_filters=in_filters,
                                out_filters=out_filters, stride=stride)

        # Exact-precision path (f32 MXU operands): tight check.
        out_f32 = bottleneck_forward(x, params,
                                     expansion_factor=expansion_factor,
                                     in_filters=in_filters,
                                     out_filters=out_filters, stride=stride,
                                     mxu_dtype=jnp.float32)
        out_f32 = jax.block_until_ready(out_f32)
        assert out_f32.shape == ref.shape, (out_f32.shape, ref.shape)
        err_f32 = float(jnp.max(jnp.abs(out_f32 - ref)))
        assert jnp.allclose(out_f32, ref, rtol=1e-3, atol=1e-3), (
            "f32", expansion_factor, in_filters, out_filters, stride, err_f32)

        # Default fast path (bf16 MXU operands, f32 accumulation): bf16
        # operand rounding gives O(1e-2) absolute deviation from exact f32.
        out_bf16 = bottleneck_forward(x, params,
                                      expansion_factor=expansion_factor,
                                      in_filters=in_filters,
                                      out_filters=out_filters, stride=stride)
        out_bf16 = jax.block_until_ready(out_bf16)
        assert out_bf16.shape == ref.shape, (out_bf16.shape, ref.shape)
        err_bf16 = float(jnp.max(jnp.abs(out_bf16 - ref)))
        assert jnp.allclose(out_bf16, ref, rtol=5e-2, atol=5e-2), (
            "bf16", expansion_factor, in_filters, out_filters, stride, err_bf16)
    print("KERNEL_OK")
</pallas_src>

<mosaic_0001>
module attributes {stable_mosaic.version = 11 : i64} {
  func.func @kernel(%arg0: i32, %arg1: memref<2x16x16x4xf32, #tpu.memory_space<vmem>>, %arg2: memref<4x128xf32, #tpu.memory_space<vmem>>, %arg3: memref<1x128xf32, #tpu.memory_space<vmem>>, %arg4: memref<3x3x128xf32, #tpu.memory_space<vmem>>, %arg5: memref<1x128xf32, #tpu.memory_space<vmem>>, %arg6: memref<128x4xf32, #tpu.memory_space<vmem>>, %arg7: memref<1x4xf32, #tpu.memory_space<vmem>>, %arg8: memref<2x16x16x4xf32, #tpu.memory_space<vmem>>, %arg9: memref<2x18x18x128xf32, #tpu.memory_space<vmem>>) attributes {dimension_semantics = [#tpu.dimension_semantics<parallel>], iteration_bounds = array<i64: 1>, scalar_prefetch = 0 : i64, scratch_operands = 1 : i64, tpu.core_type = #tpu.core_type<tc>, window_params = [{transform_indices = @transform_0, window_bounds = array<i64: 2, 16, 16, 4>}, {pipeline_mode = #tpu.pipeline_mode<synchronous>, transform_indices = @transform_1, window_bounds = array<i64: 4, 128>}, {pipeline_mode = #tpu.pipeline_mode<synchronous>, transform_indices = @transform_2, window_bounds = array<i64: 1, 128>}, {pipeline_mode = #tpu.pipeline_mode<synchronous>, transform_indices = @transform_3, window_bounds = array<i64: 3, 3, 128>}, {pipeline_mode = #tpu.pipeline_mode<synchronous>, transform_indices = @transform_4, window_bounds = array<i64: 1, 128>}, {pipeline_mode = #tpu.pipeline_mode<synchronous>, transform_indices = @transform_5, window_bounds = array<i64: 128, 4>}, {pipeline_mode = #tpu.pipeline_mode<synchronous>, transform_indices = @transform_6, window_bounds = array<i64: 1, 4>}, {transform_indices = @transform_7, window_bounds = array<i64: 2, 16, 16, 4>}]} {
    %cst = arith.constant 0.000000e+00 : f32
    %0 = vector.broadcast %cst : f32 to vector<2x1x18x128xf32>
    %c0 = arith.constant 0 : index
    %c0_0 = arith.constant 0 : index
    %c0_1 = arith.constant 0 : index
    %c0_2 = arith.constant 0 : index
    %1 = vector.load %arg9[%c0, %c0_0, %c0_1, %c0_2] : memref<2x18x18x128xf32, #tpu.memory_space<vmem>>, vector<2x1x18x128xf32>
    tpu.vector_store %arg9[%c0, %c0_0, %c0_1, %c0_2], %0 {strides = array<i32>} : memref<2x18x18x128xf32, #tpu.memory_space<vmem>>, vector<2x1x18x128xf32>,
    %cst_3 = arith.constant 0.000000e+00 : f32
    %2 = vector.broadcast %cst_3 : f32 to vector<2x1x18x128xf32>
    %c0_4 = arith.constant 0 : index
    %c17 = arith.constant 17 : index
    %c0_5 = arith.constant 0 : index
    %c0_6 = arith.constant 0 : index
    %3 = vector.load %arg9[%c0_4, %c17, %c0_5, %c0_6] : memref<2x18x18x128xf32, #tpu.memory_space<vmem>>, vector<2x1x18x128xf32>
    tpu.vector_store %arg9[%c0_4, %c17, %c0_5, %c0_6], %2 {strides = array<i32>} : memref<2x18x18x128xf32, #tpu.memory_space<vmem>>, vector<2x1x18x128xf32>,
    %cst_7 = arith.constant 0.000000e+00 : f32
    %4 = vector.broadcast %cst_7 : f32 to vector<2x18x1x128xf32>
    %c0_8 = arith.constant 0 : index
    %c0_9 = arith.constant 0 : index
    %c0_10 = arith.constant 0 : index
    %c0_11 = arith.constant 0 : index
    %5 = vector.load %arg9[%c0_8, %c0_9, %c0_10, %c0_11] : memref<2x18x18x128xf32, #tpu.memory_space<vmem>>, vector<2x18x1x128xf32>
    tpu.vector_store %arg9[%c0_8, %c0_9, %c0_10, %c0_11], %4 {strides = array<i32>} : memref<2x18x18x128xf32, #tpu.memory_space<vmem>>, vector<2x18x1x128xf32>,
    %cst_12 = arith.constant 0.000000e+00 : f32
    %6 = vector.broadcast %cst_12 : f32 to vector<2x18x1x128xf32>
    %c0_13 = arith.constant 0 : index
    %c0_14 = arith.constant 0 : index
    %c17_15 = arith.constant 17 : index
    %c0_16 = arith.constant 0 : index
    %7 = vector.load %arg9[%c0_13, %c0_14, %c17_15, %c0_16] : memref<2x18x18x128xf32, #tpu.memory_space<vmem>>, vector<2x18x1x128xf32>
    tpu.vector_store %arg9[%c0_13, %c0_14, %c17_15, %c0_16], %6 {strides = array<i32>} : memref<2x18x18x128xf32, #tpu.memory_space<vmem>>, vector<2x18x1x128xf32>,
    %c0_17 = arith.constant 0 : index
    %c0_18 = arith.constant 0 : index
    %8 = vector.load %arg2[%c0_17, %c0_18] : memref<4x128xf32, #tpu.memory_space<vmem>>, vector<4x128xf32>
    %c0_19 = arith.constant 0 : index
    %c0_20 = arith.constant 0 : index
    %c0_21 = arith.constant 0 : index
    %c0_22 = arith.constant 0 : index
    %9 = vector.load %arg1[%c0_19, %c0_20, %c0_21, %c0_22] : memref<2x16x16x4xf32, #tpu.memory_space<vmem>>, vector<2x16x16x4xf32>
    %10 = vector.shape_cast %9 : vector<2x16x16x4xf32> to vector<512x4xf32>
    %cst_23 = arith.constant dense<0.000000e+00> : vector<512x128xf32>
    %11 = tpu.matmul %10, %8, %cst_23 {dimension_numbers = #tpu.dot_dimension_numbers<[1], [0], [0], [1], [0, 0, 1, 1], [], []>} : vector<512x4xf32>, vector<4x128xf32>, vector<512x128xf32> -> vector<512x128xf32>
    %c0_24 = arith.constant 0 : index
    %c0_25 = arith.constant 0 : index
    %12 = vector.load %arg3[%c0_24, %c0_25] : memref<1x128xf32, #tpu.memory_space<vmem>>, vector<1x128xf32>
    %13 = vector.broadcast %12 : vector<1x128xf32> to vector<512x128xf32>
    %14 = arith.addf %11, %13 : vector<512x128xf32>
    %cst_26 = arith.constant 0.000000e+00 : f32
    %15 = vector.broadcast %cst_26 : f32 to vector<512x128xf32>
    %16 = arith.maximumf %14, %15 : vector<512x128xf32>
    %cst_27 = arith.constant 6.000000e+00 : f32
    %17 = vector.broadcast %cst_27 : f32 to vector<512x128xf32>
    %18 = arith.minimumf %16, %17 : vector<512x128xf32>
    %19 = vector.shape_cast %18 : vector<512x128xf32> to vector<2x16x16x128xf32>
    %c0_28 = arith.constant 0 : index
    %c1 = arith.constant 1 : index
    %c1_29 = arith.constant 1 : index
    %c0_30 = arith.constant 0 : index
    %20 = vector.load %arg9[%c0_28, %c1, %c1_29, %c0_30] : memref<2x18x18x128xf32, #tpu.memory_space<vmem>>, vector<2x16x16x128xf32>
    tpu.vector_store %arg9[%c0_28, %c1, %c1_29, %c0_30], %19 {strides = array<i32>} : memref<2x18x18x128xf32, #tpu.memory_space<vmem>>, vector<2x16x16x128xf32>,
    %c0_31 = arith.constant 0 : index
    %c0_32 = arith.constant 0 : index
    %c0_33 = arith.constant 0 : index
    %21 = vector.load %arg4[%c0_31, %c0_32, %c0_33] : memref<3x3x128xf32, #tpu.memory_space<vmem>>, vector<3x3x128xf32>
    %c0_34 = arith.constant 0 : index
    %c0_35 = arith.constant 0 : index
    %c0_36 = arith.constant 0 : index
    %c0_37 = arith.constant 0 : index
    %22 = vector.load %arg9[%c0_34, %c0_35, %c0_36, %c0_37] : memref<2x18x18x128xf32, #tpu.memory_space<vmem>>, vector<2x16x16x128xf32>
    %23 = vector.extract_strided_slice %21 {offsets = [0, 0, 0], sizes = [1, 1, 128], strides = [1, 1, 1]} : vector<3x3x128xf32> to vector<1x1x128xf32>
    %24 = vector.shape_cast %23 : vector<1x1x128xf32> to vector<1x1x1x128xf32>
    %25 = vector.broadcast %24 : vector<1x1x1x128xf32> to vector<2x16x16x128xf32>
    %26 = arith.mulf %22, %25 : vector<2x16x16x128xf32>
    %c0_38 = arith.constant 0 : index
    %c0_39 = arith.constant 0 : index
    %c1_40 = arith.constant 1 : index
    %c0_41 = arith.constant 0 : index
    %27 = vector.load %arg9[%c0_38, %c0_39, %c1_40, %c0_41] : memref<2x18x18x128xf32, #tpu.memory_space<vmem>>, vector<2x16x16x128xf32>
    %28 = vector.extract_strided_slice %21 {offsets = [0, 1, 0], sizes = [1, 1, 128], strides = [1, 1, 1]} : vector<3x3x128xf32> to vector<1x1x128xf32>
    %29 = vector.shape_cast %28 : vector<1x1x128xf32> to vector<1x1x1x128xf32>
    %30 = vector.broadcast %29 : vector<1x1x1x128xf32> to vector<2x16x16x128xf32>
    %31 = arith.mulf %27, %30 : vector<2x16x16x128xf32>
    %32 = arith.addf %26, %31 : vector<2x16x16x128xf32>
    %c0_42 = arith.constant 0 : index
    %c0_43 = arith.constant 0 : index
    %c2 = arith.constant 2 : index
    %c0_44 = arith.constant 0 : index
    %33 = vector.load %arg9[%c0_42, %c0_43, %c2, %c0_44] : memref<2x18x18x128xf32, #tpu.memory_space<vmem>>, vector<2x16x16x128xf32>
    %34 = vector.extract_strided_slice %21 {offsets = [0, 2, 0], sizes = [1, 1, 128], strides = [1, 1, 1]} : vector<3x3x128xf32> to vector<1x1x128xf32>
    %35 = vector.shape_cast %34 : vector<1x1x128xf32> to vector<1x1x1x128xf32>
    %36 = vector.broadcast %35 : vector<1x1x1x128xf32> to vector<2x16x16x128xf32>
    %37 = arith.mulf %33, %36 : vector<2x16x16x128xf32>
    %38 = arith.addf %32, %37 : vector<2x16x16x128xf32>
    %c0_45 = arith.constant 0 : index
    %c1_46 = arith.constant 1 : index
    %c0_47 = arith.constant 0 : index
    %c0_48 = arith.constant 0 : index
    %39 = vector.load %arg9[%c0_45, %c1_46, %c0_47, %c0_48] : memref<2x18x18x128xf32, #tpu.memory_space<vmem>>, vector<2x16x16x128xf32>
    %40 = vector.extract_strided_slice %21 {offsets = [1, 0, 0], sizes = [1, 1, 128], strides = [1, 1, 1]} : vector<3x3x128xf32> to vector<1x1x128xf32>
    %41 = vector.shape_cast %40 : vector<1x1x128xf32> to vector<1x1x1x128xf32>
    %42 = vector.broadcast %41 : vector<1x1x1x128xf32> to vector<2x16x16x128xf32>
    %43 = arith.mulf %39, %42 : vector<2x16x16x128xf32>
    %44 = arith.addf %38, %43 : vector<2x16x16x128xf32>
    %c0_49 = arith.constant 0 : index
    %c1_50 = arith.constant 1 : index
    %c1_51 = arith.constant 1 : index
    %c0_52 = arith.constant 0 : index
    %45 = vector.load %arg9[%c0_49, %c1_50, %c1_51, %c0_52] : memref<2x18x18x128xf32, #tpu.memory_space<vmem>>, vector<2x16x16x128xf32>
    %46 = vector.extract_strided_slice %21 {offsets = [1, 1, 0], sizes = [1, 1, 128], strides = [1, 1, 1]} : vector<3x3x128xf32> to vector<1x1x128xf32>
    %47 = vector.shape_cast %46 : vector<1x1x128xf32> to vector<1x1x1x128xf32>
    %48 = vector.broadcast %47 : vector<1x1x1x128xf32> to vector<2x16x16x128xf32>
    %49 = arith.mulf %45, %48 : vector<2x16x16x128xf32>
    %50 = arith.addf %44, %49 : vector<2x16x16x128xf32>
    %c0_53 = arith.constant 0 : index
    %c1_54 = arith.constant 1 : index
    %c2_55 = arith.constant 2 : index
    %c0_56 = arith.constant 0 : index
    %51 = vector.load %arg9[%c0_53, %c1_54, %c2_55, %c0_56] : memref<2x18x18x128xf32, #tpu.memory_space<vmem>>, vector<2x16x16x128xf32>
    %52 = vector.extract_strided_slice %21 {offsets = [1, 2, 0], sizes = [1, 1, 128], strides = [1, 1, 1]} : vector<3x3x128xf32> to vector<1x1x128xf32>
    %53 = vector.shape_cast %52 : vector<1x1x128xf32> to vector<1x1x1x128xf32>
    %54 = vector.broadcast %53 : vector<1x1x1x128xf32> to vector<2x16x16x128xf32>
    %55 = arith.mulf %51, %54 : vector<2x16x16x128xf32>
    %56 = arith.addf %50, %55 : vector<2x16x16x128xf32>
    %c0_57 = arith.constant 0 : index
    %c2_58 = arith.constant 2 : index
    %c0_59 = arith.constant 0 : index
    %c0_60 = arith.constant 0 : index
    %57 = vector.load %arg9[%c0_57, %c2_58, %c0_59, %c0_60] : memref<2x18x18x128xf32, #tpu.memory_space<vmem>>, vector<2x16x16x128xf32>
    %58 = vector.extract_strided_slice %21 {offsets = [2, 0, 0], sizes = [1, 1, 128], strides = [1, 1, 1]} : vector<3x3x128xf32> to vector<1x1x128xf32>
    %59 = vector.shape_cast %58 : vector<1x1x128xf32> to vector<1x1x1x128xf32>
    %60 = vector.broadcast %59 : vector<1x1x1x128xf32> to vector<2x16x16x128xf32>
    %61 = arith.mulf %57, %60 : vector<2x16x16x128xf32>
    %62 = arith.addf %56, %61 : vector<2x16x16x128xf32>
    %c0_61 = arith.constant 0 : index
    %c2_62 = arith.constant 2 : index
    %c1_63 = arith.constant 1 : index
    %c0_64 = arith.constant 0 : index
    %63 = vector.load %arg9[%c0_61, %c2_62, %c1_63, %c0_64] : memref<2x18x18x128xf32, #tpu.memory_space<vmem>>, vector<2x16x16x128xf32>
    %64 = vector.extract_strided_slice %21 {offsets = [2, 1, 0], sizes = [1, 1, 128], strides = [1, 1, 1]} : vector<3x3x128xf32> to vector<1x1x128xf32>
    %65 = vector.shape_cast %64 : vector<1x1x128xf32> to vector<1x1x1x128xf32>
    %66 = vector.broadcast %65 : vector<1x1x1x128xf32> to vector<2x16x16x128xf32>
    %67 = arith.mulf %63, %66 : vector<2x16x16x128xf32>
    %68 = arith.addf %62, %67 : vector<2x16x16x128xf32>
    %c0_65 = arith.constant 0 : index
    %c2_66 = arith.constant 2 : index
    %c2_67 = arith.constant 2 : index
    %c0_68 = arith.constant 0 : index
    %69 = vector.load %arg9[%c0_65, %c2_66, %c2_67, %c0_68] : memref<2x18x18x128xf32, #tpu.memory_space<vmem>>, vector<2x16x16x128xf32>
    %70 = vector.extract_strided_slice %21 {offsets = [2, 2, 0], sizes = [1, 1, 128], strides = [1, 1, 1]} : vector<3x3x128xf32> to vector<1x1x128xf32>
    %71 = vector.shape_cast %70 : vector<1x1x128xf32> to vector<1x1x1x128xf32>
    %72 = vector.broadcast %71 : vector<1x1x1x128xf32> to vector<2x16x16x128xf32>
    %73 = arith.mulf %69, %72 : vector<2x16x16x128xf32>
    %74 = arith.addf %68, %73 : vector<2x16x16x128xf32>
    %c0_69 = arith.constant 0 : index
    %c0_70 = arith.constant 0 : index
    %75 = vector.load %arg5[%c0_69, %c0_70] : memref<1x128xf32, #tpu.memory_space<vmem>>, vector<1x128xf32>
    %76 = vector.shape_cast %75 : vector<1x128xf32> to vector<1x1x1x128xf32>
    %77 = vector.broadcast %76 : vector<1x1x1x128xf32> to vector<2x16x16x128xf32>
    %78 = arith.addf %74, %77 : vector<2x16x16x128xf32>
    %cst_71 = arith.constant 0.000000e+00 : f32
    %79 = vector.broadcast %cst_71 : f32 to vector<2x16x16x128xf32>
    %80 = arith.maximumf %78, %79 : vector<2x16x16x128xf32>
    %cst_72 = arith.constant 6.000000e+00 : f32
    %81 = vector.broadcast %cst_72 : f32 to vector<2x16x16x128xf32>
    %82 = arith.minimumf %80, %81 : vector<2x16x16x128xf32>
    %c0_73 = arith.constant 0 : index
    %c0_74 = arith.constant 0 : index
    %83 = vector.load %arg6[%c0_73, %c0_74] : memref<128x4xf32, #tpu.memory_space<vmem>>, vector<128x4xf32>
    %c0_75 = arith.constant 0 : index
    %c0_76 = arith.constant 0 : index
    %84 = vector.load %arg7[%c0_75, %c0_76] : memref<1x4xf32, #tpu.memory_space<vmem>>, vector<1x4xf32>
    %85 = vector.shape_cast %82 : vector<2x16x16x128xf32> to vector<512x128xf32>
    %cst_77 = arith.constant dense<0.000000e+00> : vector<512x4xf32>
    %86 = tpu.matmul %85, %83, %cst_77 {dimension_numbers = #tpu.dot_dimension_numbers<[1], [0], [0], [1], [0, 0, 1, 1], [], []>} : vector<512x128xf32>, vector<128x4xf32>, vector<512x4xf32> -> vector<512x4xf32>
    %87 = vector.broadcast %84 : vector<1x4xf32> to vector<512x4xf32>
    %88 = arith.addf %86, %87 : vector<512x4xf32>
    %c0_78 = arith.constant 0 : index
    %c0_79 = arith.constant 0 : index
    %c0_80 = arith.constant 0 : index
    %c0_81 = arith.constant 0 : index
    %89 = vector.load %arg1[%c0_78, %c0_79, %c0_80, %c0_81] : memref<2x16x16x4xf32, #tpu.memory_space<vmem>>, vector<2x16x16x4xf32>
    %90 = vector.shape_cast %89 : vector<2x16x16x4xf32> to vector<512x4xf32>
    %91 = arith.addf %88, %90 : vector<512x4xf32>
    %92 = vector.shape_cast %91 : vector<512x4xf32> to vector<2x16x16x4xf32>
    %c0_82 = arith.constant 0 : index
    %c0_83 = arith.constant 0 : index
    %c0_84 = arith.constant 0 : index
    %c0_85 = arith.constant 0 : index
    %93 = vector.load %arg8[%c0_82, %c0_83, %c0_84, %c0_85] : memref<2x16x16x4xf32, #tpu.memory_space<vmem>>, vector<2x16x16x4xf32>
    tpu.vector_store %arg8[%c0_82, %c0_83, %c0_84, %c0_85], %92 {strides = array<i32>} : memref<2x16x16x4xf32, #tpu.memory_space<vmem>>, vector<2x16x16x4xf32>,
    return
  }
  func.func @transform_0(%arg0: i32) -> (i32, i32, i32, i32) {
    %c0_i32 = arith.constant 0 : i32
    %c0_i32_0 = arith.constant 0 : i32
    %c0_i32_1 = arith.constant 0 : i32
    %c0_i32_2 = arith.constant 0 : i32
    return %arg0, %c0_i32, %c0_i32_0, %c0_i32_1 : i32, i32, i32, i32
  }
  func.func @transform_1(%arg0: i32) -> (i32, i32) {
    %c0_i32 = arith.constant 0 : i32
    %c0_i32_0 = arith.constant 0 : i32
    %c0_i32_1 = arith.constant 0 : i32
    return %c0_i32, %c0_i32_0 : i32, i32
  }
  func.func @transform_2(%arg0: i32) -> (i32, i32) {
    %c0_i32 = arith.constant 0 : i32
    %c0_i32_0 = arith.constant 0 : i32
    %c0_i32_1 = arith.constant 0 : i32
    return %c0_i32, %c0_i32_0 : i32, i32
  }
  func.func @transform_3(%arg0: i32) -> (i32, i32, i32) {
    %c0_i32 = arith.constant 0 : i32
    %c0_i32_0 = arith.constant 0 : i32
    %c0_i32_1 = arith.constant 0 : i32
    %c0_i32_2 = arith.constant 0 : i32
    return %c0_i32, %c0_i32_0, %c0_i32_1 : i32, i32, i32
  }
  func.func @transform_4(%arg0: i32) -> (i32, i32) {
    %c0_i32 = arith.constant 0 : i32
    %c0_i32_0 = arith.constant 0 : i32
    %c0_i32_1 = arith.constant 0 : i32
    return %c0_i32, %c0_i32_0 : i32, i32
  }
  func.func @transform_5(%arg0: i32) -> (i32, i32) {
    %c0_i32 = arith.constant 0 : i32
    %c0_i32_0 = arith.constant 0 : i32
    %c0_i32_1 = arith.constant 0 : i32
    return %c0_i32, %c0_i32_0 : i32, i32
  }
  func.func @transform_6(%arg0: i32) -> (i32, i32) {
    %c0_i32 = arith.constant 0 : i32
    %c0_i32_0 = arith.constant 0 : i32
    %c0_i32_1 = arith.constant 0 : i32
    return %c0_i32, %c0_i32_0 : i32, i32
  }
  func.func @transform_7(%arg0: i32) -> (i32, i32, i32, i32) {
    %c0_i32 = arith.constant 0 : i32
    %c0_i32_0 = arith.constant 0 : i32
    %c0_i32_1 = arith.constant 0 : i32
    %c0_i32_2 = arith.constant 0 : i32
    return %arg0, %c0_i32, %c0_i32_0, %c0_i32_1 : i32, i32, i32, i32
  }
}

</mosaic_0001>

<bundles_post_ra>
// kernel: tpu_custom_call.1
= control target key start
LH: loop header
LB: loop body
LE: loop exit
PB: predicated region body
PF: predicated region fallthrough
CT: control target
= control target key end

     0   :  { %12 = vsyncpa [#allocation4], 0  ;;  %s6551_s0 = inlined_call_operand.hbm [shape: f32[2,16,16,4], index: 0, kind: input, shape index: {}]   ;;  %s6552_s1 = inlined_call_operand.hbm [shape: f32[4,128], index: 1, kind: input, shape index: {}]   ;;  %s6553_s2 = inlined_call_operand.hbm [shape: f32[1,128], index: 2, kind: input, shape index: {}]   ;;  %s6554_s3 = inlined_call_operand.hbm [shape: f32[3,3,128], index: 3, kind: input, shape index: {}]   ;;  %s6555_s4 = inlined_call_operand.hbm [shape: f32[1,128], index: 4, kind: input, shape index: {}]   ;;  %s6556_s5 = inlined_call_operand.hbm [shape: f32[128,4], index: 5, kind: input, shape index: {}]   ;;  %s6557_s6 = inlined_call_operand.hbm [shape: f32[1,4], index: 6, kind: input, shape index: {}]   ;;  %s6558_s7 = inlined_call_operand.hbm [shape: f32[2,16,16,4], index: 7, kind: output, shape index: {}]  }
   0x1   :  { %13 = vsyncpa [#allocation7], 0 }
   0x2   :  { %14 = vsyncpa [#allocation10], 0 }
   0x3   :  { %15 = vsyncpa [#allocation13], 0 }
   0x4   :  { %16 = vsyncpa [#allocation5], 0  ;;  %s4262_s24 = smov [#allocation6]   ;;  %s4263_s26 = smov [#allocation9]  }
   0x5   :  { %s35_s25 = sshll.u32 %s4262_s24, 4  ;;  %s54_s27 = sshll.u32 %s4263_s26, 4  ;;  %s36_s25 = int_to_ptr.vmem [resolvable:$true] %s35_s25  ;;  %s4315_s27 = int_to_ptr.vmem [resolvable:$true] %s54_s27 }
   0x6   :  { %s4076_s30 = scalar_lea.hbm %s6552_s1, 64 }
   0x7   :  { %p4077_p0 = scmp.ne.s32.totalorder %s6552_s1, %s4076_s30  ;;  %p4080_p1 = scmp.lt.u32.totalorder %s4076_s30, %s6552_s1 }
   0x9   :  { %p4082_p2 = pnand %p4080_p1, %p4077_p0 }
   0xb   :  { %4085 = shalt.err (!%p4082_p2)
}
   0xc   :  { %s4086_s12 = scalar_lea.vmem %s36_s25, 64  ;;  %p4091_p4 = scmp.lt.s32.totalorder %s36_s25, %s36_s25 }
   0xd   :  { %p4087_p3 = scmp.ne.s32.totalorder %s36_s25, %s4086_s12  ;;  %p4092_p5 = scmp.lt.s32.totalorder %s4086_s12, %s4086_s12 }
   0xf   :  { %p4093_p6 = por %p4092_p5, %p4091_p4 }
  0x11   :  { %p4094_p7 = pnand %p4093_p6, %p4087_p3 }
  0x13   :  { %4097 = shalt.err (!%p4094_p7)
}
  0x14   :  { %38 = dma.hbm_to_vmem [thread:$0]  %s6552_s1, 64, %s36_s25, [#allocation7]  }
  0x15   :  { %s4098_s17 = scalar_lea.hbm %s6554_s3, 192 }
  0x16   :  { %p4099_p8 = scmp.ne.s32.totalorder %s6554_s3, %s4098_s17  ;;  %p4102_p9 = scmp.lt.u32.totalorder %s4098_s17, %s6554_s3 }
  0x18   :  { %p4104_p10 = pnand %p4102_p9, %p4099_p8 }
  0x1a   :  { %4107 = shalt.err (!%p4104_p10)
}
  0x1b   :  { %s4108_s22 = scalar_lea.vmem %s4315_s27, 192  ;;  %p4113_p12 = scmp.lt.s32.totalorder %s4315_s27, %s4315_s27 }
  0x1c   :  { %p4109_p11 = scmp.ne.s32.totalorder %s4315_s27, %s4108_s22  ;;  %p4114_p13 = scmp.lt.s32.totalorder %s4108_s22, %s4108_s22 }
  0x1e   :  { %p4115_p0 = por %p4114_p13, %p4113_p12 }
  0x20   :  { %p4116_p1 = pnand %p4115_p0, %p4109_p11 }
  0x22   :  { %4119 = shalt.err (!%p4116_p1)
}
  0x23   :  { %s4264_s1 = smov 64   ;;  %s4265_s23 = smov 4  }
  0x24   :  { %60 = dma.hbm_to_vmem [thread:$0]  %s6554_s3, 192, %s4315_s27, [#allocation10], %s4264_s1, %s4264_s1, %s4265_s23  }
  0x25   :  { %s4266_s26 = smov [#allocation12]   ;;  %s4267_s29 = smov [#allocation3]  }
  0x26   :  { %s76_s28 = sshll.u32 %s4266_s26, 4  ;;  %s22_s30 = sshll.u32 %s4267_s29, 4  ;;  %s77_s28 = int_to_ptr.vmem [resolvable:$true] %s76_s28  ;;  %s4346_s30 = int_to_ptr.vmem [resolvable:$true] %s22_s30 }
  0x27   :  { %s4120_s10 = scalar_lea.hbm %s6556_s5, 2048 }
  0x28   :  { %p4121_p2 = scmp.ne.s32.totalorder %s6556_s5, %s4120_s10  ;;  %p4124_p3 = scmp.lt.u32.totalorder %s4120_s10, %s6556_s5 }
  0x2a   :  { %p4126_p4 = pnand %p4124_p3, %p4121_p2 }
  0x2c   :  { %4129 = shalt.err (!%p4126_p4)
}
  0x2d   :  { %s4130_s3 = scalar_lea.vmem %s77_s28, 2048  ;;  %p4135_p6 = scmp.lt.s32.totalorder %s77_s28, %s77_s28 }
  0x2e   :  { %p4131_p5 = scmp.ne.s32.totalorder %s77_s28, %s4130_s3  ;;  %p4136_p7 = scmp.lt.s32.totalorder %s4130_s3, %s4130_s3 }
  0x30   :  { %p4137_p8 = por %p4136_p7, %p4135_p6 }
  0x32   :  { %p4138_p9 = pnand %p4137_p8, %p4131_p5 }
  0x34   :  { %4141 = shalt.err (!%p4138_p9)
}
  0x35   :  { %s4268_s27 = smov 128   ;;  %s4269_s15 = smov 8  }
  0x36   :  { %82 = dma.hbm_to_vmem [thread:$0]  %s6556_s5, 2048, %s77_s28, [#allocation13], %s4268_s27, %s4268_s27, %s4269_s15  }
  0x37   :  { %s4142_s20 = scalar_lea.hbm %s6551_s0, 8192 }
  0x38   :  { %p4143_p10 = scmp.ne.s32.totalorder %s6551_s0, %s4142_s20  ;;  %p4146_p11 = scmp.lt.u32.totalorder %s4142_s20, %s6551_s0 }
  0x3a   :  { %p4148_p12 = pnand %p4146_p11, %p4143_p10 }
  0x3c   :  { %4151 = shalt.err (!%p4148_p12)
}
  0x3d   :  { %s4152_s24 = scalar_lea.vmem %s4346_s30, 8192  ;;  %p4157_p0 = scmp.lt.s32.totalorder %s4346_s30, %s4346_s30 }
  0x3e   :  { %p4153_p13 = scmp.ne.s32.totalorder %s4346_s30, %s4152_s24  ;;  %p4158_p1 = scmp.lt.s32.totalorder %s4152_s24, %s4152_s24 }
  0x40   :  { %p4159_p2 = por %p4158_p1, %p4157_p0 }
  0x42   :  { %p4160_p3 = pnand %p4159_p2, %p4153_p13 }
  0x44   :  { %4163 = shalt.err (!%p4160_p3)
}
  0x45   :  { %28 = dma.hbm_to_vmem [thread:$0]  %s6551_s0, 8192, %s4346_s30, [#allocation4], %s4268_s27, %s4268_s27, %s4269_s15  }
  0x46   :  { %s4270_s26 = smov [#allocation8]   ;;  %s4271_s29 = smov [#allocation11]  }
  0x47   :  { %s45_s28 = sshll.u32 %s4270_s26, 4  ;;  %s67_s8 = sshll.u32 %s4271_s29, 4  ;;  %s46_s28 = int_to_ptr.vmem [resolvable:$true] %s45_s28  ;;  %s68_s8 = int_to_ptr.vmem [resolvable:$true] %s67_s8 }
  0x48   :  { %s4164_s11 = scalar_lea.hbm %s6553_s2, 16 }
  0x49   :  { %p4165_p4 = scmp.ne.s32.totalorder %s6553_s2, %s4164_s11  ;;  %p4168_p5 = scmp.lt.u32.totalorder %s4164_s11, %s6553_s2 }
  0x4b   :  { %p4170_p6 = pnand %p4168_p5, %p4165_p4 }
  0x4d   :  { %4173 = shalt.err (!%p4170_p6)
}
  0x4e   :  { %s4174_s0 = scalar_lea.vmem %s46_s28, 16  ;;  %s4178_s30 = scalar_lea.vmem %s46_s28, 32 }
  0x4f   :  { %p4175_p7 = scmp.ne.s32.totalorder %s46_s28, %s4174_s0  ;;  %p4179_p8 = scmp.lt.s32.totalorder %s46_s28, %s46_s28 }
  0x50   :  { %p4180_p9 = scmp.lt.s32.totalorder %s4178_s30, %s4174_s0 }
  0x52   :  { %p4181_p10 = por %p4180_p9, %p4179_p8 }
  0x54   :  { %p4182_p11 = pnand %p4181_p10, %p4175_p7 }
  0x56   :  { %4185 = shalt.err (!%p4182_p11)
}
  0x57   :  { %48 = dma.hbm_to_vmem [thread:$0]  %s6553_s2, 16, %s46_s28, [#allocation7]  }
  0x58   :  { %s4186_s20 = scalar_lea.hbm %s6555_s4, 16 }
  0x59   :  { %p4187_p12 = scmp.ne.s32.totalorder %s6555_s4, %s4186_s20  ;;  %p4190_p13 = scmp.lt.u32.totalorder %s4186_s20, %s6555_s4 }
  0x5b   :  { %p4192_p0 = pnand %p4190_p13, %p4187_p12 }
  0x5d   :  { %4195 = shalt.err (!%p4192_p0)
}
  0x5e   :  { %s4196_s24 = scalar_lea.vmem %s68_s8, 16  ;;  %s4200_s5 = scalar_lea.vmem %s68_s8, 32 }
  0x5f   :  { %p4197_p1 = scmp.ne.s32.totalorder %s68_s8, %s4196_s24  ;;  %p4201_p2 = scmp.lt.s32.totalorder %s68_s8, %s68_s8 }
  0x60   :  { %p4202_p3 = scmp.lt.s32.totalorder %s4200_s5, %s4196_s24 }
  0x62   :  { %p4203_p4 = por %p4202_p3, %p4201_p2 }
  0x64   :  { %p4204_p5 = pnand %p4203_p4, %p4197_p1 }
  0x66   :  { %4207 = shalt.err (!%p4204_p5)
}
  0x67   :  { %70 = dma.hbm_to_vmem [thread:$0]  %s6555_s4, 16, %s68_s8, [#allocation10]  }
  0x68   :  { %s4272_s26 = smov [#allocation14]   ;;  %s4208_s10 = scalar_lea.hbm %s6557_s6, 16 }
  0x69   :  { %s89_s28 = sshll.u32 %s4272_s26, 4  ;;  %p4209_p6 = scmp.ne.s32.totalorder %s6557_s6, %s4208_s10  ;;  %s90_s28 = int_to_ptr.vmem [resolvable:$true] %s89_s28 }
  0x6a   :  { %p4212_p7 = scmp.lt.u32.totalorder %s4208_s10, %s6557_s6 }
  0x6c   :  { %p4214_p8 = pnand %p4212_p7, %p4209_p6 }
  0x6e   :  { %4217 = shalt.err (!%p4214_p8)
}
  0x6f   :  { %s4218_s3 = scalar_lea.vmem %s90_s28, 16  ;;  %s4222_s4 = scalar_lea.vmem %s90_s28, 32 }
  0x70   :  { %p4219_p9 = scmp.ne.s32.totalorder %s90_s28, %s4218_s3  ;;  %p4223_p10 = scmp.lt.s32.totalorder %s90_s28, %s90_s28 }
  0x71   :  { %p4224_p11 = scmp.lt.s32.totalorder %s4222_s4, %s4218_s3 }
  0x73   :  { %p4225_p12 = por %p4224_p11, %p4223_p10 }
  0x75   :  { %p4226_p13 = pnand %p4225_p12, %p4219_p9 }
  0x77   :  { %4229 = shalt.err (!%p4226_p13)
}
  0x78   :  { %92 = dma.hbm_to_vmem [thread:$0]  %s6557_s6, 16, %s90_s28, [#allocation13]  }
  0x79   :  { %4252 = dma.done.wait [#allocation4], 8192  }
  0x7a   :  { %4253 = vsyncadd [#allocation4], 4294959104 }
  0x7b   :  { %4254 = dma.done.wait [#allocation7], 80  }
  0x7c   :  { %4255 = vsyncadd [#allocation7], 4294967216 }
  0x7d   :  { %4256 = dma.done.wait [#allocation10], 208  }
  0x7e   :  { %4257 = vsyncadd [#allocation10], 4294967088 }
  0x7f   :  { %4258 = dma.done.wait [#allocation13], 2064  }
  0x80   :  { %4259 = vsyncadd [#allocation13], 4294965232  ;;  %vm464_vm0 = vcmask 1043456   ;;  %vm271_vm1 = vcmask 31744   ;;  %v199_v0 = vld [vmem:[#allocation6] sm:$0xf] }
  0x81   :  { %v200_v1 = vld [vmem:[#allocation3] sm:$0xff]  ;;  %v201_v2 = vld [vmem:[#allocation3 + $0x8] sm:$0xff]  ;;  %3782 = vmatprep.subr.msk.mxu0 %vm464_vm0, %v199_v0  ;;  %v202_v3 = vld [vmem:[#allocation3 + $0x10] sm:$0xff]  ;;  %v4273_v51 = vmov 0.0   ;;  %s4274_s6 = smov [#allocation15]  }
  0x82   :  { %3784 = vmatprep.mubr.msk.f32.mxu0 %vm271_vm1, %v200_v1  ;;  %3783 = vmatpush3.msk.msra.mxu0 %vm464_vm0, %v199_v0  ;;  %v203_v4 = vld [vmem:[#allocation3 + $0x18] sm:$0xff]  ;;  %v204_v5 = vld [vmem:[#allocation3 + $0x20] sm:$0xff]  ;;  %v205_v6 = vld [vmem:[#allocation3 + $0x28] sm:$0xff]  ;;  %114 = vst [vmem:[#allocation2] sm:$0xff] %v4273_v51  ;;  %s3554_s30 = sshll.u32 %s4274_s6, 4  ;;  %s3555_s30 = int_to_ptr.vmem [resolvable:$true] %s3554_s30 }
  0x83   :  { %3785 = vmatmul.mubr.msk.f32.vlgmr.msra.gmra.mrb[0].mxu0 %vm271_vm1, %v201_v2  ;;  %v206_v7 = vld [vmem:[#allocation3 + $0x30] sm:$0xff]  ;;  %v207_v8 = vld [vmem:[#allocation3 + $0x38] sm:$0xff]  ;;  %v208_v9 = vld [vmem:[#allocation3 + $0x40] sm:$0xff]  ;;  %115 = vst [vmem:[#allocation2 + $0x8] sm:$0xff] %v4273_v51  ;;  %s4230_s16 = scalar_lea.vmem %s3555_s30, 8192  ;;  %p4235_p1 = scmp.lt.s32.totalorder %s3555_s30, %s3555_s30 }
  0x84   :  { %3787 = vmatprep.mubr.msk.f32.mxu0 %vm271_vm1, %v202_v3  ;;  %v209_v10 = vld [vmem:[#allocation3 + $0x48] sm:$0xff]  ;;  %v210_v11 = vld [vmem:[#allocation3 + $0x50] sm:$0xff]  ;;  %v211_v12 = vld [vmem:[#allocation3 + $0x58] sm:$0xff]  ;;  %128 = vst [vmem:[#allocation2 + $0x18] sm:$0x1] %v4273_v51  ;;  %p4231_p0 = scmp.ne.s32.totalorder %s3555_s30, %s4230_s16  ;;  %p4236_p2 = scmp.lt.s32.totalorder %s4230_s16, %s4230_s16 }
  0x85   :  { %v212_v13 = vld [vmem:[#allocation3 + $0x60] sm:$0xff]  ;;  %v213_v14 = vld [vmem:[#allocation3 + $0x68] sm:$0xff]  ;;  %v214_v15 = vld [vmem:[#allocation3 + $0x70] sm:$0xff]  ;;  %129 = vst [vmem:[#allocation2 + $0x30] sm:$0x1] %v4273_v51 }
  0x86   :  { %v215_v16 = vld [vmem:[#allocation3 + $0x78] sm:$0xff]  ;;  %v216_v17 = vld [vmem:[#allocation3 + $0x80] sm:$0xff]  ;;  %v217_v18 = vld [vmem:[#allocation3 + $0x88] sm:$0xff]  ;;  %116 = vst [vmem:[#allocation2 + $0x10] sm:$0x3] %v4273_v51  ;;  %p4237_p3 = por %p4236_p2, %p4235_p1 }
  0x87   :  { %3788 = vmatmul.mubr.msk.f32.gmra.mrb[2].mxu0 %vm271_vm1, %v203_v4  ;;  %v218_v19 = vld [vmem:[#allocation3 + $0x90] sm:$0xff]  ;;  %v219_v20 = vld [vmem:[#allocation3 + $0x98] sm:$0xff]  ;;  %v220_v21 = vld [vmem:[#allocation3 + $0xa0] sm:$0xff]  ;;  %117 = vst [vmem:[#allocation2 + $0x1b0] sm:$0xff] %v4273_v51 }
  0x88   :  { %3790 = vmatprep.mubr.msk.f32.mxu0 %vm271_vm1, %v204_v5  ;;  %v221_v22 = vld [vmem:[#allocation3 + $0xa8] sm:$0xff]  ;;  %v222_v23 = vld [vmem:[#allocation3 + $0xb0] sm:$0xff]  ;;  %v223_v24 = vld [vmem:[#allocation3 + $0xb8] sm:$0xff]  ;;  %118 = vst [vmem:[#allocation2 + $0x1b8] sm:$0xff] %v4273_v51  ;;  %p4238_p4 = pnand %p4237_p3, %p4231_p0 }
  0x89   :  { %v224_v25 = vld [vmem:[#allocation3 + $0xc0] sm:$0xff]  ;;  %v225_v26 = vld [vmem:[#allocation3 + $0xc8] sm:$0xff]  ;;  %v226_v27 = vld [vmem:[#allocation3 + $0xd0] sm:$0xff]  ;;  %119 = vst [vmem:[#allocation2 + $0x1c0] sm:$0x3] %v4273_v51 }
  0x8a   :  { %v227_v28 = vld [vmem:[#allocation3 + $0xd8] sm:$0xff]  ;;  %v228_v29 = vld [vmem:[#allocation3 + $0xe0] sm:$0xff]  ;;  %v229_v30 = vld [vmem:[#allocation3 + $0xe8] sm:$0xff]  ;;  %121 = vst [vmem:[#allocation2 + $0x198] sm:$0xff] %v4273_v51 }
  0x8b   :  { %3791 = vmatmul.mubr.msk.f32.gmra.mrb[4].mxu0 %vm271_vm1, %v205_v6  ;;  %v230_v31 = vld [vmem:[#allocation3 + $0xf0] sm:$0xff]  ;;  %v231_v32 = vld [vmem:[#allocation3 + $0xf8] sm:$0xff]  ;;  %v232_v33 = vld [vmem:[#allocation3 + $0x100] sm:$0xff]  ;;  %122 = vst [vmem:[#allocation2 + $0x1a0] sm:$0xff] %v4273_v51 }
  0x8c   :  { %3793 = vmatprep.mubr.msk.f32.mxu0 %vm271_vm1, %v206_v7  ;;  %v233_v34 = vld [vmem:[#allocation3 + $0x108] sm:$0xff]  ;;  %v234_v35 = vld [vmem:[#allocation3 + $0x110] sm:$0xff]  ;;  %v235_v36 = vld [vmem:[#allocation3 + $0x118] sm:$0xff]  ;;  %123 = vst [vmem:[#allocation2 + $0x1a8] sm:$0x3] %v4273_v51 }
  0x8d   :  { %v236_v37 = vld [vmem:[#allocation3 + $0x120] sm:$0xff]  ;;  %v237_v38 = vld [vmem:[#allocation3 + $0x128] sm:$0xff]  ;;  %v238_v39 = vld [vmem:[#allocation3 + $0x130] sm:$0xff]  ;;  %124 = vst [vmem:[#allocation2 + $0x348] sm:$0xff] %v4273_v51 }
  0x8e   :  { %v239_v40 = vld [vmem:[#allocation3 + $0x138] sm:$0xff]  ;;  %v240_v41 = vld [vmem:[#allocation3 + $0x140] sm:$0xff]  ;;  %v241_v42 = vld [vmem:[#allocation3 + $0x148] sm:$0xff]  ;;  %125 = vst [vmem:[#allocation2 + $0x350] sm:$0xff] %v4273_v51 }
  0x8f   :  { %3794 = vmatmul.mubr.msk.f32.gmra.mrb[6].mxu0 %vm271_vm1, %v207_v8  ;;  %v242_v43 = vld [vmem:[#allocation3 + $0x150] sm:$0xff]  ;;  %v243_v44 = vld [vmem:[#allocation3 + $0x158] sm:$0xff]  ;;  %v244_v45 = vld [vmem:[#allocation3 + $0x160] sm:$0xff]  ;;  %126 = vst [vmem:[#allocation2 + $0x358] sm:$0x3] %v4273_v51 }
  0x90   :  { %3796 = vmatprep.mubr.msk.f32.mxu0 %vm271_vm1, %v208_v9  ;;  %v4464_v46 = vld [vmem:[#allocation3 + $0x168] sm:$0xff]  ;;  %v2949_v47 = vld [vmem:[#allocation12] sm:$0xff]  ;;  %v2950_v48 = vld [vmem:[#allocation12 + $0x8] sm:$0xff]  ;;  %130 = vst [vmem:[#allocation2 + $0x48] sm:$0x1] %v4273_v51 }
  0x91   :  { %v4466_v49 = vld [vmem:[#allocation3 + $0x170] sm:$0xff]  ;;  %v4468_v50 = vpack.c.bf16 %v2950_v48, %v2949_v47  ;;  %131 = vst [vmem:[#allocation2 + $0x60] sm:$0x1] %v4273_v51  ;;  %132 = vst [vmem:[#allocation2 + $0x78] sm:$0x1] %v4273_v51  ;;  %v247_v52 = vld [vmem:[#allocation3 + $0x178] sm:$0xff] }
  0x92   :  { %133 = vst [vmem:[#allocation2 + $0x90] sm:$0x1] %v4273_v51  ;;  %134 = vst [vmem:[#allocation2 + $0xa8] sm:$0x1] %v4273_v51  ;;  %v2951_v53 = vld [vmem:[#allocation12 + $0x10] sm:$0xff]  ;;  %v2952_v54 = vld [vmem:[#allocation12 + $0x18] sm:$0xff] }
  0x93   :  { %3797 = vmatmul.mubr.msk.f32.gmra.mrb[8].mxu0 %vm271_vm1, %v209_v10  ;;  %135 = vst [vmem:[#allocation2 + $0xc0] sm:$0x1] %v4273_v51  ;;  %136 = vst [vmem:[#allocation2 + $0xd8] sm:$0x1] %v4273_v51  ;;  %4009 = vmatprep.subr.bf16.mxu0 %v4468_v50  ;;  %v248_v55 = vld [vmem:[#allocation3 + $0x180] sm:$0xff]  ;;  %v4012_v56 = vpack.c.bf16 %v2952_v54, %v2951_v53  ;;  %v249_v57 = vld [vmem:[#allocation3 + $0x188] sm:$0xff] }
  0x94   :  { %3799 = vmatprep.mubr.msk.f32.mxu0 %vm271_vm1, %v210_v11  ;;  %137 = vst [vmem:[#allocation2 + $0xf0] sm:$0x1] %v4273_v51  ;;  %138 = vst [vmem:[#allocation2 + $0x108] sm:$0x1] %v4273_v51  ;;  %4011 = vmatpush3.bf16.msra.mxu0 %v4468_v50  ;;  %v2953_v58 = vld [vmem:[#allocation12 + $0x20] sm:$0xff]  ;;  %v2954_v59 = vld [vmem:[#allocation12 + $0x28] sm:$0xff] }
  0x95   :  { %139 = vst [vmem:[#allocation2 + $0x120] sm:$0x1] %v4273_v51  ;;  %140 = vst [vmem:[#allocation2 + $0x138] sm:$0x1] %v4273_v51  ;;  %4040 = vmatprep.subr.bf16.mxu1 %v4468_v50  ;;  %4013 = vmatprep.subr.bf16.mxu0 %v4012_v56  ;;  %v250_v60 = vld [vmem:[#allocation3 + $0x190] sm:$0xff]  ;;  %v4016_v61 = vpack.c.bf16 %v2954_v59, %v2953_v58  ;;  %v251_v62 = vld [vmem:[#allocation3 + $0x198] sm:$0xff] }
  0x96   :  { %141 = vst [vmem:[#allocation2 + $0x150] sm:$0x1] %v4273_v51  ;;  %142 = vst [vmem:[#allocation2 + $0x168] sm:$0x1] %v4273_v51  ;;  %4048 = vmatpush3.bf16.msra.mxu1 %v4468_v50  ;;  %v2955_v63 = vld [vmem:[#allocation12 + $0x30] sm:$0xff]  ;;  %v2956_v0 = vld [vmem:[#allocation12 + $0x38] sm:$0xff] }
  0x97   :  { %3800 = vmatmul.mubr.msk.f32.gmra.mrb[10].mxu0 %vm271_vm1, %v211_v12  ;;  %143 = vst [vmem:[#allocation2 + $0x180] sm:$0x1] %v4273_v51  ;;  %146 = vst [vmem:[#allocation2 + $0x1c8] sm:$0x1] %v4273_v51  ;;  %4041 = vmatprep.subr.bf16.mxu1 %v4012_v56  ;;  %v252_v1 = vld [vmem:[#allocation3 + $0x1a0] sm:$0xff]  ;;  %v4020_v2 = vpack.c.bf16 %v2956_v0, %v2955_v63  ;;  %v253_v3 = vld [vmem:[#allocation3 + $0x1a8] sm:$0xff] }
  0x98   :  { %3802 = vmatprep.mubr.msk.f32.mxu0 %vm271_vm1, %v212_v13  ;;  %147 = vst [vmem:[#allocation2 + $0x1e0] sm:$0x1] %v4273_v51  ;;  %148 = vst [vmem:[#allocation2 + $0x1f8] sm:$0x1] %v4273_v51  ;;  %4015 = vmatpush3.bf16.msra.mxu0 %v4012_v56  ;;  %v2957_v4 = vld [vmem:[#allocation12 + $0x40] sm:$0xff]  ;;  %v2958_v5 = vld [vmem:[#allocation12 + $0x48] sm:$0xff] }
  0x99   :  { %149 = vst [vmem:[#allocation2 + $0x210] sm:$0x1] %v4273_v51  ;;  %150 = vst [vmem:[#allocation2 + $0x228] sm:$0x1] %v4273_v51  ;;  %4017 = vmatprep.subr.bf16.mxu0 %v4016_v61  ;;  %v254_v6 = vld [vmem:[#allocation3 + $0x1b0] sm:$0xff]  ;;  %v4024_v7 = vpack.c.bf16 %v2958_v5, %v2957_v4  ;;  %v255_v8 = vld [vmem:[#allocation3 + $0x1b8] sm:$0xff] }
  0x9a   :  { %151 = vst [vmem:[#allocation2 + $0x240] sm:$0x1] %v4273_v51  ;;  %152 = vst [vmem:[#allocation2 + $0x258] sm:$0x1] %v4273_v51  ;;  %4049 = vmatpush3.bf16.msra.mxu1 %v4012_v56  ;;  %v2959_v9 = vld [vmem:[#allocation12 + $0x50] sm:$0xff]  ;;  %v2960_v10 = vld [vmem:[#allocation12 + $0x58] sm:$0xff] }
  0x9b   :  { %3803 = vmatmul.mubr.msk.f32.gmra.mrb[12].mxu0 %vm271_vm1, %v213_v14  ;;  %153 = vst [vmem:[#allocation2 + $0x270] sm:$0x1] %v4273_v51  ;;  %154 = vst [vmem:[#allocation2 + $0x288] sm:$0x1] %v4273_v51  ;;  %4042 = vmatprep.subr.bf16.mxu1 %v4016_v61  ;;  %v256_v11 = vld [vmem:[#allocation3 + $0x1c0] sm:$0xff]  ;;  %v4028_v12 = vpack.c.bf16 %v2960_v10, %v2959_v9  ;;  %v257_v13 = vld [vmem:[#allocation3 + $0x1c8] sm:$0xff] }
  0x9c   :  { %3805 = vmatprep.mubr.msk.f32.mxu0 %vm271_vm1, %v214_v15  ;;  %155 = vst [vmem:[#allocation2 + $0x2a0] sm:$0x1] %v4273_v51  ;;  %156 = vst [vmem:[#allocation2 + $0x2b8] sm:$0x1] %v4273_v51  ;;  %4019 = vmatpush3.bf16.msra.mxu0 %v4016_v61  ;;  %v2961_v14 = vld [vmem:[#allocation12 + $0x60] sm:$0xff]  ;;  %v2962_v15 = vld [vmem:[#allocation12 + $0x68] sm:$0xff] }
  0x9d   :  { %157 = vst [vmem:[#allocation2 + $0x2d0] sm:$0x1] %v4273_v51  ;;  %158 = vst [vmem:[#allocation2 + $0x2e8] sm:$0x1] %v4273_v51  ;;  %4021 = vmatprep.subr.bf16.mxu0 %v4020_v2  ;;  %v1048_v56 = vld [vmem:[#allocation9 + $0x8] sm:$0x7] }
  0x9e   :  { %159 = vst [vmem:[#allocation2 + $0x300] sm:$0x1] %v4273_v51  ;;  %160 = vst [vmem:[#allocation2 + $0x318] sm:$0x1] %v4273_v51  ;;  %4050 = vmatpush3.bf16.msra.mxu1 %v4016_v61 }
  0x9f   :  { %3806 = vmatmul.mubr.msk.f32.gmra.mrb[14].mxu0 %vm271_vm1, %v215_v16  ;;  %161 = vst [vmem:[#allocation2 + $0x330] sm:$0x1] %v4273_v51  ;;  %164 = vst [vmem:[#allocation2 + $0x29] sm:$0x1] %v4273_v51  ;;  %4043 = vmatprep.subr.bf16.mxu1 %v4020_v2  ;;  %v258_v16 = vld [vmem:[#allocation3 + $0x1d0] sm:$0xff] }
  0xa0   :  { %3808 = vmatprep.mubr.msk.f32.mxu0 %vm271_vm1, %v216_v17  ;;  %165 = vst [vmem:[#allocation2 + $0x41] sm:$0x1] %v4273_v51  ;;  %166 = vst [vmem:[#allocation2 + $0x59] sm:$0x1] %v4273_v51  ;;  %4023 = vmatpush3.bf16.msra.mxu0 %v4020_v2  ;;  %v4032_v17 = vpack.c.bf16 %v2962_v15, %v2961_v14 }
  0xa1   :  { %167 = vst [vmem:[#allocation2 + $0x71] sm:$0x1] %v4273_v51  ;;  %168 = vst [vmem:[#allocation2 + $0x89] sm:$0x1] %v4273_v51  ;;  %4025 = vmatprep.subr.bf16.mxu0 %v4024_v7 }
  0xa2   :  { %169 = vst [vmem:[#allocation2 + $0xa1] sm:$0x1] %v4273_v51  ;;  %170 = vst [vmem:[#allocation2 + $0xb9] sm:$0x1] %v4273_v51  ;;  %4051 = vmatpush3.bf16.msra.mxu1 %v4020_v2 }
  0xa3   :  { %3809 = vmatmul.mubr.msk.f32.gmra.mrb[16].mxu0 %vm271_vm1, %v217_v18  ;;  %171 = vst [vmem:[#allocation2 + $0xd1] sm:$0x1] %v4273_v51  ;;  %172 = vst [vmem:[#allocation2 + $0xe9] sm:$0x1] %v4273_v51  ;;  %4044 = vmatprep.subr.bf16.mxu1 %v4024_v7  ;;  %v259_v18 = vld [vmem:[#allocation3 + $0x1d8] sm:$0xff] }
  0xa4   :  { %3811 = vmatprep.mubr.msk.f32.mxu0 %vm271_vm1, %v218_v19  ;;  %173 = vst [vmem:[#allocation2 + $0x101] sm:$0x1] %v4273_v51  ;;  %174 = vst [vmem:[#allocation2 + $0x119] sm:$0x1] %v4273_v51  ;;  %4027 = vmatpush3.bf16.msra.mxu0 %v4024_v7  ;;  %v2963_v19 = vld [vmem:[#allocation12 + $0x70] sm:$0xff] }
  0xa5   :  { %175 = vst [vmem:[#allocation2 + $0x131] sm:$0x1] %v4273_v51  ;;  %176 = vst [vmem:[#allocation2 + $0x149] sm:$0x1] %v4273_v51  ;;  %4029 = vmatprep.subr.bf16.mxu0 %v4028_v12 }
  0xa6   :  { %177 = vst [vmem:[#allocation2 + $0x161] sm:$0x1] %v4273_v51  ;;  %178 = vst [vmem:[#allocation2 + $0x179] sm:$0x1] %v4273_v51  ;;  %4052 = vmatpush3.bf16.msra.mxu1 %v4024_v7 }
  0xa7   :  { %3812 = vmatmul.mubr.msk.f32.gmra.mrb[18].mxu0 %vm271_vm1, %v219_v20  ;;  %179 = vst [vmem:[#allocation2 + $0x191] sm:$0x1] %v4273_v51  ;;  %182 = vst [vmem:[#allocation2 + $0x1d9] sm:$0x1] %v4273_v51  ;;  %4045 = vmatprep.subr.bf16.mxu1 %v4028_v12  ;;  %v2964_v20 = vld [vmem:[#allocation12 + $0x78] sm:$0xff] }
  0xa8   :  { %3814 = vmatprep.mubr.msk.f32.mxu0 %vm271_vm1, %v220_v21  ;;  %183 = vst [vmem:[#allocation2 + $0x1f1] sm:$0x1] %v4273_v51  ;;  %184 = vst [vmem:[#allocation2 + $0x209] sm:$0x1] %v4273_v51  ;;  %4031 = vmatpush3.bf16.msra.mxu0 %v4028_v12  ;;  %v260_v21 = vld [vmem:[#allocation3 + $0x1e0] sm:$0xff] }
  0xa9   :  { %185 = vst [vmem:[#allocation2 + $0x221] sm:$0x1] %v4273_v51  ;;  %186 = vst [vmem:[#allocation2 + $0x239] sm:$0x1] %v4273_v51  ;;  %4033 = vmatprep.subr.bf16.mxu0 %v4032_v17 }
  0xaa   :  { %187 = vst [vmem:[#allocation2 + $0x251] sm:$0x1] %v4273_v51  ;;  %188 = vst [vmem:[#allocation2 + $0x269] sm:$0x1] %v4273_v51  ;;  %4053 = vmatpush3.bf16.msra.mxu1 %v4028_v12 }
  0xab   :  { %3815 = vmatmul.mubr.msk.f32.gmra.mrb[20].mxu0 %vm271_vm1, %v221_v22  ;;  %189 = vst [vmem:[#allocation2 + $0x281] sm:$0x1] %v4273_v51  ;;  %190 = vst [vmem:[#allocation2 + $0x299] sm:$0x1] %v4273_v51  ;;  %v4036_v22 = vpack.c.bf16 %v2964_v20, %v2963_v19  ;;  %4046 = vmatprep.subr.bf16.mxu1 %v4032_v17 }
  0xac   :  { %3817 = vmatprep.mubr.msk.f32.mxu0 %vm271_vm1, %v222_v23  ;;  %191 = vst [vmem:[#allocation2 + $0x2b1] sm:$0x1] %v4273_v51  ;;  %192 = vst [vmem:[#allocation2 + $0x2c9] sm:$0x1] %v4273_v51  ;;  %4035 = vmatpush3.bf16.msra.mxu0 %v4032_v17  ;;  %v261_v23 = vld [vmem:[#allocation3 + $0x1e8] sm:$0xff] }
  0xad   :  { %193 = vst [vmem:[#allocation2 + $0x2e1] sm:$0x1] %v4273_v51  ;;  %194 = vst [vmem:[#allocation2 + $0x2f9] sm:$0x1] %v4273_v51  ;;  %4037 = vmatprep.subr.bf16.mxu0 %v4036_v22 }
  0xae   :  { %195 = vst [vmem:[#allocation2 + $0x311] sm:$0x1] %v4273_v51  ;;  %196 = vst [vmem:[#allocation2 + $0x329] sm:$0x1] %v4273_v51  ;;  %4054 = vmatpush3.bf16.msra.mxu1 %v4032_v17 }
  0xaf   :  { %3818 = vmatmul.mubr.msk.f32.gmra.mrb[22].mxu0 %vm271_vm1, %v223_v24  ;;  %197 = vst [vmem:[#allocation2 + $0x341] sm:$0x1] %v4273_v51  ;;  %127 = vst [vmem:[#allocation2] sm:$0x1] %v4273_v51  ;;  %v262_v24 = vld [vmem:[#allocation3 + $0x1f0] sm:$0xff]  ;;  %4047 = vmatprep.subr.bf16.mxu1 %v4036_v22 }
  0xb0   :  { %3820 = vmatprep.mubr.msk.f32.mxu0 %vm271_vm1, %v224_v25  ;;  %144 = vst [vmem:[#allocation2 + $0x198] sm:$0x1] %v4273_v51  ;;  %145 = vst [vmem:[#allocation2 + $0x1b0] sm:$0x1] %v4273_v51  ;;  %4039 = vmatpush3.bf16.msra.mxu0 %v4036_v22  ;;  %v263_v25 = vld [vmem:[#allocation3 + $0x1f8] sm:$0xff] }
  0xb1   :  { %162 = vst [vmem:[#allocation2 + $0x348] sm:$0x1] %v4273_v51  ;;  %163 = vst [vmem:[#allocation2 + $0x11] sm:$0x1] %v4273_v51 }
  0xb2   :  { %180 = vst [vmem:[#allocation2 + $0x1a9] sm:$0x1] %v4273_v51  ;;  %181 = vst [vmem:[#allocation2 + $0x1c1] sm:$0x1] %v4273_v51  ;;  %4055 = vmatpush3.bf16.msra.mxu1 %v4036_v22 }
  0xb3   :  { %3821 = vmatmul.mubr.msk.f32.gmra.mrb[24].mxu0 %vm271_vm1, %v225_v26  ;;  %198 = vst [vmem:[#allocation2 + $0x359] sm:$0x1] %v4273_v51  ;;  %v1113_v26 = vlaneseq }
  0xb4   :  { %3823 = vmatprep.mubr.msk.f32.mxu0 %vm271_vm1, %v226_v27 }
  0xb5   :  { %v1114_v27 = vshrl.u32 %v1113_v26, 7 }
  0xb7   :  { %3824 = vmatmul.mubr.msk.f32.gmra.mrb[26].mxu0 %vm271_vm1, %v227_v28  ;;  %v1115_v28 = vsub.s32 0, %v1114_v27 }
  0xb8   :  { %3826 = vmatprep.mubr.msk.f32.mxu0 %vm271_vm1, %v228_v29  ;;  %v1247_v29 = vsub.s32 1, %v1114_v27 }
  0xba   :  { %v4603_v5 = vrot.slane %v1048_v56, %v1247_v29 }
  0xbb   :  { %3827 = vmatmul.mubr.msk.f32.gmra.mrb[28].mxu0 %vm271_vm1, %v229_v30  ;;  %v1046_v30 = vld [vmem:[#allocation9] sm:$0x7] }
  0xbc   :  { %3829 = vmatprep.mubr.msk.f32.mxu0 %vm271_vm1, %v230_v31  ;;  %v4579_v31 = vrot.slane %v1046_v30, %v1115_v28 }
  0xbf   :  { %3830 = vmatmul.mubr.msk.f32.gmra.mrb[30].mxu0 %vm271_vm1, %v231_v32  ;;  %v1443_v32 = vsub.s32 2, %v1114_v27 }
  0xc0   :  { %3832 = vmatprep.mubr.msk.f32.mxu0 %vm271_vm1, %v232_v33  ;;  %v4581_v33 = vld [vmem:[#allocation8] ss:$0 sm:$0xff] }
  0xc1   :  { %v4606_v10 = vrot.slane %v1048_v56, %v1443_v32 }
  0xc3   :  { %3833 = vmatmul.mubr.msk.f32.gmra.mrb[32].mxu0 %vm271_vm1, %v233_v34  ;;  %v1049_v34 = vld [vmem:[#allocation2] sm:$0xff] }
  0xc4   :  { %3835 = vmatprep.mubr.msk.f32.mxu0 %vm271_vm1, %v234_v35  ;;  %v1181_v35 = vld [vmem:[#allocation2 + $0x1] sm:$0xff] }
  0xc7   :  { %3836 = vmatmul.mubr.msk.f32.gmra.mrb[34].mxu0 %vm271_vm1, %v235_v36  ;;  %v4583_v36 = vrot.slane %v1046_v30, %v1247_v29 }
  0xc8   :  { %3838 = vmatprep.mubr.msk.f32.mxu0 %vm271_vm1, %v236_v37  ;;  %v1182_v37 = vld [vmem:[#allocation2 + $0x9] sm:$0xff] }
  0xc9   :  { %v1250_v47 = vmul.f32 %v4583_v36, %v1182_v37 }
  0xcb   :  { %3839 = vmatmul.mubr.msk.f32.gmra.mrb[36].mxu0 %vm271_vm1, %v237_v38 }
  0xcc   :  { %3841 = vmatprep.mubr.msk.f32.mxu0 %vm271_vm1, %v238_v39 }
  0xcf   :  { %3842 = vmatmul.mubr.msk.f32.gmra.mrb[38].mxu0 %vm271_vm1, %v239_v40 }
  0xd0   :  { %3844 = vmatprep.mubr.msk.f32.mxu0 %vm271_vm1, %v240_v41  ;;  %v1117_v41 = vmul.f32 %v4579_v31, %v1049_v34 }
  0xd3   :  { %3845 = vmatmul.mubr.msk.f32.gmra.mrb[40].mxu0 %vm271_vm1, %v241_v42  ;;  %v1249_v42 = vmul.f32 %v4583_v36, %v1181_v35 }
  0xd4   :  { %3847 = vmatprep.mubr.msk.f32.mxu0 %vm271_vm1, %v242_v43  ;;  %v4588_v43 = vrot.slane %v1046_v30, %v1443_v32 }
  0xd7   :  { %3848 = vmatmul.mubr.msk.f32.gmra.mrb[42].mxu0 %vm271_vm1, %v243_v44 }
  0xd8   :  { %3850 = vmatprep.mubr.msk.f32.mxu0 %vm271_vm1, %v244_v45  ;;  %v1377_v45 = vld [vmem:[#allocation2 + $0x2] sm:$0xff] }
  0xd9   :  { %v1445_v58 = vmul.f32 %v4588_v43, %v1377_v45 }
  0xdb   :  { %3851 = vmatmul.mubr.msk.f32.gmra.mrb[44].mxu0 %vm271_vm1, %v4464_v46  ;;  %v1118_v46 = vmul.f32 0.0, %v4579_v31 }
  0xdc   :  { %3853 = vmatprep.mubr.msk.f32.mxu0 %vm271_vm1, %v4466_v49  ;;  %v1378_v49 = vld [vmem:[#allocation2 + $0xa] sm:$0xff] }
  0xdd   :  { %v1314_v61 = vadd.f32 %v1250_v47, %v1118_v46 }
  0xdf   :  { %3854 = vmatmul.mubr.msk.f32.gmra.mrb[46].mxu0 %vm271_vm1, %v247_v52  ;;  %v1047_v52 = vld [vmem:[#allocation9 + $0x4] sm:$0x7] }
  0xe0   :  { %3856 = vmatprep.mubr.msk.f32.mxu0 %vm271_vm1, %v248_v55  ;;  %v4597_v0 = vrot.slane %v1047_v52, %v1247_v29  ;;  %v4601_v4 = vrot.slane %v1047_v52, %v1443_v32 }
  0xe3   :  { %3857 = vmatmul.mubr.msk.f32.gmra.mrb[48].mxu0 %vm271_vm1, %v249_v57  ;;  %v1313_v57 = vadd.f32 %v1249_v42, %v1117_v41 }
  0xe4   :  { %3859 = vmatprep.mubr.msk.f32.mxu0 %vm271_vm1, %v250_v60 }
  0xe5   :  { %v1509_v9 = vadd.f32 %v1445_v58, %v1313_v57 }
  0xe7   :  { %3860 = vmatmul.mubr.msk.f32.gmra.mrb[50].mxu0 %vm271_vm1, %v251_v62  ;;  %v1446_v62 = vmul.f32 %v4588_v43, %v1378_v49 }
  0xe8   :  { %3862 = vmatprep.mubr.msk.f32.mxu0 %vm271_vm1, %v252_v1 }
  0xe9   :  { %v1510_v14 = vadd.f32 %v1446_v62, %v1314_v61 }
  0xeb   :  { %3863 = vmatmul.mubr.msk.f32.gmra.mrb[52].mxu0 %vm271_vm1, %v253_v3  ;;  %v4599_v3 = vrot.slane %v1047_v52, %v1115_v28 }
  0xec   :  { %3865 = vmatprep.mubr.msk.f32.mxu0 %vm271_vm1, %v254_v6 }
  0xef   :  { %3866 = vmatmul.mubr.msk.f32.gmra.mrb[54].mxu0 %vm271_vm1, %v255_v8 }
  0xf0   :  { %3868 = vmatprep.mubr.msk.f32.mxu0 %vm271_vm1, %v256_v11 }
  0xf3   :  { %3869 = vmatmul.mubr.msk.f32.gmra.mrb[56].mxu0 %vm271_vm1, %v257_v13  ;;  %v4609_v13 = vrot.slane %v1048_v56, %v1115_v28 }
  0xf4   :  { %3871 = vmatprep.mubr.msk.f32.mxu0 %vm271_vm1, %v258_v16 }
  0xf7   :  { %3872 = vmatmul.mubr.msk.f32.gmra.mrb[58].mxu0 %vm271_vm1, %v259_v18 }
  0xf8   :  { %3874 = vmatprep.mubr.msk.f32.mxu0 %vm271_vm1, %v260_v21 }
  0xfb   :  { %3875 = vmatmul.mubr.msk.f32.gmra.mrb[60].mxu0 %vm271_vm1, %v261_v23 }
  0xfc   :  { %3877 = vmatprep.mubr.msk.f32.mxu0 %vm271_vm1, %v262_v24 }
  0xff   :  { %3878 = vmatmul.mubr.msk.f32.gmra.mrb[62].mxu0 %vm271_vm1, %v263_v25 }
 0x156   :  { %v3786_v38 = vpop.f32.mrb[0].mxu0 }
 0x157   :  { %v540_v39 = vadd.f32 %v3786_v38, %v4581_v33  ;;  %v534_v40 = vpop.f32.mrb[1].mxu0 }
 0x158   :  { %v535_v44 = vadd.f32 %v4581_v33, %v534_v40 }
 0x159   :  { %v854_v48 = vmax.f32 %v540_v39, 0.0 }
 0x15a   :  { %v853_v50 = vmax.f32 %v535_v44, 0.0  ;;  %v3789_v51 = vpop.f32.mrb[2].mxu0 }
 0x15b   :  { %v918_v53 = vmin.f32 %v854_v48, 6.0  ;;  %v550_v54 = vadd.f32 %v3789_v51, %v4581_v33  ;;  %v544_v55 = vpop.f32.mrb[3].mxu0 }
 0x15c   :  { %v917_v59 = vmin.f32 %v853_v50, 6.0  ;;  %v545_v60 = vadd.f32 %v4581_v33, %v544_v55 }
 0x15d   :  { %983 = vst [vmem:[#allocation2 + $0x21] sm:$0xff] %v918_v53  ;;  %v856_v63 = vmax.f32 %v550_v54, 0.0  ;;  %v1838_v17 = vmul.f32 %v4597_v0, %v918_v53  ;;  %v4614_v18 = vmul.f32 %v4583_v36, %v918_v53 }
 0x15e   :  { %982 = vst [vmem:[#allocation2 + $0x19] sm:$0xff] %v917_v59  ;;  %v855_v1 = vmax.f32 %v545_v60, 0.0  ;;  %v3792_v2 = vpop.f32.mrb[4].mxu0  ;;  %v1837_v16 = vmul.f32 %v4597_v0, %v917_v59  ;;  %v1251_v22 = vmul.f32 %v4583_v36, %v917_v59 }
 0x15f   :  { %v920_v6 = vmin.f32 %v856_v63, 6.0  ;;  %v560_v7 = vadd.f32 %v3792_v2, %v4581_v33  ;;  %v554_v8 = vpop.f32.mrb[5].mxu0 }
 0x160   :  { %v919_v11 = vmin.f32 %v855_v1, 6.0  ;;  %v555_v12 = vadd.f32 %v4581_v33, %v554_v8 }
 0x161   :  { %985 = vst [vmem:[#allocation2 + $0x39] sm:$0xff] %v920_v6  ;;  %v858_v15 = vmax.f32 %v560_v7, 0.0  ;;  %v4617_v21 = vmul.f32 %v4603_v5, %v920_v6  ;;  %v4621_v23 = vmul.f32 %v4597_v0, %v920_v6  ;;  %v4630_v28 = vmul.f32 %v4583_v36, %v920_v6 }
 0x162   :  { %984 = vst [vmem:[#allocation2 + $0x31] sm:$0xff] %v919_v11  ;;  %v857_v19 = vmax.f32 %v555_v12, 0.0  ;;  %v3795_v20 = vpop.f32.mrb[6].mxu0  ;;  %v4627_v27 = vmul.f32 %v4603_v5, %v919_v11  ;;  %v4636_v34 = vmul.f32 %v4597_v0, %v919_v11  ;;  %v4639_v35 = vmul.f32 %v4583_v36, %v919_v11 }
 0x163   :  { %v4623_v24 = vmin.f32 %v858_v15, 6.0  ;;  %v570_v25 = vadd.f32 %v3795_v20, %v4581_v33  ;;  %v564_v26 = vpop.f32.mrb[7].mxu0 }
 0x164   :  { %v4632_v29 = vmin.f32 %v857_v19, 6.0  ;;  %v565_v30 = vadd.f32 %v4581_v33, %v564_v26  ;;  %v1966_v32 = vld [vmem:[#allocation2 + $0x22] sm:$0xff] }
 0x165   :  { %987 = vst [vmem:[#allocation2 + $0x51] sm:$0xff] %v4623_v24  ;;  %v860_v37 = vmax.f32 %v570_v25, 0.0  ;;  %v1573_v38 = vld [vmem:[#allocation2 + $0x18] sm:$0xff]  ;;  %v4642_v40 = vld [vmem:[#allocation2 + $0x20] sm:$0xff]  ;;  %v2034_v41 = vmul.f32 %v4601_v4, %v1966_v32  ;;  %v4646_v42 = vmul.f32 %v1966_v32, %v4588_v43  ;;  %v4650_v44 = vmul.f32 %v4603_v5, %v4623_v24 }
 0x166   :  { %v1965_v39 = vld [vmem:[#allocation2 + $0x1a] sm:$0xff]  ;;  %986 = vst [vmem:[#allocation2 + $0x49] sm:$0xff] %v4632_v29  ;;  %v859_v45 = vmax.f32 %v565_v30, 0.0  ;;  %v3798_v46 = vpop.f32.mrb[8].mxu0  ;;  %v1641_v47 = vmul.f32 %v4599_v3, %v1573_v38  ;;  %v1642_v49 = vmul.f32 %v4599_v3, %v4642_v40  ;;  %v1119_v53 = vmul.f32 %v1573_v38, %v4579_v31 }
 0x167   :  { %v2033_v48 = vmul.f32 %v4601_v4, %v1965_v39  ;;  %v4657_v50 = vmin.f32 %v860_v37, 6.0  ;;  %v580_v51 = vadd.f32 %v3798_v46, %v4581_v33  ;;  %v574_v52 = vpop.f32.mrb[9].mxu0  ;;  %v1447_v54 = vmul.f32 %v1965_v39, %v4588_v43 }
 0x168   :  { %v4662_v55 = vmin.f32 %v859_v45, 6.0  ;;  %v575_v56 = vadd.f32 %v4581_v33, %v574_v52  ;;  %v1705_v57 = vadd.f32 %v1641_v47, %v1509_v9  ;;  %v1706_v58 = vadd.f32 %v1642_v49, %v1510_v14  ;;  %v4665_v59 = vld [vmem:[#allocation2 + $0x3a] sm:$0xff] }
 0x169   :  { %989 = vst [vmem:[#allocation2 + $0x69] sm:$0xff] %v4657_v50  ;;  %v862_v60 = vmax.f32 %v580_v51, 0.0  ;;  %v4668_v61 = vld [vmem:[#allocation2 + $0x30] sm:$0xff]  ;;  %v4672_v63 = vld [vmem:[#allocation2 + $0x38] sm:$0xff]  ;;  %v2623_v1 = vmul.f32 %v4606_v10, %v4665_v59  ;;  %v1315_v2 = vadd.f32 %v1251_v22, %v1119_v53  ;;  %v4678_v6 = vmul.f32 %v4603_v5, %v4632_v29 }
 0x16a   :  { %v4670_v62 = vld [vmem:[#allocation2 + $0x32] sm:$0xff]  ;;  %988 = vst [vmem:[#allocation2 + $0x61] sm:$0xff] %v4662_v55  ;;  %v861_v7 = vmax.f32 %v575_v56, 0.0  ;;  %v3801_v8 = vpop.f32.mrb[10].mxu0  ;;  %v1901_v9 = vadd.f32 %v1837_v16, %v1705_v57  ;;  %v2230_v11 = vmul.f32 %v4609_v13, %v4668_v61  ;;  %v1902_v20 = vadd.f32 %v1838_v17, %v1706_v58 }
 0x16b   :  { %v2622_v12 = vmul.f32 %v4606_v10, %v4670_v62  ;;  %v4685_v14 = vmin.f32 %v862_v60, 6.0  ;;  %v590_v15 = vadd.f32 %v3801_v8, %v4581_v33  ;;  %v584_v19 = vpop.f32.mrb[11].mxu0  ;;  %v2231_v22 = vmul.f32 %v4609_v13, %v4672_v63  ;;  %v4714_v8 = vld [vmem:[#allocation11] ss:$0 sm:$0xff] }
 0x16c   :  { %v4690_v25 = vmin.f32 %v861_v7, 6.0  ;;  %v585_v26 = vadd.f32 %v4581_v33, %v584_v19  ;;  %v2097_v16 = vadd.f32 %v2033_v48, %v1901_v9  ;;  %v1511_v30 = vadd.f32 %v1447_v54, %v1315_v2 }
 0x16d   :  { %991 = vst [vmem:[#allocation2 + $0x81] sm:$0xff] %v4685_v14  ;;  %v864_v32 = vmax.f32 %v590_v15, 0.0  ;;  %v2098_v37 = vadd.f32 %v2034_v41, %v1902_v20  ;;  %v1643_v38 = vmul.f32 %v4668_v61, %v4599_v3  ;;  %v2035_v39 = vmul.f32 %v4670_v62, %v4601_v4  ;;  %v4698_v17 = vld [vmem:[#allocation2 + $0x48] sm:$0xff] }
 0x16e   :  { %v4700_v45 = vld [vmem:[#allocation2 + $0x4a] sm:$0xff]  ;;  %990 = vst [vmem:[#allocation2 + $0x79] sm:$0xff] %v4690_v25  ;;  %v863_v46 = vmax.f32 %v585_v26, 0.0  ;;  %v3804_v47 = vpop.f32.mrb[12].mxu0  ;;  %v2294_v48 = vadd.f32 %v2230_v11, %v2097_v16  ;;  %v2232_v49 = vmul.f32 %v4609_v13, %v4698_v17  ;;  %v1120_v2 = vmul.f32 %v4642_v40, %v4579_v31 }
 0x16f   :  { %v2624_v41 = vmul.f32 %v4606_v10, %v4700_v45  ;;  %v928_v51 = vmin.f32 %v864_v32, 6.0  ;;  %v600_v52 = vadd.f32 %v3804_v47, %v4581_v33  ;;  %v594_v53 = vpop.f32.mrb[13].mxu0  ;;  %v2295_v54 = vadd.f32 %v2231_v22, %v2098_v37  ;;  %v4724_v26 = vld [vmem:[#allocation2 + $0x50] sm:$0xff] }
 0x170   :  { %v1707_v56 = vadd.f32 %v1643_v38, %v1511_v30  ;;  %v4708_v57 = vmin.f32 %v863_v46, 6.0  ;;  %v595_v58 = vadd.f32 %v4581_v33, %v594_v53  ;;  %v2490_v60 = vadd.f32 %v4627_v27, %v2294_v48  ;;  %v4727_v37 = vld [vmem:[#allocation2 + $0x52] sm:$0xff] }
 0x171   :  { %993 = vst [vmem:[#allocation2 + $0x99] sm:$0xff] %v928_v51  ;;  %v866_v7 = vmax.f32 %v600_v52, 0.0  ;;  %v2491_v9 = vadd.f32 %v4617_v21, %v2295_v54  ;;  %v1644_v15 = vmul.f32 %v4672_v63, %v4599_v3  ;;  %v1316_v27 = vadd.f32 %v4614_v18, %v1120_v2 }
 0x172   :  { %v1903_v11 = vadd.f32 %v4636_v34, %v1707_v56  ;;  %992 = vst [vmem:[#allocation2 + $0x91] sm:$0xff] %v4708_v57  ;;  %v865_v19 = vmax.f32 %v595_v58, 0.0  ;;  %v3807_v20 = vpop.f32.mrb[14].mxu0  ;;  %v2686_v22 = vadd.f32 %v2622_v12, %v2490_v60  ;;  %v2036_v40 = vmul.f32 %v4665_v59, %v4601_v4 }
 0x173   :  { %v930_v16 = vmin.f32 %v866_v7, 6.0  ;;  %v610_v21 = vadd.f32 %v3807_v20, %v4581_v33  ;;  %v604_v30 = vpop.f32.mrb[15].mxu0  ;;  %v2687_v34 = vadd.f32 %v2623_v1, %v2491_v9  ;;  %v1512_v18 = vadd.f32 %v4646_v42, %v1316_v27 }
 0x174   :  { %v2099_v32 = vadd.f32 %v2035_v39, %v1903_v11  ;;  %v929_v38 = vmin.f32 %v865_v19, 6.0  ;;  %v605_v46 = vadd.f32 %v4581_v33, %v604_v30  ;;  %v2757_v12 = vadd.f32 %v4714_v8, %v2686_v22 }
 0x175   :  { %995 = vst [vmem:[#allocation2 + $0xb1] sm:$0xff] %v930_v16  ;;  %v868_v47 = vmax.f32 %v610_v21, 0.0  ;;  %v2758_v48 = vadd.f32 %v4714_v8, %v2687_v34  ;;  %v2233_v52 = vmul.f32 %v4609_v13, %v4724_v26  ;;  %v1708_v54 = vadd.f32 %v1644_v15, %v1512_v18 }
 0x176   :  { %v2296_v51 = vadd.f32 %v2232_v49, %v2099_v32  ;;  %994 = vst [vmem:[#allocation2 + $0xa9] sm:$0xff] %v929_v38  ;;  %v867_v1 = vmax.f32 %v605_v46, 0.0  ;;  %v3810_v39 = vpop.f32.mrb[16].mxu0  ;;  %v2821_v53 = vmax.f32 %v2757_v12, 0.0  ;;  %v2625_v56 = vmul.f32 %v4606_v10, %v4727_v37  ;;  %v4750_v46 = vld [vmem:[#allocation2 + $0x60] sm:$0xff] }
 0x177   :  { %v932_v58 = vmin.f32 %v868_v47, 6.0  ;;  %v620_v60 = vadd.f32 %v3810_v39, %v4581_v33  ;;  %v614_v42 = vpop.f32.mrb[17].mxu0  ;;  %v2822_v2 = vmax.f32 %v2758_v48, 0.0  ;;  %v1904_v19 = vadd.f32 %v4621_v23, %v1708_v54  ;;  %v4757_v39 = vld [vmem:[#allocation2 + $0x62] sm:$0xff] }
 0x178   :  { %v2492_v7 = vadd.f32 %v4678_v6, %v2296_v51  ;;  %v931_v9 = vmin.f32 %v867_v1, 6.0  ;;  %v615_v49 = vadd.f32 %v4581_v33, %v614_v42  ;;  %v2885_v11 = vmin.f32 %v2821_v53, 6.0 }
 0x179   :  { %997 = vst [vmem:[#allocation2 + $0xc9] sm:$0xff] %v932_v58  ;;  %v870_v20 = vmax.f32 %v620_v60, 0.0  ;;  %v2886_v22 = vmin.f32 %v2822_v2, 6.0  ;;  %v1121_v27 = vmul.f32 %v4668_v61, %v4579_v31  ;;  %v2100_v30 = vadd.f32 %v2036_v40, %v1904_v19 }
 0x17a   :  { %v2688_v15 = vadd.f32 %v2624_v41, %v2492_v7  ;;  %996 = vst [vmem:[#allocation2 + $0xc1] sm:$0xff] %v931_v9  ;;  %v869_v16 = vmax.f32 %v615_v49, 0.0  ;;  %v3813_v21 = vpop.f32.mrb[18].mxu0  ;;  %3912 = vmatprep.mubr.f32.mxu0 %v2885_v11  ;;  %v1449_v6 = vmul.f32 %v4670_v62, %v4588_v43  ;;  %v1645_v34 = vmul.f32 %v4698_v17, %v4599_v3 }
 0x17b   :  { %v934_v32 = vmin.f32 %v870_v20, 6.0  ;;  %v630_v23 = vadd.f32 %v3813_v21, %v4581_v33  ;;  %v624_v38 = vpop.f32.mrb[19].mxu0  ;;  %3913 = vmatmul.mubr.f32.vlgmr.msra.gmra.mrb[64].mxu0 %v2886_v22  ;;  %v1317_v61 = vadd.f32 %v4639_v35, %v1121_v27  ;;  %v2297_v18 = vadd.f32 %v2233_v52, %v2100_v30 }
 0x17c   :  { %v2759_v41 = vadd.f32 %v4714_v8, %v2688_v15  ;;  %v933_v12 = vmin.f32 %v869_v16, 6.0  ;;  %v625_v40 = vadd.f32 %v4581_v33, %v624_v38  ;;  %v1841_v62 = vmul.f32 %v4597_v0, %v4632_v29 }
 0x17d   :  { %999 = vst [vmem:[#allocation2 + $0xe1] sm:$0xff] %v934_v32  ;;  %v872_v47 = vmax.f32 %v630_v23, 0.0  ;;  %v1513_v51 = vadd.f32 %v1449_v6, %v1317_v61  ;;  %v2037_v1 = vmul.f32 %v4700_v45, %v4601_v4  ;;  %v2493_v54 = vadd.f32 %v4650_v44, %v2297_v18 }
 0x17e   :  { %v2823_v48 = vmax.f32 %v2759_v41, 0.0  ;;  %998 = vst [vmem:[#allocation2 + $0xd9] sm:$0xff] %v933_v12  ;;  %v871_v35 = vmax.f32 %v625_v40, 0.0  ;;  %v3816_v53 = vpop.f32.mrb[20].mxu0  ;;  %v2234_v52 = vmul.f32 %v4609_v13, %v4750_v46  ;;  %v2430_v58 = vmul.f32 %v4603_v5, %v4662_v55  ;;  %v4781_v41 = vld [vmem:[#allocation2 + $0x6a] sm:$0xff] }
 0x17f   :  { %v936_v60 = vmin.f32 %v872_v47, 6.0  ;;  %v640_v42 = vadd.f32 %v3816_v53, %v4581_v33  ;;  %v634_v7 = vpop.f32.mrb[21].mxu0  ;;  %v1709_v9 = vadd.f32 %v1645_v34, %v1513_v51  ;;  %v2689_v19 = vadd.f32 %v2625_v56, %v2493_v54  ;;  %v4777_v34 = vld [vmem:[#allocation2 + $0x68] sm:$0xff] }
 0x180   :  { %v2887_v2 = vmin.f32 %v2823_v48, 6.0  ;;  %v935_v49 = vmin.f32 %v871_v35, 6.0  ;;  %v635_v11 = vadd.f32 %v4581_v33, %v634_v7  ;;  %v2626_v20 = vmul.f32 %v4606_v10, %v4757_v39 }
 0x181   :  { %1001 = vst [vmem:[#allocation2 + $0xf9] sm:$0xff] %v936_v60  ;;  %v874_v44 = vmax.f32 %v640_v42, 0.0  ;;  %v1905_v22 = vadd.f32 %v1841_v62, %v1709_v9  ;;  %v1122_v15 = vmul.f32 %v4672_v63, %v4579_v31  ;;  %v1450_v27 = vmul.f32 %v4665_v59, %v4588_v43 }
 0x182   :  { %3915 = vmatprep.mubr.f32.mxu0 %v2887_v2  ;;  %1000 = vst [vmem:[#allocation2 + $0xf1] sm:$0xff] %v935_v49  ;;  %v873_v16 = vmax.f32 %v635_v11, 0.0  ;;  %v2760_v21 = vadd.f32 %v4714_v8, %v2689_v19  ;;  %v3819_v30 = vpop.f32.mrb[22].mxu0  ;;  %v1646_v56 = vmul.f32 %v4724_v26, %v4599_v3  ;;  %v1842_v6 = vmul.f32 %v4597_v0, %v4623_v24 }
 0x183   :  { %v938_v32 = vmin.f32 %v874_v44, 6.0  ;;  %v650_v23 = vadd.f32 %v3819_v30, %v4581_v33  ;;  %v2101_v63 = vadd.f32 %v2037_v1, %v1905_v22  ;;  %v644_v38 = vpop.f32.mrb[23].mxu0  ;;  %v1318_v59 = vadd.f32 %v4630_v28, %v1122_v15 }
 0x184   :  { %v937_v61 = vmin.f32 %v873_v16, 6.0  ;;  %v2824_v12 = vmax.f32 %v2760_v21, 0.0  ;;  %v645_v40 = vadd.f32 %v4581_v33, %v644_v38  ;;  %v2038_v18 = vmul.f32 %v4727_v37, %v4601_v4  ;;  %v4803_v16 = vld [vmem:[#allocation2 + $0x7a] sm:$0xff] }
 0x185   :  { %1003 = vst [vmem:[#allocation2 + $0x111] sm:$0xff] %v938_v32  ;;  %v876_v62 = vmax.f32 %v650_v23, 0.0  ;;  %v2298_v47 = vadd.f32 %v2234_v52, %v2101_v63  ;;  %v1514_v48 = vadd.f32 %v1450_v27, %v1318_v59  ;;  %v2235_v51 = vmul.f32 %v4609_v13, %v4777_v34  ;;  %v4793_v52 = vld [vmem:[#allocation2 + $0x78] sm:$0xff] }
 0x186   :  { %1002 = vst [vmem:[#allocation2 + $0x109] sm:$0xff] %v937_v61  ;;  %v2888_v1 = vmin.f32 %v2824_v12, 6.0  ;;  %v875_v35 = vmax.f32 %v645_v40, 0.0  ;;  %v2431_v28 = vmul.f32 %v4603_v5, %v4657_v50  ;;  %v2627_v53 = vmul.f32 %v4606_v10, %v4781_v41  ;;  %v3822_v54 = vpop.f32.mrb[24].mxu0 }
 0x187   :  { %v940_v60 = vmin.f32 %v876_v62, 6.0  ;;  %v2494_v42 = vadd.f32 %v2430_v58, %v2298_v47  ;;  %v1710_v2 = vadd.f32 %v1646_v56, %v1514_v48  ;;  %v660_v7 = vadd.f32 %v3822_v54, %v4581_v33  ;;  %v654_v9 = vpop.f32.mrb[25].mxu0  ;;  %v4825_v47 = vld [vmem:[#allocation2 + $0x80] sm:$0xff] }
 0x188   :  { %3916 = vmatmul.mubr.f32.gmra.mrb[66].mxu0 %v2888_v1  ;;  %v939_v49 = vmin.f32 %v875_v35, 6.0  ;;  %v1123_v11 = vmul.f32 %v4698_v17, %v4579_v31  ;;  %v1255_v19 = vmul.f32 %v4583_v36, %v4632_v29  ;;  %v1451_v44 = vmul.f32 %v4700_v45, %v4588_v43 }
 0x189   :  { %1005 = vst [vmem:[#allocation2 + $0x129] sm:$0xff] %v940_v60  ;;  %v2690_v22 = vadd.f32 %v2626_v20, %v2494_v42  ;;  %v1906_v58 = vadd.f32 %v1842_v6, %v1710_v2  ;;  %v878_v15 = vmax.f32 %v660_v7, 0.0  ;;  %v1647_v27 = vmul.f32 %v4750_v46, %v4599_v3 }
 0x18a   :  { %1004 = vst [vmem:[#allocation2 + $0x121] sm:$0xff] %v939_v49  ;;  %v1319_v21 = vadd.f32 %v1255_v19, %v1123_v11  ;;  %v1843_v17 = vmul.f32 %v4597_v0, %v4662_v55  ;;  %v2039_v29 = vmul.f32 %v4757_v39, %v4601_v4  ;;  %v2236_v45 = vmul.f32 %v4609_v13, %v4793_v52  ;;  %v3825_v30 = vpop.f32.mrb[26].mxu0 }
 0x18b   :  { %v2761_v20 = vadd.f32 %v4714_v8, %v2690_v22  ;;  %v2102_v56 = vadd.f32 %v2038_v18, %v1906_v58  ;;  %v942_v6 = vmin.f32 %v878_v15, 6.0  ;;  %v2432_v32 = vmul.f32 %v4603_v5, %v4690_v25  ;;  %v664_v23 = vpop.f32.mrb[27].mxu0 }
 0x18c   :  { %v1515_v63 = vadd.f32 %v1451_v44, %v1319_v21  ;;  %v4816_v38 = vmul.f32 %v4606_v10, %v4803_v16  ;;  %v655_v59 = vadd.f32 %v4581_v33, %v654_v9  ;;  %v1124_v61 = vmul.f32 %v4724_v26, %v4579_v31  ;;  %v4831_v26 = vld [vmem:[#allocation2 + $0x82] sm:$0xff] }
 0x18d   :  { %v2825_v12 = vmax.f32 %v2761_v20, 0.0  ;;  %v2299_v40 = vadd.f32 %v2235_v51, %v2102_v56  ;;  %1007 = vst [vmem:[#allocation2 + $0x141] sm:$0xff] %v942_v6  ;;  %v1256_v18 = vmul.f32 %v4583_v36, %v4623_v24  ;;  %v1452_v62 = vmul.f32 %v4727_v37, %v4588_v43 }
 0x18e   :  { %v1711_v48 = vadd.f32 %v1647_v27, %v1515_v63  ;;  %v877_v1 = vmax.f32 %v655_v59, 0.0  ;;  %v1648_v35 = vmul.f32 %v4777_v34, %v4599_v3  ;;  %v1844_v54 = vmul.f32 %v4597_v0, %v4657_v50  ;;  %v4833_v51 = vpop.f32.mrb[28].mxu0  ;;  %v4854_v27 = vld [vmem:[#allocation2 + $0x90] sm:$0xff] }
 0x18f   :  { %v2889_v60 = vmin.f32 %v2825_v12, 6.0  ;;  %v2495_v42 = vadd.f32 %v2431_v28, %v2299_v40  ;;  %v1320_v24 = vadd.f32 %v1256_v18, %v1124_v61  ;;  %v2040_v37 = vmul.f32 %v4781_v41, %v4601_v4  ;;  %v4837_v2 = vpop.f32.mrb[29].mxu0  ;;  %v1190_v40 = vld [vmem:[#allocation2 + $0x69] sm:$0xff] }
 0x190   :  { %v1907_v7 = vadd.f32 %v1843_v17, %v1711_v48  ;;  %v941_v9 = vmin.f32 %v877_v1, 6.0  ;;  %v2237_v49 = vmul.f32 %v4609_v13, %v4825_v47  ;;  %v2433_v50 = vmul.f32 %v4603_v5, %v4685_v14 }
 0x191   :  { %3918 = vmatprep.mubr.f32.mxu0 %v2889_v60  ;;  %v2691_v11 = vadd.f32 %v2627_v53, %v2495_v42  ;;  %v1516_v19 = vadd.f32 %v1452_v62, %v1320_v24  ;;  %v4845_v28 = vmul.f32 %v4606_v10, %v4831_v26  ;;  %v670_v44 = vadd.f32 %v3825_v30, %v4581_v33  ;;  %v4861_v30 = vld [vmem:[#allocation2 + $0x92] sm:$0xff] }
 0x192   :  { %v2103_v22 = vadd.f32 %v2039_v29, %v1907_v7  ;;  %1006 = vst [vmem:[#allocation2 + $0x139] sm:$0xff] %v941_v9  ;;  %v1125_v58 = vmul.f32 %v4750_v46, %v4579_v31  ;;  %v1257_v15 = vmul.f32 %v4583_v36, %v4662_v55  ;;  %v1453_v14 = vmul.f32 %v4757_v39, %v4588_v43  ;;  %v4856_v53 = vpop.f32.mrb[30].mxu0 }
 0x193   :  { %v2762_v21 = vadd.f32 %v4714_v8, %v2691_v11  ;;  %v1712_v17 = vadd.f32 %v1648_v35, %v1516_v19  ;;  %v880_v20 = vmax.f32 %v670_v44, 0.0  ;;  %v1649_v29 = vmul.f32 %v4793_v52, %v4599_v3  ;;  %v4863_v46 = vpop.f32.mrb[31].mxu0  ;;  %v4890_v11 = vld [vmem:[#allocation2 + $0x98] sm:$0xff] }
 0x194   :  { %v2300_v56 = vadd.f32 %v2236_v45, %v2103_v22  ;;  %v1321_v55 = vadd.f32 %v1257_v15, %v1125_v58  ;;  %v1845_v39 = vmul.f32 %v4597_v0, %v4690_v25  ;;  %v2041_v6 = vmul.f32 %v4803_v16, %v4601_v4  ;;  %v4877_v25 = vld [vmem:[#allocation2 + $0x81] sm:$0xff]  ;;  %v4892_v19 = vld [vmem:[#allocation2 + $0x99] sm:$0xff] }
 0x195   :  { %v2826_v63 = vmax.f32 %v2762_v21, 0.0  ;;  %v1908_v59 = vadd.f32 %v1844_v54, %v1712_v17  ;;  %v944_v61 = vmin.f32 %v880_v20, 6.0  ;;  %v2238_v12 = vmul.f32 %v4609_v13, %v4854_v27 }
 0x196   :  { %v2496_v18 = vadd.f32 %v2432_v32, %v2300_v56  ;;  %v1517_v62 = vadd.f32 %v1453_v14, %v1321_v55  ;;  %v2434_v48 = vmul.f32 %v4603_v5, %v4708_v57  ;;  %v4875_v45 = vmul.f32 %v4606_v10, %v4861_v30  ;;  %v4879_v1 = vpop.f32.mrb[32].mxu0  ;;  %v1191_v14 = vld [vmem:[#allocation2 + $0x79] sm:$0xff] }
 0x197   :  { %v2890_v35 = vmin.f32 %v2826_v63, 6.0  ;;  %v2104_v54 = vadd.f32 %v2040_v37, %v1908_v59  ;;  %1009 = vst [vmem:[#allocation2 + $0x159] sm:$0xff] %v944_v61  ;;  %v665_v60 = vadd.f32 %v4581_v33, %v664_v23  ;;  %v1126_v32 = vmul.f32 %v4777_v34, %v4579_v31  ;;  %v4884_v42 = vpop.f32.mrb[33].mxu0 }
 0x198   :  { %v2692_v57 = vadd.f32 %v4816_v38, %v2496_v18  ;;  %v1713_v24 = vadd.f32 %v1649_v29, %v1517_v62  ;;  %v1258_v7 = vmul.f32 %v4583_v36, %v1190_v40  ;;  %v1454_v9 = vmul.f32 %v4781_v41, %v4588_v43  ;;  %v4898_v38 = vld [vmem:[#allocation2 + $0x9a] sm:$0xff]  ;;  %v4921_v62 = vld [vmem:[#allocation2 + $0x91] sm:$0xff] }
 0x199   :  { %3919 = vmatmul.mubr.f32.gmra.mrb[68].mxu0 %v2890_v35  ;;  %v2301_v37 = vadd.f32 %v2237_v49, %v2104_v54  ;;  %v879_v23 = vmax.f32 %v665_v60, 0.0  ;;  %v1650_v34 = vmul.f32 %v4825_v47, %v4599_v3  ;;  %v1846_v44 = vmul.f32 %v4597_v0, %v4877_v25 }
 0x19a   :  { %v2763_v22 = vadd.f32 %v4714_v8, %v2692_v57  ;;  %v1909_v58 = vadd.f32 %v1845_v39, %v1713_v24  ;;  %v1322_v15 = vadd.f32 %v1258_v7, %v1126_v32  ;;  %v2042_v41 = vmul.f32 %v4831_v26, %v4601_v4  ;;  %v4903_v21 = vpop.f32.mrb[34].mxu0  ;;  %v4925_v32 = vld [vmem:[#allocation2 + $0xa8] sm:$0xff] }
 0x19b   :  { %v2497_v49 = vadd.f32 %v2433_v50, %v2301_v37  ;;  %v943_v17 = vmin.f32 %v879_v23, 6.0  ;;  %v2239_v20 = vmul.f32 %v4609_v13, %v4890_v11  ;;  %v2435_v29 = vmul.f32 %v4603_v5, %v4892_v19  ;;  %v4909_v56 = vpop.f32.mrb[35].mxu0  ;;  %v4932_v7 = vld [vmem:[#allocation2 + $0xa9] sm:$0xff] }
 0x19c   :  { %v2827_v55 = vmax.f32 %v2763_v22, 0.0  ;;  %v2105_v63 = vadd.f32 %v2041_v6, %v1909_v58  ;;  %v1518_v39 = vadd.f32 %v1454_v9, %v1322_v15  ;;  %v4913_v59 = vmul.f32 %v4606_v10, %v4898_v38  ;;  %v4934_v9 = vld [vmem:[#allocation2 + $0xaa] sm:$0xff] }
 0x19d   :  { %v2693_v61 = vadd.f32 %v4845_v28, %v2497_v49  ;;  %1008 = vst [vmem:[#allocation2 + $0x151] sm:$0xff] %v943_v17  ;;  %v680_v50 = vadd.f32 %v4833_v51, %v4581_v33  ;;  %v1127_v40 = vmul.f32 %v4793_v52, %v4579_v31  ;;  %v1259_v18 = vmul.f32 %v4583_v36, %v1191_v14 }
 0x19e   :  { %v2891_v35 = vmin.f32 %v2827_v55, 6.0  ;;  %v2302_v6 = vadd.f32 %v2238_v12, %v2105_v63  ;;  %v1714_v54 = vadd.f32 %v1650_v34, %v1518_v39  ;;  %v1455_v60 = vmul.f32 %v4803_v16, %v4588_v43  ;;  %v4927_v28 = vpop.f32.mrb[36].mxu0 }
 0x19f   :  { %v2764_v57 = vadd.f32 %v4714_v8, %v2693_v61  ;;  %v882_v51 = vmax.f32 %v680_v50, 0.0  ;;  %v1323_v24 = vadd.f32 %v1259_v18, %v1127_v40  ;;  %v1651_v52 = vmul.f32 %v4854_v27, %v4599_v3  ;;  %v4936_v12 = vpop.f32.mrb[37].mxu0 }
 0x1a0   :  { %3921 = vmatprep.mubr.f32.mxu1 %v2891_v35  ;;  %v2498_v37 = vadd.f32 %v2434_v48, %v2302_v6  ;;  %v1910_v16 = vadd.f32 %v1846_v44, %v1714_v54  ;;  %v1847_v23 = vmul.f32 %v4597_v0, %v4921_v62  ;;  %v2043_v34 = vmul.f32 %v4861_v30, %v4601_v4  ;;  %v4962_v6 = vld [vmem:[#allocation2 + $0xb0] sm:$0xff] }
 0x1a1   :  { %v2828_v22 = vmax.f32 %v2764_v57, 0.0  ;;  %v946_v58 = vmin.f32 %v882_v51, 6.0  ;;  %v1519_v15 = vadd.f32 %v1455_v60, %v1323_v24  ;;  %v2240_v14 = vmul.f32 %v4609_v13, %v4925_v32  ;;  %v4964_v54 = vld [vmem:[#allocation2 + $0xb1] sm:$0xff] }
 0x1a2   :  { %v2694_v49 = vadd.f32 %v4875_v45, %v2498_v37  ;;  %v2106_v17 = vadd.f32 %v2042_v41, %v1910_v16  ;;  %v2436_v55 = vmul.f32 %v4603_v5, %v4932_v7  ;;  %v2632_v48 = vmul.f32 %v4606_v10, %v4934_v9  ;;  %v4949_v44 = vpop.f32.mrb[38].mxu0 }
 0x1a3   :  { %v2892_v63 = vmin.f32 %v2828_v22, 6.0  ;;  %1011 = vst [vmem:[#allocation2 + $0x171] sm:$0xff] %v946_v58  ;;  %v1715_v39 = vadd.f32 %v1651_v52, %v1519_v15  ;;  %v675_v61 = vadd.f32 %v4581_v33, %v4837_v2  ;;  %v1128_v50 = vmul.f32 %v4825_v47, %v4579_v31  ;;  %v4955_v40 = vpop.f32.mrb[39].mxu0 }
 0x1a4   :  { %v2765_v45 = vadd.f32 %v4714_v8, %v2694_v49  ;;  %v2303_v41 = vadd.f32 %v2239_v20, %v2106_v17  ;;  %v1260_v18 = vmul.f32 %v4877_v25, %v4583_v36  ;;  %v1456_v35 = vmul.f32 %v4831_v26, %v4588_v43  ;;  %v4970_v20 = vld [vmem:[#allocation2 + $0xb2] sm:$0xff] }
 0x1a5   :  { %3922 = vmatmul.mubr.f32.vlgmr.msra.gmra.mrb[0].mxu1 %v2892_v63  ;;  %v1911_v2 = vadd.f32 %v1847_v23, %v1715_v39  ;;  %v881_v60 = vmax.f32 %v675_v61, 0.0  ;;  %v1652_v47 = vmul.f32 %v4890_v11, %v4599_v3  ;;  %v1848_v57 = vmul.f32 %v4892_v19, %v4597_v0 }
 0x1a6   :  { %v2829_v51 = vmax.f32 %v2765_v45, 0.0  ;;  %v2499_v25 = vadd.f32 %v2435_v29, %v2303_v41  ;;  %v1324_v24 = vadd.f32 %v1260_v18, %v1128_v50  ;;  %v2044_v26 = vmul.f32 %v4898_v38, %v4601_v4  ;;  %v4974_v52 = vpop.f32.mrb[40].mxu0  ;;  %v4991_v50 = vld [vmem:[#allocation2 + $0xc0] sm:$0xff] }
 0x1a7   :  { %v2107_v37 = vadd.f32 %v2043_v34, %v1911_v2  ;;  %v945_v16 = vmin.f32 %v881_v60, 6.0  ;;  %v2241_v23 = vmul.f32 %v4609_v13, %v4962_v6  ;;  %v2437_v22 = vmul.f32 %v4603_v5, %v4964_v54  ;;  %v4980_v58 = vpop.f32.mrb[41].mxu0  ;;  %v4998_v18 = vld [vmem:[#allocation2 + $0xc1] sm:$0xff] }
 0x1a8   :  { %v2893_v15 = vmin.f32 %v2829_v51, 6.0  ;;  %v2695_v49 = vadd.f32 %v4913_v59, %v2499_v25  ;;  %v1520_v29 = vadd.f32 %v1456_v35, %v1324_v24  ;;  %v2633_v17 = vmul.f32 %v4606_v10, %v4970_v20  ;;  %v5004_v60 = vld [vmem:[#allocation2 + $0xc2] sm:$0xff] }
 0x1a9   :  { %v2304_v63 = vadd.f32 %v2240_v14, %v2107_v37  ;;  %1010 = vst [vmem:[#allocation2 + $0x169] sm:$0xff] %v945_v16  ;;  %v690_v34 = vadd.f32 %v4856_v53, %v4581_v33  ;;  %v1129_v39 = vmul.f32 %v4854_v27, %v4579_v31  ;;  %v1261_v61 = vmul.f32 %v4921_v62, %v4583_v36 }
 0x1aa   :  { %3924 = vmatprep.mubr.f32.mxu1 %v2893_v15  ;;  %v2766_v59 = vadd.f32 %v4714_v8, %v2695_v49  ;;  %v1716_v45 = vadd.f32 %v1652_v47, %v1520_v29  ;;  %v1457_v41 = vmul.f32 %v4861_v30, %v4588_v43  ;;  %v1653_v14 = vmul.f32 %v4925_v32, %v4599_v3  ;;  %v5000_v53 = vpop.f32.mrb[42].mxu0 }
 0x1ab   :  { %v2500_v27 = vadd.f32 %v2436_v55, %v2304_v63  ;;  %v884_v35 = vmax.f32 %v690_v34, 0.0  ;;  %v1325_v2 = vadd.f32 %v1261_v61, %v1129_v39  ;;  %v1849_v62 = vmul.f32 %v4932_v7, %v4597_v0  ;;  %v5006_v51 = vpop.f32.mrb[43].mxu0 }
 0x1ac   :  { %v2830_v47 = vmax.f32 %v2766_v59, 0.0  ;;  %v1912_v25 = vadd.f32 %v1848_v57, %v1716_v45  ;;  %v2045_v30 = vmul.f32 %v4934_v9, %v4601_v4  ;;  %v2242_v24 = vmul.f32 %v4609_v13, %v4991_v50  ;;  %v5025_v45 = vld [vmem:[#allocation2 + $0xc8] sm:$0xff] }
 0x1ad   :  { %v2696_v37 = vadd.f32 %v2632_v48, %v2500_v27  ;;  %v948_v16 = vmin.f32 %v884_v35, 6.0  ;;  %v1521_v55 = vadd.f32 %v1457_v41, %v1325_v2  ;;  %v2438_v15 = vmul.f32 %v4603_v5, %v4998_v18 }
 0x1ae   :  { %v2894_v49 = vmin.f32 %v2830_v47, 6.0  ;;  %v2108_v29 = vadd.f32 %v2044_v26, %v1912_v25  ;;  %v2634_v63 = vmul.f32 %v4606_v10, %v5004_v60  ;;  %v685_v57 = vadd.f32 %v4581_v33, %v4863_v46  ;;  %v5018_v34 = vpop.f32.mrb[44].mxu0  ;;  %v5037_v25 = vld [vmem:[#allocation2 + $0xca] sm:$0xff] }
 0x1af   :  { %v2767_v39 = vadd.f32 %v4714_v8, %v2696_v37  ;;  %1013 = vst [vmem:[#allocation2 + $0x189] sm:$0xff] %v948_v16  ;;  %v1717_v61 = vadd.f32 %v1653_v14, %v1521_v55  ;;  %v1130_v48 = vmul.f32 %v4890_v11, %v4579_v31  ;;  %v1262_v59 = vmul.f32 %v4892_v19, %v4583_v36  ;;  %v5027_v26 = vpop.f32.mrb[45].mxu0  ;;  %v5033_v14 = vld [vmem:[#allocation2 + $0xc9] sm:$0xff] }
 0x1b0   :  { %3925 = vmatmul.mubr.f32.gmra.mrb[2].mxu1 %v2894_v49  ;;  %v2305_v41 = vadd.f32 %v2241_v23, %v2108_v29  ;;  %v883_v27 = vmax.f32 %v685_v57, 0.0  ;;  %v1458_v46 = vmul.f32 %v4898_v38, %v4588_v43  ;;  %v1654_v35 = vmul.f32 %v4962_v6, %v4599_v3 }
 0x1b1   :  { %v2831_v2 = vmax.f32 %v2767_v39, 0.0  ;;  %v1913_v11 = vadd.f32 %v1849_v62, %v1717_v61  ;;  %v1326_v47 = vadd.f32 %v1262_v59, %v1130_v48  ;;  %v1850_v19 = vmul.f32 %v4964_v54, %v4597_v0 }
 0x1b2   :  { %v2501_v37 = vadd.f32 %v2437_v22, %v2305_v41  ;;  %v947_v16 = vmin.f32 %v883_v27, 6.0  ;;  %v2046_v23 = vmul.f32 %v4970_v20, %v4601_v4  ;;  %v2243_v38 = vmul.f32 %v4609_v13, %v5025_v45  ;;  %v5043_v55 = vpop.f32.mrb[46].mxu0 }
 0x1b3   :  { %6559 = vst [vmem:[#allocation21_spill] sm:$0xff] %v5043_v55  ;;  %v2895_v49 = vmin.f32 %v2831_v2, 6.0  ;;  %v2109_v29 = vadd.f32 %v2045_v30, %v1913_v11  ;;  %v1522_v57 = vadd.f32 %v1458_v46, %v1326_v47  ;;  %v2439_v62 = vmul.f32 %v4603_v5, %v5033_v14  ;;  %v5047_v39 = vpop.f32.mrb[47].mxu0  ;;  %v5061_v2 = vld [vmem:[#allocation2 + $0xd9] sm:$0xff] }
 0x1b4   :  { %6560 = vst [vmem:[#allocation22_spill] sm:$0xff] %v5047_v39  ;;  %v2697_v61 = vadd.f32 %v2633_v17, %v2501_v37  ;;  %1012 = vst [vmem:[#allocation2 + $0x181] sm:$0xff] %v947_v16  ;;  %v2635_v22 = vmul.f32 %v4606_v10, %v5037_v25  ;;  %v700_v48 = vadd.f32 %v4879_v1, %v4581_v33  ;;  %v5059_v17 = vld [vmem:[#allocation2 + $0xd8] sm:$0xff] }
 0x1b5   :  { %v1131_v59 = vmul.f32 %v4925_v32, %v4579_v31  ;;  %3927 = vmatprep.mubr.f32.mxu1 %v2895_v49  ;;  %v2306_v41 = vadd.f32 %v2242_v24, %v2109_v29  ;;  %v1718_v30 = vadd.f32 %v1654_v35, %v1522_v57  ;;  %v1263_v27 = vmul.f32 %v4932_v7, %v4583_v36  ;;  %v5068_v32 = vld [vmem:[#allocation2 + $0xda] sm:$0xff] }
 0x1b6   :  { %v1459_v46 = vmul.f32 %v4934_v9, %v4588_v43  ;;  %v2768_v11 = vadd.f32 %v4714_v8, %v2697_v61  ;;  %v886_v47 = vmax.f32 %v700_v48, 0.0  ;;  %v1655_v33 = vmul.f32 %v4991_v50, %v4599_v3  ;;  %v5070_v24 = vpop.f32.mrb[48].mxu0 }
 0x1b7   :  { %v1851_v1 = vmul.f32 %v4998_v18, %v4597_v0  ;;  %v2502_v7 = vadd.f32 %v2438_v15, %v2306_v41  ;;  %v1914_v35 = vadd.f32 %v1850_v19, %v1718_v30  ;;  %v1327_v9 = vadd.f32 %v1263_v27, %v1131_v59  ;;  %v5074_v16 = vpop.f32.mrb[49].mxu0  ;;  %v5082_v59 = vld [vmem:[#allocation8] ss:$0 sm:$0xff] }
 0x1b8   :  { %v2047_v37 = vmul.f32 %v5004_v60, %v4601_v4  ;;  %v2832_v49 = vmax.f32 %v2768_v11, 0.0  ;;  %v950_v29 = vmin.f32 %v886_v47, 6.0  ;;  %v2244_v57 = vmul.f32 %v4609_v13, %v5059_v17 }
 0x1b9   :  { %v2440_v61 = vmul.f32 %v4603_v5, %v5061_v2  ;;  %v2698_v48 = vadd.f32 %v2634_v63, %v2502_v7  ;;  %v2110_v39 = vadd.f32 %v2046_v23, %v1914_v35  ;;  %v1523_v55 = vadd.f32 %v1459_v46, %v1327_v9  ;;  %v5095_v7 = vld [vmem:[#allocation2 + $0xe0] sm:$0xff] }
 0x1ba   :  { %v2636_v15 = vmul.f32 %v4606_v10, %v5068_v32  ;;  %v2896_v19 = vmin.f32 %v2832_v49, 6.0  ;;  %1015 = vst [vmem:[#allocation2 + $0x1d1] sm:$0xff] %v950_v29  ;;  %v695_v41 = vadd.f32 %v5082_v59, %v4884_v42  ;;  %v1132_v30 = vmul.f32 %v4962_v6, %v4579_v31  ;;  %v5090_v11 = vpop.f32.mrb[50].mxu0  ;;  %v5097_v35 = vld [vmem:[#allocation2 + $0xe1] sm:$0xff] }
 0x1bb   :  { %v1264_v27 = vmul.f32 %v4964_v54, %v4583_v36  ;;  %6561 = vst [vmem:[#allocation23_spill] sm:$0xff] %v5090_v11  ;;  %v2769_v63 = vadd.f32 %v4714_v8, %v2698_v48  ;;  %v2307_v23 = vadd.f32 %v2243_v38, %v2110_v39  ;;  %v1719_v46 = vadd.f32 %v1655_v33, %v1523_v55  ;;  %v5099_v42 = vpop.f32.mrb[51].mxu0  ;;  %v5105_v38 = vld [vmem:[#allocation2 + $0xe2] sm:$0xff] }
 0x1bc   :  { %v1460_v47 = vmul.f32 %v4970_v20, %v4588_v43  ;;  %6562 = vst [vmem:[#allocation24_spill] sm:$0xff] %v5099_v42  ;;  %3928 = vmatmul.mubr.f32.gmra.mrb[4].mxu1 %v2896_v19  ;;  %v885_v6 = vmax.f32 %v695_v41, 0.0  ;;  %v1656_v54 = vmul.f32 %v5025_v45, %v4599_v3  ;;  %v1852_v49 = vmul.f32 %v5033_v14, %v4597_v0 }
 0x1bd   :  { %v1328_v9 = vadd.f32 %v1264_v27, %v1132_v30  ;;  %v2833_v55 = vmax.f32 %v2769_v63, 0.0  ;;  %v2503_v39 = vadd.f32 %v2439_v62, %v2307_v23  ;;  %v1915_v20 = vadd.f32 %v1851_v1, %v1719_v46 }
 0x1be   :  { %v2048_v33 = vmul.f32 %v5037_v25, %v4601_v4  ;;  %v949_v29 = vmin.f32 %v885_v6, 6.0  ;;  %v2245_v19 = vmul.f32 %v4609_v13, %v5095_v7  ;;  %v2441_v41 = vmul.f32 %v4603_v5, %v5097_v35  ;;  %v5113_v30 = vpop.f32.mrb[52].mxu0 }
 0x1bf   :  { %v1524_v48 = vadd.f32 %v1460_v47, %v1328_v9  ;;  %v2897_v27 = vmin.f32 %v2833_v55, 6.0  ;;  %v2699_v42 = vadd.f32 %v2635_v22, %v2503_v39  ;;  %v2111_v11 = vadd.f32 %v2047_v37, %v1915_v20  ;;  %v5123_v47 = vld [vmem:[#allocation2 + $0xf0] sm:$0xff]  ;;  %v5125_v6 = vpop.f32.mrb[53].mxu0 }
 0x1c0   :  { %v2637_v62 = vmul.f32 %v4606_v10, %v5105_v38  ;;  %1014 = vst [vmem:[#allocation2 + $0x1c9] sm:$0xff] %v949_v29  ;;  %v710_v63 = vadd.f32 %v5082_v59, %v4903_v21  ;;  %v1133_v23 = vmul.f32 %v4991_v50, %v4579_v31  ;;  %v1265_v46 = vmul.f32 %v4998_v18, %v4583_v36  ;;  %v5136_v20 = vld [vmem:[#allocation2 + $0xf2] sm:$0xff] }
 0x1c1   :  { %v1720_v1 = vadd.f32 %v1656_v54, %v1524_v48  ;;  %3930 = vmatprep.mubr.f32.mxu1 %v2897_v27  ;;  %v2770_v22 = vadd.f32 %v4714_v8, %v2699_v42  ;;  %v2308_v37 = vadd.f32 %v2244_v57, %v2111_v11  ;;  %v1461_v9 = vmul.f32 %v5004_v60, %v4588_v43  ;;  %v5132_v54 = vld [vmem:[#allocation2 + $0xf1] sm:$0xff] }
 0x1c2   :  { %v1657_v21 = vmul.f32 %v5059_v17, %v4599_v3  ;;  %v888_v55 = vmax.f32 %v710_v63, 0.0  ;;  %v1329_v39 = vadd.f32 %v1265_v46, %v1133_v23  ;;  %v1853_v18 = vmul.f32 %v5061_v2, %v4597_v0  ;;  %v5148_v46 = vpop.f32.mrb[54].mxu0 }
 0x1c3   :  { %v1916_v50 = vadd.f32 %v1852_v49, %v1720_v1  ;;  %v2834_v29 = vmax.f32 %v2770_v22, 0.0  ;;  %v2504_v48 = vadd.f32 %v2440_v61, %v2308_v37  ;;  %v2049_v57 = vmul.f32 %v5068_v32, %v4601_v4 }
 0x1c4   :  { %v2246_v60 = vmul.f32 %v4609_v13, %v5123_v47  ;;  %v952_v42 = vmin.f32 %v888_v55, 6.0  ;;  %v1525_v27 = vadd.f32 %v1461_v9, %v1329_v39  ;;  %v2442_v49 = vmul.f32 %v4603_v5, %v5132_v54  ;;  %v5161_v39 = vld [vmem:[#allocation2 + $0xf9] sm:$0xff] }
 0x1c5   :  { %v2112_v11 = vadd.f32 %v2048_v33, %v1916_v50  ;;  %v2898_v1 = vmin.f32 %v2834_v29, 6.0  ;;  %v2700_v63 = vadd.f32 %v2636_v15, %v2504_v48  ;;  %v2638_v23 = vmul.f32 %v4606_v10, %v5136_v20  ;;  %v5154_v50 = vld [vmem:[#allocation2 + $0xf8] sm:$0xff] }
 0x1c6   :  { %v705_v61 = vadd.f32 %v5082_v59, %v4909_v56  ;;  %1017 = vst [vmem:[#allocation2 + $0x1e9] sm:$0xff] %v952_v42  ;;  %v1721_v37 = vadd.f32 %v1657_v21, %v1525_v27  ;;  %v1134_v33 = vmul.f32 %v5025_v45, %v4579_v31  ;;  %v1266_v9 = vmul.f32 %v5033_v14, %v4583_v36  ;;  %v5165_v48 = vld [vmem:[#allocation2 + $0xfa] sm:$0xff] }
 0x1c7   :  { %v2309_v22 = vadd.f32 %v2245_v19, %v2112_v11  ;;  %3931 = vmatmul.mubr.f32.gmra.mrb[6].mxu1 %v2898_v1  ;;  %v2771_v15 = vadd.f32 %v4714_v8, %v2700_v63  ;;  %v1462_v56 = vmul.f32 %v5037_v25, %v4588_v43  ;;  %v1658_v19 = vmul.f32 %v5095_v7, %v4599_v3 }
 0x1c8   :  { %v887_v55 = vmax.f32 %v705_v61, 0.0  ;;  %v1917_v29 = vadd.f32 %v1853_v18, %v1721_v37  ;;  %v1330_v45 = vadd.f32 %v1266_v9, %v1134_v33  ;;  %v1854_v14 = vmul.f32 %v5097_v35, %v4597_v0  ;;  %v5179_v9 = vpop.f32.mrb[55].mxu0 }
 0x1c9   :  { %v2505_v21 = vadd.f32 %v2441_v41, %v2309_v22  ;;  %v2835_v11 = vmax.f32 %v2771_v15, 0.0  ;;  %v2050_v27 = vmul.f32 %v5105_v38, %v4601_v4  ;;  %v2247_v25 = vmul.f32 %v4609_v13, %v5154_v50  ;;  %6563 = vst [vmem:[#allocation25_spill] sm:$0xff] %v5179_v9 }
 0x1ca   :  { %v951_v42 = vmin.f32 %v887_v55, 6.0  ;;  %v2113_v63 = vadd.f32 %v2049_v57, %v1917_v29  ;;  %v1526_v61 = vadd.f32 %v1462_v56, %v1330_v45  ;;  %v2443_v41 = vmul.f32 %v4603_v5, %v5161_v39  ;;  %v5184_v56 = vld [vmem:[#allocation2 + $0x108] sm:$0xff] }
 0x1cb   :  { %v2701_v1 = vadd.f32 %v2637_v62, %v2505_v21  ;;  %v2899_v18 = vmin.f32 %v2835_v11, 6.0  ;;  %v2639_v22 = vmul.f32 %v4606_v10, %v5165_v48  ;;  %v720_v37 = vadd.f32 %v5082_v59, %v4927_v28  ;;  %v5186_v21 = vld [vmem:[#allocation2 + $0x109] sm:$0xff] }
 0x1cc   :  { %1016 = vst [vmem:[#allocation2 + $0x1e1] sm:$0xff] %v951_v42  ;;  %v1135_v33 = vmul.f32 %v5059_v17, %v4579_v31  ;;  %v2310_v57 = vadd.f32 %v2246_v60, %v2113_v63  ;;  %v1722_v15 = vadd.f32 %v1658_v19, %v1526_v61  ;;  %v1267_v55 = vmul.f32 %v5061_v2, %v4583_v36  ;;  %v5194_v2 = vld [vmem:[#allocation2 + $0x10a] sm:$0xff] }
 0x1cd   :  { %v2772_v62 = vadd.f32 %v4714_v8, %v2701_v1  ;;  %3933 = vmatprep.mubr.f32.mxu1 %v2899_v18  ;;  %v890_v29 = vmax.f32 %v720_v37, 0.0  ;;  %v1463_v28 = vmul.f32 %v5068_v32, %v4588_v43  ;;  %v1659_v17 = vmul.f32 %v5123_v47, %v4599_v3 }
 0x1ce   :  { %v1855_v8 = vmul.f32 %v5132_v54, %v4597_v0  ;;  %v2506_v19 = vadd.f32 %v2442_v49, %v2310_v57  ;;  %v1918_v45 = vadd.f32 %v1854_v14, %v1722_v15  ;;  %v1331_v11 = vadd.f32 %v1267_v55, %v1135_v33  ;;  %v5210_v57 = vpop.f32.mrb[56].mxu0  ;;  %v5212_v15 = vld [vmem:[#allocation11] ss:$0 sm:$0xff] }
 0x1cf   :  { %v2836_v60 = vmax.f32 %v2772_v62, 0.0  ;;  %v954_v42 = vmin.f32 %v890_v29, 6.0  ;;  %v2051_v1 = vmul.f32 %v5136_v20, %v4601_v4  ;;  %v2248_v63 = vmul.f32 %v4609_v13, %v5184_v56 }
 0x1d0   :  { %v2444_v32 = vmul.f32 %v4603_v5, %v5186_v21  ;;  %v2702_v18 = vadd.f32 %v2638_v23, %v2506_v19  ;;  %v2114_v37 = vadd.f32 %v2050_v27, %v1918_v45  ;;  %v1527_v9 = vadd.f32 %v1463_v28, %v1331_v11  ;;  %v5217_v28 = vld [vmem:[#allocation2 + $0x110] sm:$0xff] }
 0x1d1   :  { %v2900_v61 = vmin.f32 %v2836_v60, 6.0  ;;  %1019 = vst [vmem:[#allocation2 + $0x201] sm:$0xff] %v954_v42  ;;  %v2640_v49 = vmul.f32 %v4606_v10, %v5194_v2  ;;  %v715_v14 = vadd.f32 %v5082_v59, %v4936_v12  ;;  %v1136_v33 = vmul.f32 %v5095_v7, %v4579_v31  ;;  %v5219_v12 = vld [vmem:[#allocation2 + $0x111] sm:$0xff] }
 0x1d2   :  { %v1268_v62 = vmul.f32 %v5097_v35, %v4583_v36  ;;  %v2773_v23 = vadd.f32 %v5212_v15, %v2702_v18  ;;  %v2311_v27 = vadd.f32 %v2247_v25, %v2114_v37  ;;  %v1723_v55 = vadd.f32 %v1659_v17, %v1527_v9  ;;  %v5225_v45 = vld [vmem:[#allocation2 + $0x112] sm:$0xff] }
 0x1d3   :  { %3934 = vmatmul.mubr.f32.gmra.mrb[8].mxu1 %v2900_v61  ;;  %v1464_v29 = vmul.f32 %v5105_v38, %v4588_v43  ;;  %v889_v7 = vmax.f32 %v715_v14, 0.0  ;;  %v1660_v35 = vmul.f32 %v5154_v50, %v4599_v3  ;;  %v1856_v19 = vmul.f32 %v5161_v39, %v4597_v0 }
 0x1d4   :  { %v1332_v60 = vadd.f32 %v1268_v62, %v1136_v33  ;;  %v2837_v11 = vmax.f32 %v2773_v23, 0.0  ;;  %v2507_v25 = vadd.f32 %v2443_v41, %v2311_v27  ;;  %v1919_v9 = vadd.f32 %v1855_v8, %v1723_v55  ;;  %v5241_v55 = vld [vmem:[#allocation2 + $0x120] sm:$0xff] }
 0x1d5   :  { %v2052_v38 = vmul.f32 %v5165_v48, %v4601_v4  ;;  %v953_v17 = vmin.f32 %v889_v7, 6.0  ;;  %v2249_v61 = vmul.f32 %v4609_v13, %v5217_v28  ;;  %v2445_v18 = vmul.f32 %v4603_v5, %v5219_v12 }
 0x1d6   :  { %v1528_v42 = vadd.f32 %v1464_v29, %v1332_v60  ;;  %v2901_v37 = vmin.f32 %v2837_v11, 6.0  ;;  %v2703_v14 = vadd.f32 %v2639_v22, %v2507_v25  ;;  %v2115_v33 = vadd.f32 %v2051_v1, %v1919_v9  ;;  %v5243_v29 = vpop.f32.mrb[57].mxu0  ;;  %v5250_v60 = vld [vmem:[#allocation2 + $0x121] sm:$0xff] }
 0x1d7   :  { %v2641_v62 = vmul.f32 %v4606_v10, %v5225_v45  ;;  %1018 = vst [vmem:[#allocation2 + $0x1f9] sm:$0xff] %v953_v17  ;;  %v730_v8 = vadd.f32 %v5082_v59, %v4949_v44  ;;  %v1137_v23 = vmul.f32 %v5123_v47, %v4579_v31  ;;  %v1269_v27 = vmul.f32 %v5132_v54, %v4583_v36  ;;  %v5254_v25 = vld [vmem:[#allocation2 + $0x122] sm:$0xff] }
 0x1d8   :  { %v1724_v41 = vadd.f32 %v1660_v35, %v1528_v42  ;;  %3936 = vmatprep.mubr.f32.mxu1 %v2901_v37  ;;  %v2774_v22 = vadd.f32 %v5212_v15, %v2703_v14  ;;  %v2312_v1 = vadd.f32 %v2248_v63, %v2115_v33  ;;  %v1465_v7 = vmul.f32 %v5136_v20, %v4588_v43 }
 0x1d9   :  { %v1661_v44 = vmul.f32 %v5184_v56, %v4599_v3  ;;  %v892_v35 = vmax.f32 %v730_v8, 0.0  ;;  %v1333_v11 = vadd.f32 %v1269_v27, %v1137_v23  ;;  %v1857_v54 = vmul.f32 %v5186_v21, %v4597_v0  ;;  %v5266_v23 = vpop.f32.mrb[58].mxu0 }
 0x1da   :  { %v1920_v47 = vadd.f32 %v1856_v19, %v1724_v41  ;;  %v2838_v9 = vmax.f32 %v2774_v22, 0.0  ;;  %v2508_v17 = vadd.f32 %v2444_v32, %v2312_v1  ;;  %v2053_v63 = vmul.f32 %v5194_v2, %v4601_v4 }
 0x1db   :  { %v2250_v20 = vmul.f32 %v4609_v13, %v5241_v55  ;;  %v956_v37 = vmin.f32 %v892_v35, 6.0  ;;  %v1529_v14 = vadd.f32 %v1465_v7, %v1333_v11  ;;  %v2446_v19 = vmul.f32 %v4603_v5, %v5250_v60  ;;  %v5272_v7 = vld [vmem:[#allocation2 + $0x128] sm:$0xff] }
 0x1dc   :  { %v2116_v42 = vadd.f32 %v2052_v38, %v1920_v47  ;;  %v2902_v33 = vmin.f32 %v2838_v9, 6.0  ;;  %v2704_v41 = vadd.f32 %v2640_v49, %v2508_v17  ;;  %v2642_v8 = vmul.f32 %v4606_v10, %v5254_v25  ;;  %v5279_v35 = vld [vmem:[#allocation2 + $0x129] sm:$0xff] }
 0x1dd   :  { %v725_v32 = vadd.f32 %v5082_v59, %v4955_v40  ;;  %1021 = vst [vmem:[#allocation2 + $0x219] sm:$0xff] %v956_v37  ;;  %v1725_v22 = vadd.f32 %v1661_v44, %v1529_v14  ;;  %v1138_v38 = vmul.f32 %v5154_v50, %v4579_v31  ;;  %v1270_v1 = vmul.f32 %v5161_v39, %v4583_v36  ;;  %v5283_v9 = vld [vmem:[#allocation2 + $0x12a] sm:$0xff] }
 0x1de   :  { %v2313_v27 = vadd.f32 %v2249_v61, %v2116_v42  ;;  %3937 = vmatmul.mubr.f32.gmra.mrb[10].mxu1 %v2902_v33  ;;  %v2775_v49 = vadd.f32 %v5212_v15, %v2704_v41  ;;  %v1466_v40 = vmul.f32 %v5165_v48, %v4588_v43  ;;  %v1662_v61 = vmul.f32 %v5217_v28, %v4599_v3 }
 0x1df   :  { %v891_v47 = vmax.f32 %v725_v32, 0.0  ;;  %v1921_v11 = vadd.f32 %v1857_v54, %v1725_v22  ;;  %v1334_v50 = vadd.f32 %v1270_v1, %v1138_v38  ;;  %v1858_v39 = vmul.f32 %v5219_v12, %v4597_v0  ;;  %v5297_v38 = vpop.f32.mrb[59].mxu0 }
 0x1e0   :  { %v2509_v44 = vadd.f32 %v2445_v18, %v2313_v27  ;;  %v2839_v17 = vmax.f32 %v2775_v49, 0.0  ;;  %v2054_v37 = vmul.f32 %v5225_v45, %v4601_v4  ;;  %v2251_v48 = vmul.f32 %v4609_v13, %v5272_v7  ;;  %6564 = vst [vmem:[#allocation26_spill] sm:$0xff] %v5297_v38 }
 0x1e1   :  { %v955_v42 = vmin.f32 %v891_v47, 6.0  ;;  %v2117_v33 = vadd.f32 %v2053_v63, %v1921_v11  ;;  %v1530_v41 = vadd.f32 %v1466_v40, %v1334_v50  ;;  %v2447_v18 = vmul.f32 %v4603_v5, %v5279_v35  ;;  %v5302_v47 = vld [vmem:[#allocation2 + $0x138] sm:$0xff] }
 0x1e2   :  { %v2705_v14 = vadd.f32 %v2641_v62, %v2509_v44  ;;  %v2903_v54 = vmin.f32 %v2839_v17, 6.0  ;;  %v2643_v32 = vmul.f32 %v4606_v10, %v5283_v9  ;;  %v740_v27 = vadd.f32 %v5082_v59, %v4974_v52  ;;  %v5304_v40 = vld [vmem:[#allocation2 + $0x139] sm:$0xff] }
 0x1e3   :  { %1020 = vst [vmem:[#allocation2 + $0x211] sm:$0xff] %v955_v42  ;;  %v1139_v22 = vmul.f32 %v5184_v56, %v4579_v31  ;;  %v2314_v63 = vadd.f32 %v2250_v20, %v2117_v33  ;;  %v1726_v1 = vadd.f32 %v1662_v61, %v1530_v41  ;;  %v1271_v49 = vmul.f32 %v5186_v21, %v4583_v36  ;;  %v5312_v21 = vld [vmem:[#allocation2 + $0x13a] sm:$0xff] }
 0x1e4   :  { %v2776_v62 = vadd.f32 %v5212_v15, %v2705_v14  ;;  %3939 = vmatprep.mubr.f32.mxu1 %v2903_v54  ;;  %v894_v44 = vmax.f32 %v740_v27, 0.0  ;;  %v1467_v52 = vmul.f32 %v5194_v2, %v4588_v43  ;;  %v1663_v56 = vmul.f32 %v5241_v55, %v4599_v3 }
 0x1e5   :  { %v1859_v11 = vmul.f32 %v5250_v60, %v4597_v0  ;;  %v2510_v61 = vadd.f32 %v2446_v19, %v2314_v63  ;;  %v1922_v50 = vadd.f32 %v1858_v39, %v1726_v1  ;;  %v1335_v17 = vadd.f32 %v1271_v49, %v1139_v22  ;;  %v5328_v63 = vpop.f32.mrb[60].mxu0 }
 0x1e6   :  { %v2840_v20 = vmax.f32 %v2776_v62, 0.0  ;;  %v958_v42 = vmin.f32 %v894_v44, 6.0  ;;  %v2055_v14 = vmul.f32 %v5254_v25, %v4601_v4  ;;  %v2252_v33 = vmul.f32 %v4609_v13, %v5302_v47  ;;  %v5333_v44 = vld [vmem:[#allocation2 + $0x140] sm:$0xff] }
 0x1e7   :  { %v2448_v2 = vmul.f32 %v4603_v5, %v5304_v40  ;;  %v2706_v54 = vadd.f32 %v2642_v8, %v2510_v61  ;;  %v2118_v27 = vadd.f32 %v2054_v37, %v1922_v50  ;;  %v1531_v38 = vadd.f32 %v1467_v52, %v1335_v17  ;;  %v5335_v52 = vld [vmem:[#allocation2 + $0x141] sm:$0xff] }
 0x1e8   :  { %v2904_v41 = vmin.f32 %v2840_v20, 6.0  ;;  %1023 = vst [vmem:[#allocation2 + $0x231] sm:$0xff] %v958_v42  ;;  %v2644_v19 = vmul.f32 %v4606_v10, %v5312_v21  ;;  %v735_v39 = vadd.f32 %v5082_v59, %v4980_v58  ;;  %v1140_v22 = vmul.f32 %v5217_v28, %v4579_v31  ;;  %v5341_v61 = vld [vmem:[#allocation2 + $0x142] sm:$0xff] }
 0x1e9   :  { %v1272_v62 = vmul.f32 %v5219_v12, %v4583_v36  ;;  %v2777_v8 = vadd.f32 %v5212_v15, %v2706_v54  ;;  %v2315_v37 = vadd.f32 %v2251_v48, %v2118_v27  ;;  %v1727_v1 = vadd.f32 %v1663_v56, %v1531_v38 }
 0x1ea   :  { %3940 = vmatmul.mubr.f32.gmra.mrb[12].mxu1 %v2904_v41  ;;  %v1468_v49 = vmul.f32 %v5225_v45, %v4588_v43  ;;  %v893_v58 = vmax.f32 %v735_v39, 0.0  ;;  %v1664_v28 = vmul.f32 %v5272_v7, %v4599_v3  ;;  %v1860_v12 = vmul.f32 %v5279_v35, %v4597_v0 }
 0x1eb   :  { %v1336_v20 = vadd.f32 %v1272_v62, %v1140_v22  ;;  %v2841_v50 = vmax.f32 %v2777_v8, 0.0  ;;  %v2511_v48 = vadd.f32 %v2447_v18, %v2315_v37  ;;  %v1923_v38 = vadd.f32 %v1859_v11, %v1727_v1  ;;  %v5357_v37 = vld [vmem:[#allocation2 + $0x150] sm:$0xff]  ;;  %v5359_v1 = vpop.f32.mrb[61].mxu0 }
 0x1ec   :  { %v2056_v45 = vmul.f32 %v5283_v9, %v4601_v4  ;;  %v957_v56 = vmin.f32 %v893_v58, 6.0  ;;  %v2253_v42 = vmul.f32 %v4609_v13, %v5333_v44  ;;  %v2449_v41 = vmul.f32 %v4603_v5, %v5335_v52  ;;  %v5366_v58 = vld [vmem:[#allocation2 + $0x151] sm:$0xff] }
 0x1ed   :  { %v1532_v17 = vadd.f32 %v1468_v49, %v1336_v20  ;;  %v2905_v54 = vmin.f32 %v2841_v50, 6.0  ;;  %v2707_v27 = vadd.f32 %v2643_v32, %v2511_v48  ;;  %v2119_v39 = vadd.f32 %v2055_v14, %v1923_v38  ;;  %v5370_v50 = vld [vmem:[#allocation2 + $0x152] sm:$0xff] }
 0x1ee   :  { %v2645_v22 = vmul.f32 %v4606_v10, %v5341_v61  ;;  %1022 = vst [vmem:[#allocation2 + $0x229] sm:$0xff] %v957_v56  ;;  %v750_v11 = vadd.f32 %v5082_v59, %v5000_v53  ;;  %v1141_v62 = vmul.f32 %v5241_v55, %v4579_v31  ;;  %v1273_v8 = vmul.f32 %v5250_v60, %v4583_v36 }
 0x1ef   :  { %v1728_v18 = vadd.f32 %v1664_v28, %v1532_v17  ;;  %3942 = vmatprep.mubr.f32.mxu1 %v2905_v54  ;;  %v2778_v32 = vadd.f32 %v5212_v15, %v2707_v27  ;;  %v2316_v14 = vadd.f32 %v2252_v33, %v2119_v39  ;;  %v1469_v49 = vmul.f32 %v5254_v25, %v4588_v43 }
 0x1f0   :  { %v1665_v53 = vmul.f32 %v5302_v47, %v4599_v3  ;;  %v896_v20 = vmax.f32 %v750_v11, 0.0  ;;  %v1337_v28 = vadd.f32 %v1273_v8, %v1141_v62  ;;  %v1861_v60 = vmul.f32 %v5304_v40, %v4597_v0  ;;  %v5382_v11 = vpop.f32.mrb[62].mxu0 }
 0x1f1   :  { %v1924_v55 = vadd.f32 %v1860_v12, %v1728_v18  ;;  %v2842_v48 = vmax.f32 %v2778_v32, 0.0  ;;  %v2512_v38 = vadd.f32 %v2448_v2, %v2316_v14  ;;  %v2057_v33 = vmul.f32 %v5312_v21, %v4601_v4  ;;  %v5388_v14 = vld [vmem:[#allocation2 + $0x158] sm:$0xff] }
 0x1f2   :  { %v2254_v25 = vmul.f32 %v4609_v13, %v5357_v37  ;;  %v960_v17 = vmin.f32 %v896_v20, 6.0  ;;  %v1533_v54 = vadd.f32 %v1469_v49, %v1337_v28  ;;  %v2450_v12 = vmul.f32 %v4603_v5, %v5366_v58  ;;  %v5399_v28 = vld [vmem:[#allocation2 + $0x15a] sm:$0xff] }
 0x1f3   :  { %v2120_v56 = vadd.f32 %v2056_v45, %v1924_v55  ;;  %v2906_v27 = vmin.f32 %v2842_v48, 6.0  ;;  %v2708_v39 = vadd.f32 %v2644_v19, %v2512_v38  ;;  %v2646_v18 = vmul.f32 %v4606_v10, %v5370_v50  ;;  %v5395_v55 = vld [vmem:[#allocation2 + $0x159] sm:$0xff] }
 0x1f4   :  { %v745_v2 = vadd.f32 %v5082_v59, %v5006_v51  ;;  %1025 = vst [vmem:[#allocation2 + $0x249] sm:$0xff] %v960_v17  ;;  %v1729_v8 = vadd.f32 %v1665_v53, %v1533_v54  ;;  %v1142_v45 = vmul.f32 %v5272_v7, %v4579_v31  ;;  %v1274_v32 = vmul.f32 %v5279_v35, %v4583_v36 }
 0x1f5   :  { %v2317_v62 = vadd.f32 %v2253_v42, %v2120_v56  ;;  %3943 = vmatmul.mubr.f32.gmra.mrb[14].mxu1 %v2906_v27  ;;  %v2779_v19 = vadd.f32 %v5212_v15, %v2708_v39  ;;  %v1470_v51 = vmul.f32 %v5283_v9, %v4588_v43  ;;  %v1666_v42 = vmul.f32 %v5333_v44, %v4599_v3 }
 0x1f6   :  { %v895_v49 = vmax.f32 %v745_v2, 0.0  ;;  %v1925_v20 = vadd.f32 %v1861_v60, %v1729_v8  ;;  %v1338_v7 = vadd.f32 %v1274_v32, %v1142_v45  ;;  %v1862_v35 = vmul.f32 %v5335_v52, %v4597_v0  ;;  %v5413_v8 = vpop.f32.mrb[63].mxu0 }
 0x1f7   :  { %v2513_v53 = vadd.f32 %v2449_v41, %v2317_v62  ;;  %v2843_v48 = vmax.f32 %v2779_v19, 0.0  ;;  %v2058_v56 = vmul.f32 %v5341_v61, %v4601_v4  ;;  %v2255_v9 = vmul.f32 %v4609_v13, %v5388_v14  ;;  %v5418_v19 = vld [vmem:[#allocation2 + $0x168] sm:$0xff] }
 0x1f8   :  { %v959_v38 = vmin.f32 %v895_v49, 6.0  ;;  %v2121_v54 = vadd.f32 %v2057_v33, %v1925_v20  ;;  %v1534_v27 = vadd.f32 %v1470_v51, %v1338_v7  ;;  %v2451_v41 = vmul.f32 %v4603_v5, %v5395_v55  ;;  %v5420_v49 = vld [vmem:[#allocation2 + $0x169] sm:$0xff] }
 0x1f9   :  { %v2709_v17 = vadd.f32 %v2645_v22, %v2513_v53  ;;  %v2907_v60 = vmin.f32 %v2843_v48, 6.0  ;;  %v2647_v39 = vmul.f32 %v4606_v10, %v5399_v28  ;;  %v760_v2 = vadd.f32 %v5082_v59, %v5018_v34 }
 0x1fa   :  { %1024 = vst [vmem:[#allocation2 + $0x241] sm:$0xff] %v959_v38  ;;  %v1143_v62 = vmul.f32 %v5302_v47, %v4579_v31  ;;  %v2318_v33 = vadd.f32 %v2254_v25, %v2121_v54  ;;  %v1730_v45 = vadd.f32 %v1666_v42, %v1534_v27  ;;  %v1275_v32 = vmul.f32 %v5304_v40, %v4583_v36  ;;  %v5428_v40 = vld [vmem:[#allocation2 + $0x16a] sm:$0xff] }
 0x1fb   :  { %v2780_v22 = vadd.f32 %v5212_v15, %v2709_v17  ;;  %3945 = vmatprep.mubr.f32.mxu1 %v2907_v60  ;;  %v898_v51 = vmax.f32 %v760_v2, 0.0  ;;  %v1471_v34 = vmul.f32 %v5312_v21, %v4588_v43  ;;  %v1667_v47 = vmul.f32 %v5357_v37, %v4599_v3 }
 0x1fc   :  { %v1863_v53 = vmul.f32 %v5366_v58, %v4597_v0  ;;  %v2514_v42 = vadd.f32 %v2450_v12, %v2318_v33  ;;  %v1926_v20 = vadd.f32 %v1862_v35, %v1730_v45  ;;  %v1339_v7 = vadd.f32 %v1275_v32, %v1143_v62  ;;  %v5447_v32 = vld [vmem:[#allocation2 + $0x170] sm:$0xff] }
 0x1fd   :  { %v2844_v25 = vmax.f32 %v2780_v22, 0.0  ;;  %v962_v48 = vmin.f32 %v898_v51, 6.0  ;;  %v2059_v38 = vmul.f32 %v5370_v50, %v4601_v4  ;;  %v2256_v17 = vmul.f32 %v4609_v13, %v5418_v19  ;;  %v5449_v51 = vld [vmem:[#allocation2 + $0x171] sm:$0xff] }
 0x1fe   :  { %v2452_v21 = vmul.f32 %v4603_v5, %v5420_v49  ;;  %v2710_v27 = vadd.f32 %v2646_v18, %v2514_v42  ;;  %v2122_v60 = vadd.f32 %v2058_v56, %v1926_v20  ;;  %v1535_v2 = vadd.f32 %v1471_v34, %v1339_v7 }
 0x1ff   :  { %v2908_v54 = vmin.f32 %v2844_v25, 6.0  ;;  %1027 = vst [vmem:[#allocation2 + $0x261] sm:$0xff] %v962_v48  ;;  %v2648_v12 = vmul.f32 %v4606_v10, %v5428_v40  ;;  %v755_v35 = vadd.f32 %v5082_v59, %v5027_v26  ;;  %v1144_v62 = vmul.f32 %v5333_v44, %v4579_v31  ;;  %v5455_v25 = vld [vmem:[#allocation2 + $0x172] sm:$0xff] }
 0x200   :  { %v1276_v22 = vmul.f32 %v5335_v52, %v4583_v36  ;;  %v2781_v33 = vadd.f32 %v5212_v15, %v2710_v27  ;;  %v2319_v45 = vadd.f32 %v2255_v9, %v2122_v60  ;;  %v1731_v18 = vadd.f32 %v1667_v47, %v1535_v2 }
 0x201   :  { %3946 = vmatmul.mubr.f32.gmra.mrb[16].mxu1 %v2908_v54  ;;  %v1472_v56 = vmul.f32 %v5341_v61, %v4588_v43  ;;  %v897_v34 = vmax.f32 %v755_v35, 0.0  ;;  %v1668_v44 = vmul.f32 %v5388_v14, %v4599_v3  ;;  %v1864_v52 = vmul.f32 %v5395_v55, %v4597_v0 }
 0x202   :  { %v1340_v26 = vadd.f32 %v1276_v22, %v1144_v62  ;;  %v2845_v42 = vmax.f32 %v2781_v33, 0.0  ;;  %v2515_v9 = vadd.f32 %v2451_v41, %v2319_v45  ;;  %v1927_v47 = vadd.f32 %v1863_v53, %v1731_v18  ;;  %v6565_v53 = vld [vmem:[#allocation21_spill] sm:$0xff]  ;;  %v5471_v45 = vld [vmem:[#allocation2 + $0x180] sm:$0xff] }
 0x203   :  { %v2060_v61 = vmul.f32 %v5399_v28, %v4601_v4  ;;  %v961_v20 = vmin.f32 %v897_v34, 6.0  ;;  %v2257_v48 = vmul.f32 %v4609_v13, %v5447_v32  ;;  %v2453_v54 = vmul.f32 %v4603_v5, %v5449_v51  ;;  %v2386_v34 = vld [vmem:[#allocation2 + $0x181] sm:$0xff] }
 0x204   :  { %v1536_v7 = vadd.f32 %v1472_v56, %v1340_v26  ;;  %v2909_v27 = vmin.f32 %v2845_v42, 6.0  ;;  %v2711_v60 = vadd.f32 %v2647_v39, %v2515_v9  ;;  %v2123_v2 = vadd.f32 %v2059_v38, %v1927_v47 }
 0x205   :  { %v2649_v35 = vmul.f32 %v4606_v10, %v5455_v25  ;;  %1026 = vst [vmem:[#allocation2 + $0x259] sm:$0xff] %v961_v20  ;;  %v770_v62 = vadd.f32 %v5082_v59, %v6565_v53  ;;  %v1145_v22 = vmul.f32 %v5357_v37, %v4579_v31  ;;  %v1277_v33 = vmul.f32 %v5366_v58, %v4583_v36  ;;  %v2582_v58 = vld [vmem:[#allocation2 + $0x182] sm:$0xff] }
 0x206   :  { %v1732_v41 = vadd.f32 %v1668_v44, %v1536_v7  ;;  %3948 = vmatprep.mubr.f32.mxu1 %v2909_v27  ;;  %v2782_v39 = vadd.f32 %v5212_v15, %v2711_v60  ;;  %v2320_v38 = vadd.f32 %v2256_v17, %v2123_v2  ;;  %v1473_v18 = vmul.f32 %v5370_v50, %v4588_v43  ;;  %v6566_v53 = vld [vmem:[#allocation22_spill] sm:$0xff] }
 0x207   :  { %v1669_v56 = vmul.f32 %v5418_v19, %v4599_v3  ;;  %v900_v44 = vmax.f32 %v770_v62, 0.0  ;;  %v1341_v42 = vadd.f32 %v1277_v33, %v1145_v22  ;;  %v1865_v37 = vmul.f32 %v5420_v49, %v4597_v0 }
 0x208   :  { %v1928_v26 = vadd.f32 %v1864_v52, %v1732_v41  ;;  %v2846_v9 = vmax.f32 %v2782_v39, 0.0  ;;  %v2516_v47 = vadd.f32 %v2452_v21, %v2320_v38  ;;  %v2061_v20 = vmul.f32 %v5428_v40, %v4601_v4  ;;  %v2191_v39 = vld [vmem:[#allocation2 + $0x188] sm:$0xff] }
 0x209   :  { %v2258_v17 = vmul.f32 %v4609_v13, %v5471_v45  ;;  %v964_v7 = vmin.f32 %v900_v44, 6.0  ;;  %v1537_v27 = vadd.f32 %v1473_v18, %v1341_v42  ;;  %v2454_v60 = vmul.f32 %v4603_v5, %v2386_v34 }
 0x20a   :  { %v2124_v50 = vadd.f32 %v2060_v61, %v1928_v26  ;;  %v2910_v52 = vmin.f32 %v2846_v9, 6.0  ;;  %v2712_v2 = vadd.f32 %v2648_v12, %v2516_v47  ;;  %v2650_v41 = vmul.f32 %v4606_v10, %v2582_v58  ;;  %v2583_v9 = vld [vmem:[#allocation2 + $0x18a] sm:$0xff] }
 0x20b   :  { %v765_v62 = vadd.f32 %v5082_v59, %v6566_v53  ;;  %1029 = vst [vmem:[#allocation2 + $0x279] sm:$0xff] %v964_v7  ;;  %v1733_v21 = vadd.f32 %v1669_v56, %v1537_v27  ;;  %v1146_v33 = vmul.f32 %v5388_v14, %v4579_v31  ;;  %v1278_v61 = vmul.f32 %v5395_v55, %v4583_v36 }
 0x20c   :  { %v2321_v22 = vadd.f32 %v2257_v48, %v2124_v50  ;;  %3949 = vmatmul.mubr.f32.gmra.mrb[18].mxu1 %v2910_v52  ;;  %v2783_v38 = vadd.f32 %v5212_v15, %v2712_v2  ;;  %v1474_v12 = vmul.f32 %v5399_v28, %v4588_v43  ;;  %v1670_v26 = vmul.f32 %v5447_v32, %v4599_v3  ;;  %v2387_v48 = vld [vmem:[#allocation2 + $0x189] sm:$0xff] }
 0x20d   :  { %v899_v18 = vmax.f32 %v765_v62, 0.0  ;;  %v1929_v56 = vadd.f32 %v1865_v37, %v1733_v21  ;;  %v1342_v42 = vadd.f32 %v1278_v61, %v1146_v33  ;;  %v1866_v14 = vmul.f32 %v5449_v51, %v4597_v0  ;;  %v2388_v61 = vld [vmem:[#allocation2 + $0x199] sm:$0xff] }
 0x20e   :  { %v2517_v44 = vadd.f32 %v2453_v54, %v2321_v22  ;;  %v2847_v55 = vmax.f32 %v2783_v38, 0.0  ;;  %v2062_v50 = vmul.f32 %v5455_v25, %v4601_v4  ;;  %v2259_v7 = vmul.f32 %v4609_v13, %v2191_v39 }
 0x20f   :  { %v963_v47 = vmin.f32 %v899_v18, 6.0  ;;  %v2125_v28 = vadd.f32 %v2061_v20, %v1929_v56  ;;  %v1538_v52 = vadd.f32 %v1474_v12, %v1342_v42  ;;  %v2455_v2 = vmul.f32 %v4603_v5, %v2387_v48  ;;  %v2192_v20 = vld [vmem:[#allocation2 + $0x198] sm:$0xff] }
 0x210   :  { %v2713_v27 = vadd.f32 %v2649_v35, %v2517_v44  ;;  %v2911_v53 = vmin.f32 %v2847_v55, 6.0  ;;  %v2651_v54 = vmul.f32 %v4606_v10, %v2583_v9  ;;  %v780_v37 = vadd.f32 %v5082_v59, %v5070_v24 }
 0x211   :  { %1028 = vst [vmem:[#allocation2 + $0x271] sm:$0xff] %v963_v47  ;;  %v1147_v62 = vmul.f32 %v5418_v19, %v4579_v31  ;;  %v2322_v21 = vadd.f32 %v2258_v17, %v2125_v28  ;;  %v1734_v33 = vadd.f32 %v1670_v26, %v1538_v52  ;;  %v1279_v35 = vmul.f32 %v5420_v49, %v4583_v36  ;;  %v2584_v26 = vld [vmem:[#allocation2 + $0x19a] sm:$0xff] }
 0x212   :  { %v2784_v22 = vadd.f32 %v5212_v15, %v2713_v27  ;;  %3951 = vmatprep.mubr.f32.mxu1 %v2911_v53  ;;  %v902_v38 = vmax.f32 %v780_v37, 0.0  ;;  %v1475_v18 = vmul.f32 %v5428_v40, %v4588_v43  ;;  %v1671_v24 = vmul.f32 %v5471_v45, %v4599_v3  ;;  %v2389_v37 = vld [vmem:[#allocation2 + $0x1a1] sm:$0xff] }
 0x213   :  { %v1867_v12 = vmul.f32 %v2386_v34, %v4597_v0  ;;  %v2518_v44 = vadd.f32 %v2454_v60, %v2322_v21  ;;  %v1930_v56 = vadd.f32 %v1866_v14, %v1734_v33  ;;  %v1343_v17 = vadd.f32 %v1279_v35, %v1147_v62  ;;  %v2585_v33 = vld [vmem:[#allocation2 + $0x1a2] sm:$0xff] }
 0x214   :  { %v2848_v19 = vmax.f32 %v2784_v22, 0.0  ;;  %v966_v42 = vmin.f32 %v902_v38, 6.0  ;;  %v2063_v49 = vmul.f32 %v2582_v58, %v4601_v4  ;;  %v2260_v55 = vmul.f32 %v4609_v13, %v2192_v20  ;;  %v1213_v38 = vld [vmem:[#allocation2 + $0x1b1] sm:$0xff] }
 0x215   :  { %v2456_v47 = vmul.f32 %v4603_v5, %v2388_v61  ;;  %v2714_v28 = vadd.f32 %v2650_v41, %v2518_v44  ;;  %v2126_v40 = vadd.f32 %v2062_v50, %v1930_v56  ;;  %v1539_v52 = vadd.f32 %v1475_v18, %v1343_v17  ;;  %v1081_v61 = vld [vmem:[#allocation2 + $0x1b0] sm:$0xff]  ;;  %v5536_v56 = vld [vmem:[#allocation2 + $0x1c8] sm:$0xff] }
 0x216   :  { %v2912_v27 = vmin.f32 %v2848_v19, 6.0  ;;  %1031 = vst [vmem:[#allocation2 + $0x291] sm:$0xff] %v966_v42  ;;  %v5520_v45 = vmul.f32 %v4606_v10, %v2584_v26  ;;  %v775_v34 = vadd.f32 %v5082_v59, %v5074_v16  ;;  %v1148_v60 = vmul.f32 %v5447_v32, %v4579_v31  ;;  %v1409_v44 = vld [vmem:[#allocation2 + $0x1b2] sm:$0xff]  ;;  %v6567_v26 = vld [vmem:[#allocation23_spill] sm:$0xff] }
 0x217   :  { %v1280_v58 = vmul.f32 %v5449_v51, %v4583_v36  ;;  %v2785_v14 = vadd.f32 %v5212_v15, %v2714_v28  ;;  %v2323_v53 = vadd.f32 %v2259_v7, %v2126_v40  ;;  %v1735_v41 = vadd.f32 %v1671_v24, %v1539_v52  ;;  %v4071_v24 = vld [vmem:[#allocation2 + $0x8] sm:$0xff]  ;;  %v5547_v52 = vld [vmem:[#allocation2 + $0x1e0] sm:$0xff] }
 0x218   :  { %3952 = vmatmul.mubr.f32.gmra.mrb[20].mxu1 %v2912_v27  ;;  %v1476_v50 = vmul.f32 %v5455_v25, %v4588_v43  ;;  %v901_v62 = vmax.f32 %v775_v34, 0.0  ;;  %v1672_v21 = vmul.f32 %v2191_v39, %v4599_v3  ;;  %v1868_v16 = vmul.f32 %v2387_v48, %v4597_v0  ;;  %v5545_v40 = vld [vmem:[#allocation2 + $0x1ca] sm:$0xff] }
 0x219   :  { %v1344_v22 = vadd.f32 %v1280_v58, %v1148_v60  ;;  %v2849_v32 = vmax.f32 %v2785_v14, 0.0  ;;  %v2519_v35 = vadd.f32 %v2455_v2, %v2323_v53  ;;  %v1931_v20 = vadd.f32 %v1867_v12, %v1735_v41  ;;  %v5539_v12 = vld [vmem:[#allocation2 + $0x1c9] sm:$0xff]  ;;  %v5553_v58 = vld [vmem:[#allocation2 + $0x1e1] sm:$0xff] }
 0x21a   :  { %v2064_v51 = vmul.f32 %v2583_v9, %v4601_v4  ;;  %v965_v7 = vmin.f32 %v901_v62, 6.0  ;;  %v2261_v25 = vmul.f32 %v4071_v24, %v4609_v13  ;;  %v2457_v19 = vmul.f32 %v4603_v5, %v2389_v37 }
 0x21b   :  { %v1540_v18 = vadd.f32 %v1476_v50, %v1344_v22  ;;  %v2913_v39 = vmin.f32 %v2849_v32, 6.0  ;;  %v2715_v48 = vadd.f32 %v2651_v54, %v2519_v35  ;;  %v2127_v17 = vadd.f32 %v2063_v49, %v1931_v20  ;;  %v5557_v50 = vld [vmem:[#allocation2 + $0x1e2] sm:$0xff]  ;;  %v1410_v20 = vld [vmem:[#allocation2 + $0x1ba] sm:$0xff] }
 0x21c   :  { %v2653_v2 = vmul.f32 %v4606_v10, %v2585_v33  ;;  %1030 = vst [vmem:[#allocation2 + $0x289] sm:$0xff] %v965_v7  ;;  %v790_v42 = vadd.f32 %v5082_v59, %v6567_v26  ;;  %v1149_v27 = vmul.f32 %v4579_v31, %v1081_v61  ;;  %v1281_v28 = vmul.f32 %v4583_v36, %v1213_v38  ;;  %v5565_v61 = vld [vmem:[#allocation2 + $0x1d0] sm:$0xff] }
 0x21d   :  { %v1736_v9 = vadd.f32 %v1672_v21, %v1540_v18  ;;  %3954 = vmatprep.mubr.f32.mxu1 %v2913_v39  ;;  %v2786_v54 = vadd.f32 %v5212_v15, %v2715_v48  ;;  %v2324_v49 = vadd.f32 %v2260_v55, %v2127_v17  ;;  %v1477_v34 = vmul.f32 %v4588_v43, %v1409_v44  ;;  %v1214_v21 = vld [vmem:[#allocation2 + $0x1b9] sm:$0xff]  ;;  %v5570_v18 = vld [vmem:[#allocation8] ss:$0 sm:$0xff]  ;;  %v6568_v44 = vld [vmem:[#allocation24_spill] sm:$0xff] }
 0x21e   :  { %v1673_v60 = vmul.f32 %v4599_v3, %v5536_v56  ;;  %v904_v14 = vmax.f32 %v790_v42, 0.0  ;;  %v1345_v53 = vadd.f32 %v1281_v28, %v1149_v27  ;;  %v1869_v41 = vmul.f32 %v4597_v0, %v5539_v12  ;;  %v1998_v42 = vld [vmem:[#allocation2 + $0x1d2] sm:$0xff]  ;;  %v5576_v27 = vld [vmem:[#allocation2 + $0x1e8] sm:$0xff] }
 0x21f   :  { %v1932_v59 = vadd.f32 %v1868_v16, %v1736_v9  ;;  %v2850_v37 = vmax.f32 %v2786_v54, 0.0  ;;  %v2520_v62 = vadd.f32 %v2456_v47, %v2324_v49  ;;  %v2065_v55 = vmul.f32 %v4601_v4, %v5545_v40 }
 0x220   :  { %v2262_v22 = vmul.f32 %v4609_v13, %v5547_v52  ;;  %v968_v32 = vmin.f32 %v904_v14, 6.0  ;;  %v1541_v35 = vadd.f32 %v1477_v34, %v1345_v53  ;;  %v2458_v16 = vmul.f32 %v4603_v5, %v5553_v58  ;;  %v5582_v34 = vld [vmem:[#allocation2 + $0x1e9] sm:$0xff] }
 0x221   :  { %v2128_v33 = vadd.f32 %v2064_v51, %v1932_v59  ;;  %v2914_v38 = vmin.f32 %v2850_v37, 6.0  ;;  %v2716_v7 = vadd.f32 %v5520_v45, %v2520_v62  ;;  %v2654_v47 = vmul.f32 %v4606_v10, %v5557_v50  ;;  %v1802_v51 = vld [vmem:[#allocation2 + $0x1d1] sm:$0xff] }
 0x222   :  { %v785_v39 = vadd.f32 %v5570_v18, %v6568_v44  ;;  %1033 = vst [vmem:[#allocation2 + $0x2a9] sm:$0xff] %v968_v32  ;;  %v1737_v17 = vadd.f32 %v1673_v60, %v1541_v35  ;;  %v1150_v9 = vmul.f32 %v4071_v24, %v4579_v31  ;;  %v1282_v26 = vmul.f32 %v4583_v36, %v1214_v21  ;;  %v5585_v14 = vld [vmem:[#allocation2 + $0x1ea] sm:$0xff] }
 0x223   :  { %v2325_v48 = vadd.f32 %v2261_v25, %v2128_v33  ;;  %3955 = vmatmul.mubr.f32.gmra.mrb[22].mxu1 %v2914_v38  ;;  %v2787_v45 = vadd.f32 %v5212_v15, %v2716_v7  ;;  %v1478_v54 = vmul.f32 %v4588_v43, %v1410_v20  ;;  %v1674_v49 = vmul.f32 %v4599_v3, %v5565_v61 }
 0x224   :  { %v903_v28 = vmax.f32 %v785_v39, 0.0  ;;  %v1933_v60 = vadd.f32 %v1869_v41, %v1737_v17  ;;  %v1346_v59 = vadd.f32 %v1282_v26, %v1150_v9  ;;  %v1870_v24 = vmul.f32 %v4597_v0, %v1802_v51  ;;  %v5603_v17 = vld [vmem:[#allocation2 + $0x1f9] sm:$0xff] }
 0x225   :  { %v2521_v25 = vadd.f32 %v2457_v19, %v2325_v48  ;;  %v2851_v53 = vmax.f32 %v2787_v45, 0.0  ;;  %v2066_v62 = vmul.f32 %v4601_v4, %v1998_v42  ;;  %v2263_v21 = vmul.f32 %v4609_v13, %v5576_v27  ;;  %v5601_v48 = vld [vmem:[#allocation2 + $0x1f8] sm:$0xff] }
 0x226   :  { %v967_v37 = vmin.f32 %v903_v28, 6.0  ;;  %v2129_v32 = vadd.f32 %v2065_v55, %v1933_v60  ;;  %v1542_v35 = vadd.f32 %v1478_v54, %v1346_v59  ;;  %v2459_v20 = vmul.f32 %v4603_v5, %v5582_v34 }
 0x227   :  { %v2717_v33 = vadd.f32 %v2653_v2, %v2521_v25  ;;  %v2915_v19 = vmin.f32 %v2851_v53, 6.0  ;;  %v2655_v41 = vmul.f32 %v4606_v10, %v5585_v14  ;;  %v800_v38 = vadd.f32 %v5570_v18, %v5113_v30 }
 0x228   :  { %1032 = vst [vmem:[#allocation2 + $0x2a1] sm:$0xff] %v967_v37  ;;  %v1151_v7 = vmul.f32 %v5536_v56, %v4579_v31  ;;  %v2326_v39 = vadd.f32 %v2262_v22, %v2129_v32  ;;  %v1738_v2 = vadd.f32 %v1674_v49, %v1542_v35  ;;  %v1283_v55 = vmul.f32 %v5539_v12, %v4583_v36  ;;  %v5611_v12 = vld [vmem:[#allocation2 + $0x1fa] sm:$0xff] }
 0x229   :  { %v2788_v44 = vadd.f32 %v5212_v15, %v2717_v33  ;;  %3957 = vmatprep.mubr.f32.mxu1 %v2915_v19  ;;  %v906_v9 = vmax.f32 %v800_v38, 0.0  ;;  %v1479_v26 = vmul.f32 %v5545_v40, %v4588_v43  ;;  %v1675_v30 = vmul.f32 %v5547_v52, %v4599_v3 }
 0x22a   :  { %v1871_v56 = vmul.f32 %v5553_v58, %v4597_v0  ;;  %v2522_v45 = vadd.f32 %v2458_v16, %v2326_v39  ;;  %v1934_v28 = vadd.f32 %v1870_v24, %v1738_v2  ;;  %v1347_v54 = vadd.f32 %v1283_v55, %v1151_v7 }
 0x22b   :  { %v2852_v22 = vmax.f32 %v2788_v44, 0.0  ;;  %v970_v49 = vmin.f32 %v906_v9, 6.0  ;;  %v2067_v25 = vmul.f32 %v5557_v50, %v4601_v4  ;;  %v2264_v60 = vmul.f32 %v4609_v13, %v5601_v48  ;;  %v5630_v44 = vld [vmem:[#allocation2 + $0x201] sm:$0xff] }
 0x22c   :  { %v2460_v40 = vmul.f32 %v4603_v5, %v5603_v17  ;;  %v2718_v53 = vadd.f32 %v2654_v47, %v2522_v45  ;;  %v2130_v37 = vadd.f32 %v2066_v62, %v1934_v28  ;;  %v1543_v33 = vadd.f32 %v1479_v26, %v1347_v54  ;;  %v5628_v62 = vld [vmem:[#allocation2 + $0x200] sm:$0xff] }
 0x22d   :  { %v2916_v59 = vmin.f32 %v2852_v22, 6.0  ;;  %1035 = vst [vmem:[#allocation2 + $0x2c1] sm:$0xff] %v970_v49  ;;  %v2656_v16 = vmul.f32 %v4606_v10, %v5611_v12  ;;  %v795_v24 = vadd.f32 %v5570_v18, %v5125_v6  ;;  %v1152_v32 = vmul.f32 %v5565_v61, %v4579_v31 }
 0x22e   :  { %v1284_v35 = vmul.f32 %v1802_v51, %v4583_v36  ;;  %v2789_v19 = vadd.f32 %v5212_v15, %v2718_v53  ;;  %v2327_v38 = vadd.f32 %v2263_v21, %v2130_v37  ;;  %v1739_v7 = vadd.f32 %v1675_v30, %v1543_v33  ;;  %v5636_v51 = vld [vmem:[#allocation2 + $0x202] sm:$0xff]  ;;  %v5652_v33 = vld [vmem:[#allocation2 + $0x210] sm:$0xff] }
 0x22f   :  { %3958 = vmatmul.mubr.f32.gmra.mrb[24].mxu1 %v2916_v59  ;;  %v1480_v47 = vmul.f32 %v1998_v42, %v4588_v43  ;;  %v905_v39 = vmax.f32 %v795_v24, 0.0  ;;  %v1676_v6 = vmul.f32 %v5576_v27, %v4599_v3  ;;  %v1872_v61 = vmul.f32 %v5582_v34, %v4597_v0 }
 0x230   :  { %v1348_v2 = vadd.f32 %v1284_v35, %v1152_v32  ;;  %v2853_v55 = vmax.f32 %v2789_v19, 0.0  ;;  %v2523_v9 = vadd.f32 %v2459_v20, %v2327_v38  ;;  %v1935_v21 = vadd.f32 %v1871_v56, %v1739_v7  ;;  %v5659_v35 = vld [vmem:[#allocation2 + $0x211] sm:$0xff] }
 0x231   :  { %v2068_v42 = vmul.f32 %v5585_v14, %v4601_v4  ;;  %v969_v26 = vmin.f32 %v905_v39, 6.0  ;;  %v2265_v22 = vmul.f32 %v4609_v13, %v5628_v62  ;;  %v2461_v45 = vmul.f32 %v4603_v5, %v5630_v44  ;;  %v5663_v38 = vld [vmem:[#allocation2 + $0x212] sm:$0xff] }
 0x232   :  { %v1544_v30 = vadd.f32 %v1480_v47, %v1348_v2  ;;  %v2917_v28 = vmin.f32 %v2853_v55, 6.0  ;;  %v2719_v54 = vadd.f32 %v2655_v41, %v2523_v9  ;;  %v2131_v49 = vadd.f32 %v2067_v25, %v1935_v21  ;;  %v6569_v21 = vld [vmem:[#allocation25_spill] sm:$0xff] }
 0x233   :  { %v2657_v59 = vmul.f32 %v4606_v10, %v5636_v51  ;;  %1034 = vst [vmem:[#allocation2 + $0x2b9] sm:$0xff] %v969_v26  ;;  %v810_v56 = vadd.f32 %v5570_v18, %v5148_v46  ;;  %v1153_v53 = vmul.f32 %v5547_v52, %v4579_v31  ;;  %v1285_v37 = vmul.f32 %v5553_v58, %v4583_v36 }
 0x234   :  { %v1740_v20 = vadd.f32 %v1676_v6, %v1544_v30  ;;  %3960 = vmatprep.mubr.f32.mxu1 %v2917_v28  ;;  %v2790_v41 = vadd.f32 %v5212_v15, %v2719_v54  ;;  %v2328_v25 = vadd.f32 %v2264_v60, %v2131_v49  ;;  %v1481_v24 = vmul.f32 %v5557_v50, %v4588_v43  ;;  %v5679_v54 = vld [vmem:[#allocation2 + $0x218] sm:$0xff]  ;;  %v5681_v49 = vld [vmem:[#allocation11] ss:$0 sm:$0xff] }
 0x235   :  { %v1677_v32 = vmul.f32 %v5601_v48, %v4599_v3  ;;  %v908_v19 = vmax.f32 %v810_v56, 0.0  ;;  %v1349_v52 = vadd.f32 %v1285_v37, %v1153_v53  ;;  %v1873_v58 = vmul.f32 %v5603_v17, %v4597_v0  ;;  %v5688_v53 = vld [vmem:[#allocation2 + $0x219] sm:$0xff] }
 0x236   :  { %v1936_v46 = vadd.f32 %v1872_v61, %v1740_v20  ;;  %v2854_v7 = vmax.f32 %v2790_v41, 0.0  ;;  %v2524_v47 = vadd.f32 %v2460_v40, %v2328_v25  ;;  %v2069_v15 = vmul.f32 %v5611_v12, %v4601_v4  ;;  %v5692_v25 = vld [vmem:[#allocation2 + $0x21a] sm:$0xff] }
 0x237   :  { %v2266_v50 = vmul.f32 %v4609_v13, %v5652_v33  ;;  %v972_v39 = vmin.f32 %v908_v19, 6.0  ;;  %v1545_v2 = vadd.f32 %v1481_v24, %v1349_v52  ;;  %v2462_v6 = vmul.f32 %v4603_v5, %v5659_v35 }
 0x238   :  { %v2132_v60 = vadd.f32 %v2068_v42, %v1936_v46  ;;  %v2918_v61 = vmin.f32 %v2854_v7, 6.0  ;;  %v2720_v55 = vadd.f32 %v2656_v16, %v2524_v47  ;;  %v2658_v9 = vmul.f32 %v4606_v10, %v5663_v38 }
 0x239   :  { %v805_v40 = vadd.f32 %v5570_v18, %v6569_v21  ;;  %1037 = vst [vmem:[#allocation2 + $0x2d9] sm:$0xff] %v972_v39  ;;  %v1741_v30 = vadd.f32 %v1677_v32, %v1545_v2  ;;  %v1154_v28 = vmul.f32 %v5576_v27, %v4579_v31  ;;  %v1286_v42 = vmul.f32 %v5582_v34, %v4583_v36  ;;  %v5714_v21 = vld [vmem:[#allocation2 + $0x229] sm:$0xff] }
 0x23a   :  { %v2329_v26 = vadd.f32 %v2265_v22, %v2132_v60  ;;  %3961 = vmatmul.mubr.f32.gmra.mrb[26].mxu1 %v2918_v61  ;;  %v2791_v16 = vadd.f32 %v5681_v49, %v2720_v55  ;;  %v1482_v56 = vmul.f32 %v5585_v14, %v4588_v43  ;;  %v1678_v22 = vmul.f32 %v5628_v62, %v4599_v3  ;;  %v5712_v55 = vld [vmem:[#allocation2 + $0x228] sm:$0xff] }
 0x23b   :  { %v907_v20 = vmax.f32 %v805_v40, 0.0  ;;  %v1937_v37 = vadd.f32 %v1873_v58, %v1741_v30  ;;  %v1350_v41 = vadd.f32 %v1286_v42, %v1154_v28  ;;  %v1874_v34 = vmul.f32 %v5630_v44, %v4597_v0 }
 0x23c   :  { %v2525_v27 = vadd.f32 %v2461_v45, %v2329_v26  ;;  %v2855_v24 = vmax.f32 %v2791_v16, 0.0  ;;  %v2070_v46 = vmul.f32 %v5636_v51, %v4601_v4  ;;  %v2267_v14 = vmul.f32 %v4609_v13, %v5679_v54 }
 0x23d   :  { %v5694_v32 = vmin.f32 %v907_v20, 6.0  ;;  %v2133_v52 = vadd.f32 %v2069_v15, %v1937_v37  ;;  %v1546_v7 = vadd.f32 %v1482_v56, %v1350_v41  ;;  %v2463_v45 = vmul.f32 %v4603_v5, %v5688_v53 }
 0x23e   :  { %v2721_v19 = vadd.f32 %v2657_v59, %v2525_v27  ;;  %v2919_v58 = vmin.f32 %v2855_v24, 6.0  ;;  %v2659_v47 = vmul.f32 %v4606_v10, %v5692_v25  ;;  %v820_v60 = vadd.f32 %v5570_v18, %v5210_v57 }
 0x23f   :  { %1036 = vst [vmem:[#allocation2 + $0x2d1] sm:$0xff] %v5694_v32  ;;  %v1155_v39 = vmul.f32 %v5601_v48, %v4579_v31  ;;  %v2330_v59 = vadd.f32 %v2266_v50, %v2133_v52  ;;  %v1742_v15 = vadd.f32 %v1678_v22, %v1546_v7  ;;  %v1287_v61 = vmul.f32 %v5603_v17, %v4583_v36  ;;  %v5722_v17 = vld [vmem:[#allocation2 + $0x22a] sm:$0xff] }
 0x240   :  { %v2792_v2 = vadd.f32 %v5681_v49, %v2721_v19  ;;  %3963 = vmatprep.mubr.f32.mxu1 %v2919_v58  ;;  %v910_v40 = vmax.f32 %v820_v60, 0.0  ;;  %v1483_v26 = vmul.f32 %v5611_v12, %v4588_v43  ;;  %v1679_v57 = vmul.f32 %v5652_v33, %v4599_v3  ;;  %v5741_v58 = vld [vmem:[#allocation2 + $0x230] sm:$0xff] }
 0x241   :  { %v1875_v48 = vmul.f32 %v5659_v35, %v4597_v0  ;;  %v2526_v30 = vadd.f32 %v2462_v6, %v2330_v59  ;;  %v1938_v28 = vadd.f32 %v1874_v34, %v1742_v15  ;;  %v1351_v42 = vadd.f32 %v1287_v61, %v1155_v39  ;;  %v5743_v60 = vld [vmem:[#allocation2 + $0x231] sm:$0xff] }
 0x242   :  { %v2856_v50 = vmax.f32 %v2792_v2, 0.0  ;;  %v974_v16 = vmin.f32 %v910_v40, 6.0  ;;  %v2071_v20 = vmul.f32 %v5663_v38, %v4601_v4  ;;  %v2268_v56 = vmul.f32 %v4609_v13, %v5712_v55  ;;  %v5749_v2 = vld [vmem:[#allocation2 + $0x232] sm:$0xff] }
 0x243   :  { %v2464_v12 = vmul.f32 %v4603_v5, %v5714_v21  ;;  %v2722_v27 = vadd.f32 %v2658_v9, %v2526_v30  ;;  %v2134_v37 = vadd.f32 %v2070_v46, %v1938_v28  ;;  %v1547_v41 = vadd.f32 %v1483_v26, %v1351_v42 }
 0x244   :  { %v2920_v22 = vmin.f32 %v2856_v50, 6.0  ;;  %1039 = vst [vmem:[#allocation2 + $0x2f1] sm:$0xff] %v974_v16  ;;  %v2660_v6 = vmul.f32 %v4606_v10, %v5722_v17  ;;  %v815_v34 = vadd.f32 %v5570_v18, %v5243_v29  ;;  %v1156_v24 = vmul.f32 %v5628_v62, %v4579_v31 }
 0x245   :  { %v1288_v19 = vmul.f32 %v5630_v44, %v4583_v36  ;;  %v2793_v52 = vadd.f32 %v5681_v49, %v2722_v27  ;;  %v2331_v7 = vadd.f32 %v2267_v14, %v2134_v37  ;;  %v1743_v9 = vadd.f32 %v1679_v57, %v1547_v41  ;;  %v5768_v27 = vld [vmem:[#allocation2 + $0x240] sm:$0xff] }
 0x246   :  { %3964 = vmatmul.mubr.f32.gmra.mrb[28].mxu1 %v2920_v22  ;;  %v1484_v46 = vmul.f32 %v5636_v51, %v4588_v43  ;;  %v909_v39 = vmax.f32 %v815_v34, 0.0  ;;  %v1680_v62 = vmul.f32 %v5679_v54, %v4599_v3  ;;  %v1876_v44 = vmul.f32 %v5688_v53, %v4597_v0  ;;  %v5775_v34 = vld [vmem:[#allocation2 + $0x241] sm:$0xff] }
 0x247   :  { %v1352_v29 = vadd.f32 %v1288_v19, %v1156_v24  ;;  %v2857_v59 = vmax.f32 %v2793_v52, 0.0  ;;  %v2527_v14 = vadd.f32 %v2463_v45, %v2331_v7  ;;  %v1939_v15 = vadd.f32 %v1875_v48, %v1743_v9  ;;  %v5779_v19 = vld [vmem:[#allocation2 + $0x242] sm:$0xff] }
 0x248   :  { %v2072_v51 = vmul.f32 %v5692_v25, %v4601_v4  ;;  %v5753_v61 = vmin.f32 %v909_v39, 6.0  ;;  %v2269_v26 = vmul.f32 %v4609_v13, %v5741_v58  ;;  %v2465_v57 = vmul.f32 %v4603_v5, %v5743_v60 }
 0x249   :  { %v1548_v40 = vadd.f32 %v1484_v46, %v1352_v29  ;;  %v2921_v50 = vmin.f32 %v2857_v59, 6.0  ;;  %v2723_v30 = vadd.f32 %v2659_v47, %v2527_v14  ;;  %v2135_v28 = vadd.f32 %v2071_v20, %v1939_v15  ;;  %v6570_v14 = vld [vmem:[#allocation26_spill] sm:$0xff] }
 0x24a   :  { %v2661_v42 = vmul.f32 %v4606_v10, %v5749_v2  ;;  %1038 = vst [vmem:[#allocation2 + $0x2e9] sm:$0xff] %v5753_v61  ;;  %v830_v48 = vadd.f32 %v5570_v18, %v5266_v23  ;;  %v1157_v16 = vmul.f32 %v5652_v33, %v4579_v31  ;;  %v1289_v22 = vmul.f32 %v5659_v35, %v4583_v36 }
 0x24b   :  { %v1744_v45 = vadd.f32 %v1680_v62, %v1548_v40  ;;  %3966 = vmatprep.mubr.f32.mxu1 %v2921_v50  ;;  %v2794_v47 = vadd.f32 %v5681_v49, %v2723_v30  ;;  %v2332_v20 = vadd.f32 %v2268_v56, %v2135_v28  ;;  %v1485_v37 = vmul.f32 %v5663_v38, %v4588_v43  ;;  %v5795_v30 = vld [vmem:[#allocation2 + $0x248] sm:$0xff] }
 0x24c   :  { %v1681_v41 = vmul.f32 %v5712_v55, %v4599_v3  ;;  %v912_v24 = vmax.f32 %v830_v48, 0.0  ;;  %v1353_v33 = vadd.f32 %v1289_v22, %v1157_v16  ;;  %v1877_v35 = vmul.f32 %v5714_v21, %v4597_v0  ;;  %v5802_v48 = vld [vmem:[#allocation2 + $0x249] sm:$0xff] }
 0x24d   :  { %v1940_v23 = vadd.f32 %v1876_v44, %v1744_v45  ;;  %v2858_v52 = vmax.f32 %v2794_v47, 0.0  ;;  %v2528_v7 = vadd.f32 %v2464_v12, %v2332_v20  ;;  %v2073_v56 = vmul.f32 %v5722_v17, %v4601_v4  ;;  %v5806_v47 = vld [vmem:[#allocation2 + $0x24a] sm:$0xff] }
 0x24e   :  { %v2270_v38 = vmul.f32 %v4609_v13, %v5768_v27  ;;  %v976_v46 = vmin.f32 %v912_v24, 6.0  ;;  %v1549_v39 = vadd.f32 %v1485_v37, %v1353_v33  ;;  %v2466_v29 = vmul.f32 %v4603_v5, %v5775_v34 }
 0x24f   :  { %v2136_v9 = vadd.f32 %v2072_v51, %v1940_v23  ;;  %v2922_v62 = vmin.f32 %v2858_v52, 6.0  ;;  %v2724_v44 = vadd.f32 %v2660_v6, %v2528_v7  ;;  %v2662_v59 = vmul.f32 %v4606_v10, %v5779_v19 }
 0x250   :  { %v825_v12 = vadd.f32 %v5570_v18, %v6570_v14  ;;  %1041 = vst [vmem:[#allocation2 + $0x309] sm:$0xff] %v976_v46  ;;  %v1745_v40 = vadd.f32 %v1681_v41, %v1549_v39  ;;  %v1158_v50 = vmul.f32 %v5679_v54, %v4579_v31  ;;  %v1290_v51 = vmul.f32 %v5688_v53, %v4583_v36 }
 0x251   :  { %v2333_v15 = vadd.f32 %v2269_v26, %v2136_v9  ;;  %3967 = vmatmul.mubr.f32.gmra.mrb[30].mxu1 %v2922_v62  ;;  %v2795_v6 = vadd.f32 %v5681_v49, %v2724_v44  ;;  %v1486_v45 = vmul.f32 %v5692_v25, %v4588_v43  ;;  %v1682_v26 = vmul.f32 %v5741_v58, %v4599_v3  ;;  %v5826_v62 = vld [vmem:[#allocation2 + $0x258] sm:$0xff] }
 0x252   :  { %v911_v28 = vmax.f32 %v825_v12, 0.0  ;;  %v1941_v22 = vadd.f32 %v1877_v35, %v1745_v40  ;;  %v1354_v54 = vadd.f32 %v1290_v51, %v1158_v50  ;;  %v1878_v53 = vmul.f32 %v5743_v60, %v4597_v0  ;;  %v5828_v44 = vld [vmem:[#allocation2 + $0x259] sm:$0xff] }
 0x253   :  { %v2529_v16 = vadd.f32 %v2465_v57, %v2333_v15  ;;  %v2859_v20 = vmax.f32 %v2795_v6, 0.0  ;;  %v2074_v41 = vmul.f32 %v5749_v2, %v4601_v4  ;;  %v2271_v25 = vmul.f32 %v4609_v13, %v5795_v30 }
 0x254   :  { %v5808_v37 = vmin.f32 %v911_v28, 6.0  ;;  %v2137_v24 = vadd.f32 %v2073_v56, %v1941_v22  ;;  %v1550_v33 = vadd.f32 %v1486_v45, %v1354_v54  ;;  %v2467_v57 = vmul.f32 %v4603_v5, %v5802_v48  ;;  %v5844_v45 = vpop.f32.mrb[64].mxu0 }
 0x255   :  { %v2725_v23 = vadd.f32 %v2661_v42, %v2529_v16  ;;  %v2923_v35 = vmin.f32 %v2859_v20, 6.0  ;;  %v2663_v52 = vmul.f32 %v4606_v10, %v5806_v47  ;;  %v840_v7 = vadd.f32 %v5570_v18, %v5328_v63  ;;  %v5846_v54 = vpop.f32.mrb[65].mxu0 }
 0x256   :  { %1040 = vst [vmem:[#allocation2 + $0x301] sm:$0xff] %v5808_v37  ;;  %v1159_v9 = vmul.f32 %v5712_v55, %v4579_v31  ;;  %v2334_v42 = vadd.f32 %v2270_v38, %v2137_v24  ;;  %v1746_v56 = vadd.f32 %v1682_v26, %v1550_v33  ;;  %v1291_v39 = vmul.f32 %v5714_v21, %v4583_v36  ;;  %v5836_v21 = vld [vmem:[#allocation2 + $0x25a] sm:$0xff] }
 0x257   :  { %v2796_v46 = vadd.f32 %v5681_v49, %v2725_v23  ;;  %3969 = vmatprep.mubr.f32.mxu1 %v2923_v35  ;;  %v914_v14 = vmax.f32 %v840_v7, 0.0  ;;  %v1487_v12 = vmul.f32 %v5722_v17, %v4588_v43  ;;  %v1683_v63 = vmul.f32 %v5768_v27, %v4599_v3 }
 0x258   :  { %v1879_v55 = vmul.f32 %v5775_v34, %v4597_v0  ;;  %v2530_v15 = vadd.f32 %v2466_v29, %v2334_v42  ;;  %v1942_v40 = vadd.f32 %v1878_v53, %v1746_v56  ;;  %v1355_v50 = vadd.f32 %v1291_v39, %v1159_v9  ;;  %v5861_v9 = vld [vmem:[#allocation2 + $0x260] sm:$0xff] }
 0x259   :  { %v2860_v38 = vmax.f32 %v2796_v46, 0.0  ;;  %v978_v51 = vmin.f32 %v914_v14, 6.0  ;;  %v2075_v6 = vmul.f32 %v5779_v19, %v4601_v4  ;;  %v2272_v28 = vmul.f32 %v4609_v13, %v5826_v62  ;;  %v5863_v46 = vld [vmem:[#allocation2 + $0x261] sm:$0xff] }
 0x25a   :  { %v2468_v17 = vmul.f32 %v4603_v5, %v5828_v44  ;;  %v2726_v16 = vadd.f32 %v2662_v59, %v2530_v15  ;;  %v2138_v22 = vadd.f32 %v2074_v41, %v1942_v40  ;;  %v1551_v29 = vadd.f32 %v1487_v12, %v1355_v50  ;;  %v5871_v39 = vld [vmem:[#allocation2 + $0x262] sm:$0xff] }
 0x25b   :  { %v2924_v26 = vmin.f32 %v2860_v38, 6.0  ;;  %1043 = vst [vmem:[#allocation2 + $0x321] sm:$0xff] %v978_v51  ;;  %v2664_v53 = vmul.f32 %v4606_v10, %v5836_v21  ;;  %v835_v20 = vadd.f32 %v5570_v18, %v5359_v1  ;;  %v1160_v23 = vmul.f32 %v5741_v58, %v4579_v31  ;;  %v5856_v33 = vpop.f32.mrb[66].mxu0 }
 0x25c   :  { %v1292_v24 = vmul.f32 %v5743_v60, %v4583_v36  ;;  %v2797_v59 = vadd.f32 %v5681_v49, %v2726_v16  ;;  %v2335_v41 = vadd.f32 %v2271_v25, %v2138_v22  ;;  %v1747_v35 = vadd.f32 %v1683_v63, %v1551_v29  ;;  %v5865_v1 = vpop.f32.mrb[67].mxu0 }
 0x25d   :  { %3970 = vmatmul.mubr.f32.gmra.mrb[32].mxu1 %v2924_v26  ;;  %v1488_v7 = vmul.f32 %v5749_v2, %v4588_v43  ;;  %v913_v58 = vmax.f32 %v835_v20, 0.0  ;;  %v1684_v60 = vmul.f32 %v5795_v30, %v4599_v3  ;;  %v1880_v56 = vmul.f32 %v5802_v48, %v4597_v0  ;;  %v5890_v20 = vld [vmem:[#allocation2 + $0x270] sm:$0xff] }
 0x25e   :  { %v1356_v42 = vadd.f32 %v1292_v24, %v1160_v23  ;;  %v2861_v25 = vmax.f32 %v2797_v59, 0.0  ;;  %v2531_v14 = vadd.f32 %v2467_v57, %v2335_v41  ;;  %v1943_v12 = vadd.f32 %v1879_v55, %v1747_v35  ;;  %v5897_v59 = vld [vmem:[#allocation2 + $0x271] sm:$0xff] }
 0x25f   :  { %v2076_v2 = vmul.f32 %v5806_v47, %v4601_v4  ;;  %v5875_v63 = vmin.f32 %v913_v58, 6.0  ;;  %v2273_v15 = vmul.f32 %v4609_v13, %v5861_v9  ;;  %v2469_v40 = vmul.f32 %v4603_v5, %v5863_v46  ;;  %v5901_v35 = vld [vmem:[#allocation2 + $0x272] sm:$0xff] }
 0x260   :  { %v1552_v38 = vadd.f32 %v1488_v7, %v1356_v42  ;;  %v2925_v50 = vmin.f32 %v2861_v25, 6.0  ;;  %v2727_v51 = vadd.f32 %v2663_v52, %v2531_v14  ;;  %v2139_v26 = vadd.f32 %v2075_v6, %v1943_v12 }
 0x261   :  { %v2665_v16 = vmul.f32 %v4606_v10, %v5871_v39  ;;  %1042 = vst [vmem:[#allocation2 + $0x319] sm:$0xff] %v5875_v63  ;;  %v850_v55 = vadd.f32 %v5570_v18, %v5382_v11  ;;  %v1161_v22 = vmul.f32 %v5768_v27, %v4579_v31  ;;  %v1293_v29 = vmul.f32 %v5775_v34, %v4583_v36 }
 0x262   :  { %v1748_v57 = vadd.f32 %v1684_v60, %v1552_v38  ;;  %3972 = vmatprep.mubr.f32.mxu1 %v2925_v50  ;;  %v2798_v52 = vadd.f32 %v5681_v49, %v2727_v51  ;;  %v2336_v6 = vadd.f32 %v2272_v28, %v2139_v26  ;;  %v1489_v23 = vmul.f32 %v5779_v19, %v4588_v43 }
 0x263   :  { %v1685_v24 = vmul.f32 %v5826_v62, %v4599_v3  ;;  %v916_v41 = vmax.f32 %v850_v55, 0.0  ;;  %v1357_v27 = vadd.f32 %v1293_v29, %v1161_v22  ;;  %v1881_v34 = vmul.f32 %v5828_v44, %v4597_v0 }
 0x264   :  { %v1944_v11 = vadd.f32 %v1880_v56, %v1748_v57  ;;  %v2862_v7 = vmax.f32 %v2798_v52, 0.0  ;;  %v2532_v58 = vadd.f32 %v2468_v17, %v2336_v6  ;;  %v2077_v28 = vmul.f32 %v5836_v21, %v4601_v4  ;;  %v5917_v57 = vld [vmem:[#allocation2 + $0x278] sm:$0xff] }
 0x265   :  { %v2274_v19 = vmul.f32 %v4609_v13, %v5890_v20  ;;  %v980_v60 = vmin.f32 %v916_v41, 6.0  ;;  %v1553_v25 = vadd.f32 %v1489_v23, %v1357_v27  ;;  %v2470_v56 = vmul.f32 %v4603_v5, %v5897_v59  ;;  %v5928_v52 = vld [vmem:[#allocation2 + $0x27a] sm:$0xff] }
 0x266   :  { %v2140_v42 = vadd.f32 %v2076_v2, %v1944_v11  ;;  %v2926_v14 = vmin.f32 %v2862_v7, 6.0  ;;  %v2728_v12 = vadd.f32 %v2664_v53, %v2532_v58  ;;  %v2666_v38 = vmul.f32 %v4606_v10, %v5901_v35 }
 0x267   :  { %v845_v17 = vadd.f32 %v5570_v18, %v5413_v8  ;;  %1045 = vst [vmem:[#allocation2 + $0x339] sm:$0xff] %v980_v60  ;;  %v1749_v51 = vadd.f32 %v1685_v24, %v1553_v25  ;;  %v1162_v26 = vmul.f32 %v5795_v30, %v4579_v31  ;;  %v1294_v2 = vmul.f32 %v5802_v48, %v4583_v36  ;;  %v5924_v18 = vld [vmem:[#allocation2 + $0x279] sm:$0xff]  ;;  %v5945_v60 = vld [vmem:[#allocation2 + $0x288] sm:$0xff] }
 0x268   :  { %v2337_v50 = vadd.f32 %v2273_v15, %v2140_v42  ;;  %3973 = vmatmul.mubr.f32.gmra.mrb[34].mxu1 %v2926_v14  ;;  %v2799_v53 = vadd.f32 %v5681_v49, %v2728_v12  ;;  %v1490_v22 = vmul.f32 %v5806_v47, %v4588_v43  ;;  %v1686_v8 = vmul.f32 %v5861_v9, %v4599_v3 }
 0x269   :  { %v915_v55 = vmax.f32 %v845_v17, 0.0  ;;  %v1945_v29 = vadd.f32 %v1881_v34, %v1749_v51  ;;  %v1358_v30 = vadd.f32 %v1294_v2, %v1162_v26  ;;  %v1882_v48 = vmul.f32 %v5863_v46, %v4597_v0  ;;  %v5952_v17 = vld [vmem:[#allocation2 + $0x289] sm:$0xff] }
 0x26a   :  { %v2533_v15 = vadd.f32 %v2469_v40, %v2337_v50  ;;  %v2863_v6 = vmax.f32 %v2799_v53, 0.0  ;;  %v2078_v24 = vmul.f32 %v5871_v39, %v4601_v4  ;;  %v2275_v47 = vmul.f32 %v4609_v13, %v5917_v57  ;;  %v5954_v50 = vld [vmem:[#allocation2 + $0x28a] sm:$0xff] }
 0x26b   :  { %v5930_v23 = vmin.f32 %v915_v55, 6.0  ;;  %v2141_v41 = vadd.f32 %v2077_v28, %v1945_v29  ;;  %v1554_v27 = vadd.f32 %v1490_v22, %v1358_v30  ;;  %v2471_v40 = vmul.f32 %v4603_v5, %v5924_v18 }
 0x26c   :  { %v2729_v11 = vadd.f32 %v2665_v16, %v2533_v15  ;;  %v2927_v34 = vmin.f32 %v2863_v6, 6.0  ;;  %v2667_v7 = vmul.f32 %v4606_v10, %v5928_v52  ;;  %v1163_v58 = vmul.f32 %v5826_v62, %v4579_v31  ;;  %v5947_v16 = vpop.f32.mrb[68].mxu0 }
 0x26d   :  { %1044 = vst [vmem:[#allocation2 + $0x331] sm:$0xff] %v5930_v23  ;;  %v1295_v42 = vmul.f32 %v5828_v44, %v4583_v36  ;;  %v2338_v25 = vadd.f32 %v2274_v19, %v2141_v41  ;;  %v1750_v14 = vadd.f32 %v1686_v8, %v1554_v27  ;;  %v1491_v12 = vmul.f32 %v5836_v21, %v4588_v43  ;;  %v5956_v51 = vpop.f32.mrb[69].mxu0  ;;  %v5976_v41 = vld [vmem:[#allocation2 + $0x291] sm:$0xff] }
 0x26e   :  { %v2800_v28 = vadd.f32 %v5681_v49, %v2729_v11  ;;  %3975 = vmatprep.mubr.f32.mxu1 %v2927_v34  ;;  %v1687_v44 = vmul.f32 %v5890_v20, %v4599_v3  ;;  %v1883_v26 = vmul.f32 %v5897_v59, %v4597_v0  ;;  %v2079_v19 = vmul.f32 %v5901_v35, %v4601_v4  ;;  %v5978_v27 = vld [vmem:[#allocation2 + $0x292] sm:$0xff] }
 0x26f   :  { %v1359_v62 = vadd.f32 %v1295_v42, %v1163_v58  ;;  %v2534_v53 = vadd.f32 %v2470_v56, %v2338_v25  ;;  %v1946_v21 = vadd.f32 %v1882_v48, %v1750_v14  ;;  %v2276_v55 = vmul.f32 %v4609_v13, %v5945_v60  ;;  %v5974_v48 = vld [vmem:[#allocation2 + $0x290] sm:$0xff] }
 0x270   :  { %v2864_v2 = vmax.f32 %v2800_v28, 0.0  ;;  %v2472_v8 = vmul.f32 %v4603_v5, %v5952_v17  ;;  %v2668_v15 = vmul.f32 %v4606_v10, %v5954_v50  ;;  %v1164_v29 = vmul.f32 %v5861_v9, %v4579_v31 }
 0x271   :  { %v1555_v22 = vadd.f32 %v1491_v12, %v1359_v62  ;;  %v2730_v6 = vadd.f32 %v2666_v38, %v2534_v53  ;;  %v2142_v11 = vadd.f32 %v2078_v24, %v1946_v21  ;;  %v1296_v56 = vmul.f32 %v5863_v46, %v4583_v36  ;;  %v5997_v53 = vld [vmem:[#allocation2 + $0x2a0] sm:$0xff] }
 0x272   :  { %v2928_v30 = vmin.f32 %v2864_v2, 6.0  ;;  %v1492_v58 = vmul.f32 %v5871_v39, %v4588_v43  ;;  %v1688_v42 = vmul.f32 %v5917_v57, %v4599_v3  ;;  %v1884_v9 = vmul.f32 %v5924_v18, %v4597_v0 }
 0x273   :  { %v1751_v34 = vadd.f32 %v1687_v44, %v1555_v22  ;;  %v2801_v38 = vadd.f32 %v5681_v49, %v2730_v6  ;;  %v2339_v46 = vadd.f32 %v2275_v47, %v2142_v11  ;;  %v1360_v24 = vadd.f32 %v1296_v56, %v1164_v29  ;;  %v6007_v6 = vld [vmem:[#allocation2 + $0x2a2] sm:$0xff] }
 0x274   :  { %3976 = vmatmul.mubr.f32.gmra.mrb[36].mxu1 %v2928_v30  ;;  %v2080_v28 = vmul.f32 %v5928_v52, %v4601_v4  ;;  %v2277_v14 = vmul.f32 %v4609_v13, %v5974_v48  ;;  %v2473_v39 = vmul.f32 %v4603_v5, %v5976_v41  ;;  %v2669_v12 = vmul.f32 %v4606_v10, %v5978_v27  ;;  %v6005_v30 = vld [vmem:[#allocation2 + $0x2a1] sm:$0xff] }
 0x275   :  { %v1947_v25 = vadd.f32 %v1883_v26, %v1751_v34  ;;  %v2865_v62 = vmax.f32 %v2801_v38, 0.0  ;;  %v2535_v44 = vadd.f32 %v2471_v40, %v2339_v46  ;;  %v1556_v2 = vadd.f32 %v1492_v58, %v1360_v24 }
 0x276   :  { %v1165_v47 = vmul.f32 %v5890_v20, %v4579_v31  ;;  %v1297_v26 = vmul.f32 %v5897_v59, %v4583_v36  ;;  %v1493_v22 = vmul.f32 %v5901_v35, %v4588_v43  ;;  %v1689_v29 = vmul.f32 %v5945_v60, %v4599_v3 }
 0x277   :  { %v2143_v21 = vadd.f32 %v2079_v19, %v1947_v25  ;;  %v2929_v40 = vmin.f32 %v2865_v62, 6.0  ;;  %v2731_v11 = vadd.f32 %v2667_v7, %v2535_v44  ;;  %v1752_v56 = vadd.f32 %v1688_v42, %v1556_v2  ;;  %v6028_v2 = vld [vmem:[#allocation2 + $0x2a8] sm:$0xff] }
 0x278   :  { %v1885_v20 = vmul.f32 %v5952_v17, %v4597_v0  ;;  %v1361_v34 = vadd.f32 %v1297_v26, %v1165_v47  ;;  %v2081_v59 = vmul.f32 %v5954_v50, %v4601_v4  ;;  %v2278_v35 = vmul.f32 %v4609_v13, %v5997_v53  ;;  %v6015_v58 = vpop.f32.mrb[0].mxu1 }
 0x279   :  { %v2340_v19 = vadd.f32 %v2276_v55, %v2143_v21  ;;  %3978 = vmatprep.mubr.f32.mxu1 %v2929_v40  ;;  %v2802_v38 = vadd.f32 %v5681_v49, %v2731_v11  ;;  %v1948_v46 = vadd.f32 %v1884_v9, %v1752_v56  ;;  %v2474_v7 = vmul.f32 %v4603_v5, %v6005_v30  ;;  %v6022_v55 = vpop.f32.mrb[1].mxu1  ;;  %v6034_v40 = vld [vmem:[#allocation2 + $0x2a9] sm:$0xff] }
 0x27a   :  { %v2670_v42 = vmul.f32 %v4606_v10, %v6007_v6  ;;  %v1557_v25 = vadd.f32 %v1493_v22, %v1361_v34  ;;  %v1166_v62 = vmul.f32 %v5917_v57, %v4579_v31  ;;  %v1298_v44 = vmul.f32 %v5924_v18, %v4583_v36  ;;  %v6038_v56 = vld [vmem:[#allocation2 + $0x2aa] sm:$0xff] }
 0x27b   :  { %v2536_v24 = vadd.f32 %v2472_v8, %v2340_v19  ;;  %v2866_v47 = vmax.f32 %v2802_v38, 0.0  ;;  %v2144_v9 = vadd.f32 %v2080_v28, %v1948_v46  ;;  %v1494_v21 = vmul.f32 %v5928_v52, %v4588_v43 }
 0x27c   :  { %v1690_v26 = vmul.f32 %v5974_v48, %v4599_v3  ;;  %v1753_v22 = vadd.f32 %v1689_v29, %v1557_v25  ;;  %v1362_v11 = vadd.f32 %v1298_v44, %v1166_v62  ;;  %v1886_v57 = vmul.f32 %v5976_v41, %v4597_v0 }
 0x27d   :  { %v2732_v8 = vadd.f32 %v2668_v15, %v2536_v24  ;;  %v2930_v18 = vmin.f32 %v2866_v47, 6.0  ;;  %v2341_v19 = vadd.f32 %v2277_v14, %v2144_v9  ;;  %v2082_v28 = vmul.f32 %v5978_v27, %v4601_v4  ;;  %v6055_v9 = vld [vmem:[#allocation2 + $0x2b8] sm:$0xff] }
 0x27e   :  { %v2279_v52 = vmul.f32 %v4609_v13, %v6028_v2  ;;  %v1949_v38 = vadd.f32 %v1885_v20, %v1753_v22  ;;  %v1558_v46 = vadd.f32 %v1494_v21, %v1362_v11  ;;  %v2475_v15 = vmul.f32 %v4603_v5, %v6034_v40  ;;  %v6057_v21 = vld [vmem:[#allocation2 + $0x2b9] sm:$0xff] }
 0x27f   :  { %v2803_v34 = vadd.f32 %v5681_v49, %v2732_v8  ;;  %3979 = vmatmul.mubr.f32.gmra.mrb[38].mxu1 %v2930_v18  ;;  %v2537_v29 = vadd.f32 %v2473_v39, %v2341_v19  ;;  %v2671_v24 = vmul.f32 %v4606_v10, %v6038_v56  ;;  %v1167_v14 = vmul.f32 %v5945_v60, %v4579_v31  ;;  %v6063_v11 = vld [vmem:[#allocation2 + $0x2ba] sm:$0xff] }
 0x280   :  { %v1299_v25 = vmul.f32 %v5952_v17, %v4583_v36  ;;  %v2145_v44 = vadd.f32 %v2081_v59, %v1949_v38  ;;  %v1754_v47 = vadd.f32 %v1690_v26, %v1558_v46  ;;  %v1495_v20 = vmul.f32 %v5954_v50, %v4588_v43 }
 0x281   :  { %v2867_v62 = vmax.f32 %v2803_v34, 0.0  ;;  %v2733_v39 = vadd.f32 %v2669_v12, %v2537_v29  ;;  %v1691_v22 = vmul.f32 %v5997_v53, %v4599_v3  ;;  %v1887_v60 = vmul.f32 %v6005_v30, %v4597_v0 }
 0x282   :  { %v1363_v8 = vadd.f32 %v1299_v25, %v1167_v14  ;;  %v2342_v59 = vadd.f32 %v2278_v35, %v2145_v44  ;;  %v1950_v26 = vadd.f32 %v1886_v57, %v1754_v47  ;;  %v2083_v50 = vmul.f32 %v6007_v6, %v4601_v4 }
 0x283   :  { %v2931_v17 = vmin.f32 %v2867_v62, 6.0  ;;  %v2804_v18 = vadd.f32 %v5681_v49, %v2733_v39  ;;  %v2280_v12 = vmul.f32 %v4609_v13, %v6055_v9  ;;  %v2476_v34 = vmul.f32 %v4603_v5, %v6057_v21  ;;  %v6072_v38 = vpop.f32.mrb[2].mxu1 }
 0x284   :  { %v1559_v19 = vadd.f32 %v1495_v20, %v1363_v8  ;;  %v2538_v46 = vadd.f32 %v2474_v7, %v2342_v59  ;;  %v2146_v29 = vadd.f32 %v2082_v28, %v1950_v26  ;;  %v2672_v35 = vmul.f32 %v4606_v10, %v6063_v11  ;;  %v6078_v14 = vpop.f32.mrb[3].mxu1  ;;  %v6084_v20 = vld [vmem:[#allocation2 + $0x2c0] sm:$0xff] }
 0x285   :  { %3981 = vmatprep.mubr.f32.mxu1 %v2931_v17  ;;  %v1168_v57 = vmul.f32 %v5974_v48, %v4579_v31  ;;  %v2868_v25 = vmax.f32 %v2804_v18, 0.0  ;;  %v1300_v44 = vmul.f32 %v5976_v41, %v4583_v36  ;;  %v1496_v47 = vmul.f32 %v5978_v27, %v4588_v43  ;;  %v6086_v7 = vld [vmem:[#allocation2 + $0x2c1] sm:$0xff] }
 0x286   :  { %v1755_v62 = vadd.f32 %v1691_v22, %v1559_v19  ;;  %v2734_v28 = vadd.f32 %v2670_v42, %v2538_v46  ;;  %v2343_v39 = vadd.f32 %v2279_v52, %v2146_v29  ;;  %v1692_v8 = vmul.f32 %v6028_v2, %v4599_v3  ;;  %v6092_v17 = vld [vmem:[#allocation2 + $0x2c2] sm:$0xff] }
 0x287   :  { %v1888_v48 = vmul.f32 %v6034_v40, %v4597_v0  ;;  %v2932_v22 = vmin.f32 %v2868_v25, 6.0  ;;  %v1364_v41 = vadd.f32 %v1300_v44, %v1168_v57  ;;  %v2084_v27 = vmul.f32 %v6038_v56, %v4601_v4  ;;  %v6109_v44 = vld [vmem:[#allocation2 + $0x2d0] sm:$0xff] }
 0x288   :  { %v1951_v59 = vadd.f32 %v1887_v60, %v1755_v62  ;;  %v2805_v26 = vadd.f32 %v5681_v49, %v2734_v28  ;;  %v2539_v18 = vadd.f32 %v2475_v15, %v2343_v39  ;;  %v2281_v42 = vmul.f32 %v4609_v13, %v6084_v20 }
 0x289   :  { %v2477_v52 = vmul.f32 %v4603_v5, %v6086_v7  ;;  %3982 = vmatmul.mubr.f32.gmra.mrb[40].mxu1 %v2932_v22  ;;  %v1560_v46 = vadd.f32 %v1496_v47, %v1364_v41  ;;  %v2673_v29 = vmul.f32 %v4606_v10, %v6092_v17  ;;  %v1169_v60 = vmul.f32 %v5997_v53, %v4579_v31  ;;  %v6115_v22 = vld [vmem:[#allocation2 + $0x2d2] sm:$0xff] }
 0x28a   :  { %v2147_v19 = vadd.f32 %v2083_v50, %v1951_v59  ;;  %v2869_v57 = vmax.f32 %v2805_v26, 0.0  ;;  %v2735_v25 = vadd.f32 %v2671_v24, %v2539_v18  ;;  %v1301_v15 = vmul.f32 %v6005_v30, %v4583_v36 }
 0x28b   :  { %v1497_v62 = vmul.f32 %v6007_v6, %v4588_v43  ;;  %v1756_v39 = vadd.f32 %v1692_v8, %v1560_v46  ;;  %v1693_v50 = vmul.f32 %v6055_v9, %v4599_v3  ;;  %v1889_v47 = vmul.f32 %v6057_v21, %v4597_v0 }
 0x28c   :  { %v2344_v28 = vadd.f32 %v2280_v12, %v2147_v19  ;;  %v2933_v53 = vmin.f32 %v2869_v57, 6.0  ;;  %v2806_v24 = vadd.f32 %v5681_v49, %v2735_v25  ;;  %v1365_v59 = vadd.f32 %v1301_v15, %v1169_v60  ;;  %v6132_v25 = vld [vmem:[#allocation2 + $0x2d8] sm:$0xff] }
 0x28d   :  { %v2085_v30 = vmul.f32 %v6063_v11, %v4601_v4  ;;  %v1952_v41 = vadd.f32 %v1888_v48, %v1756_v39  ;;  %v2282_v12 = vmul.f32 %v4609_v13, %v6109_v44  ;;  %v2478_v8 = vmul.f32 %v4603_v5, %v5694_v32  ;;  %v6134_v32 = vld [vmem:[#allocation2 + $0x2d9] sm:$0xff] }
 0x28e   :  { %v2540_v6 = vadd.f32 %v2476_v34, %v2344_v28  ;;  %3984 = vmatprep.mubr.f32.mxu1 %v2933_v53  ;;  %v2870_v26 = vmax.f32 %v2806_v24, 0.0  ;;  %v1561_v18 = vadd.f32 %v1497_v62, %v1365_v59  ;;  %v2674_v19 = vmul.f32 %v4606_v10, %v6115_v22  ;;  %v6136_v15 = vld [vmem:[#allocation2 + $0x2da] sm:$0xff] }
 0x28f   :  { %v1170_v46 = vmul.f32 %v6028_v2, %v4579_v31  ;;  %v2148_v57 = vadd.f32 %v2084_v27, %v1952_v41  ;;  %v1302_v34 = vmul.f32 %v6034_v40, %v4583_v36  ;;  %v1498_v48 = vmul.f32 %v6038_v56, %v4588_v43  ;;  %v6138_v62 = vpop.f32.mrb[4].mxu1 }
 0x290   :  { %v2736_v60 = vadd.f32 %v2672_v35, %v2540_v6  ;;  %6571 = vst [vmem:[#allocation21_spill] sm:$0xff] %v6138_v62  ;;  %v2934_v28 = vmin.f32 %v2870_v26, 6.0  ;;  %v1757_v39 = vadd.f32 %v1693_v50, %v1561_v18  ;;  %v1694_v2 = vmul.f32 %v6084_v20, %v4599_v3  ;;  %v6144_v40 = vpop.f32.mrb[5].mxu1  ;;  %v1823_v26 = vld [vmem:[#allocation2 + $0x2d1] sm:$0xff] }
 0x291   :  { %v1890_v35 = vmul.f32 %v6086_v7, %v4597_v0  ;;  %6572 = vst [vmem:[#allocation22_spill] sm:$0xff] %v6144_v40  ;;  %v2345_v27 = vadd.f32 %v2281_v42, %v2148_v57  ;;  %v1366_v53 = vadd.f32 %v1302_v34, %v1170_v46  ;;  %v2086_v24 = vmul.f32 %v6092_v17, %v4601_v4  ;;  %v6157_v46 = vld [vmem:[#allocation2 + $0x2e8] sm:$0xff] }
 0x292   :  { %v2807_v56 = vadd.f32 %v5681_v49, %v2736_v60  ;;  %3985 = vmatmul.mubr.f32.gmra.mrb[42].mxu1 %v2934_v28  ;;  %v1953_v59 = vadd.f32 %v1889_v47, %v1757_v39  ;;  %v2283_v50 = vmul.f32 %v4609_v13, %v6132_v25  ;;  %v2479_v6 = vmul.f32 %v4603_v5, %v6134_v32  ;;  %v6165_v39 = vld [vmem:[#allocation2 + $0x2ea] sm:$0xff] }
 0x293   :  { %v2675_v41 = vmul.f32 %v4606_v10, %v6136_v15  ;;  %v2541_v40 = vadd.f32 %v2477_v52, %v2345_v27  ;;  %v1562_v60 = vadd.f32 %v1498_v48, %v1366_v53  ;;  %v1171_v42 = vmul.f32 %v6055_v9, %v4579_v31 }
 0x294   :  { %v2871_v18 = vmax.f32 %v2807_v56, 0.0  ;;  %v2149_v57 = vadd.f32 %v2085_v30, %v1953_v59  ;;  %v1303_v47 = vmul.f32 %v6057_v21, %v4583_v36  ;;  %v1499_v34 = vmul.f32 %v6063_v11, %v4588_v43 }
 0x295   :  { %v1695_v28 = vmul.f32 %v6109_v44, %v4599_v3  ;;  %v2737_v52 = vadd.f32 %v2673_v29, %v2541_v40  ;;  %v1758_v48 = vadd.f32 %v1694_v2, %v1562_v60  ;;  %v1891_v27 = vmul.f32 %v4597_v0, %v1823_v26  ;;  %v6181_v60 = vld [vmem:[#allocation2 + $0x2f0] sm:$0xff] }
 0x296   :  { %v2935_v56 = vmin.f32 %v2871_v18, 6.0  ;;  %v2346_v9 = vadd.f32 %v2282_v12, %v2149_v57  ;;  %v1367_v53 = vadd.f32 %v1303_v47, %v1171_v42  ;;  %v2087_v30 = vmul.f32 %v6115_v22, %v4601_v4  ;;  %v6187_v47 = vld [vmem:[#allocation2 + $0x2f1] sm:$0xff] }
 0x297   :  { %v2284_v21 = vmul.f32 %v4609_v13, %v6157_v46  ;;  %v2808_v11 = vadd.f32 %v5681_v49, %v2737_v52  ;;  %v1954_v59 = vadd.f32 %v1890_v35, %v1758_v48  ;;  %v2480_v62 = vmul.f32 %v4603_v5, %v5753_v61  ;;  %v6191_v52 = vld [vmem:[#allocation2 + $0x2f2] sm:$0xff] }
 0x298   :  { %3987 = vmatprep.mubr.f32.mxu1 %v2935_v56  ;;  %v2676_v29 = vmul.f32 %v4606_v10, %v6165_v39  ;;  %v2542_v2 = vadd.f32 %v2478_v8, %v2346_v9  ;;  %v1563_v40 = vadd.f32 %v1499_v34, %v1367_v53  ;;  %v1172_v12 = vmul.f32 %v6084_v20, %v4579_v31 }
 0x299   :  { %v1304_v18 = vmul.f32 %v6086_v7, %v4583_v36  ;;  %v2872_v42 = vmax.f32 %v2808_v11, 0.0  ;;  %v2150_v57 = vadd.f32 %v2086_v24, %v1954_v59  ;;  %v1500_v35 = vmul.f32 %v6092_v17, %v4588_v43 }
 0x29a   :  { %v1696_v61 = vmul.f32 %v6132_v25, %v4599_v3  ;;  %v2738_v8 = vadd.f32 %v2674_v19, %v2542_v2  ;;  %v1759_v34 = vadd.f32 %v1695_v28, %v1563_v40  ;;  %v1892_v20 = vmul.f32 %v6134_v32, %v4597_v0  ;;  %v6193_v7 = vpop.f32.mrb[6].mxu1  ;;  %v1825_v2 = vld [vmem:[#allocation2 + $0x2e9] sm:$0xff] }
 0x29b   :  { %v1368_v56 = vadd.f32 %v1304_v18, %v1172_v12  ;;  %v2936_v48 = vmin.f32 %v2872_v42, 6.0  ;;  %v2347_v24 = vadd.f32 %v2283_v50, %v2150_v57  ;;  %v2088_v17 = vmul.f32 %v6136_v15, %v4601_v4  ;;  %v6199_v53 = vpop.f32.mrb[7].mxu1 }
 0x29c   :  { %v2285_v9 = vmul.f32 %v4609_v13, %v6181_v60  ;;  %6573 = vst [vmem:[#allocation23_spill] sm:$0xff] %v6199_v53  ;;  %v2809_v19 = vadd.f32 %v5681_v49, %v2738_v8  ;;  %v1955_v28 = vadd.f32 %v1891_v27, %v1759_v34  ;;  %v2481_v59 = vmul.f32 %v4603_v5, %v6187_v47 }
 0x29d   :  { %v1564_v11 = vadd.f32 %v1500_v35, %v1368_v56  ;;  %3988 = vmatmul.mubr.f32.gmra.mrb[44].mxu1 %v2936_v48  ;;  %v2543_v40 = vadd.f32 %v2479_v6, %v2347_v24  ;;  %v2677_v50 = vmul.f32 %v4606_v10, %v6191_v52  ;;  %v1173_v12 = vmul.f32 %v6109_v44, %v4579_v31  ;;  %v6211_v35 = vld [vmem:[#allocation2 + $0x300] sm:$0xff] }
 0x29e   :  { %v1305_v18 = vmul.f32 %v1823_v26, %v4583_v36  ;;  %v2873_v42 = vmax.f32 %v2809_v19, 0.0  ;;  %v2151_v57 = vadd.f32 %v2087_v30, %v1955_v28  ;;  %v1501_v27 = vmul.f32 %v6115_v22, %v4588_v43  ;;  %v6216_v48 = vld [vmem:[#allocation2 + $0x302] sm:$0xff] }
 0x29f   :  { %v1760_v53 = vadd.f32 %v1696_v61, %v1564_v11  ;;  %v2739_v8 = vadd.f32 %v2675_v41, %v2543_v40  ;;  %v1697_v6 = vmul.f32 %v6157_v46, %v4599_v3  ;;  %v1893_v56 = vmul.f32 %v4597_v0, %v1825_v2 }
 0x2a0   :  { %v1369_v34 = vadd.f32 %v1305_v18, %v1173_v12  ;;  %v2937_v44 = vmin.f32 %v2873_v42, 6.0  ;;  %v2348_v24 = vadd.f32 %v2284_v21, %v2151_v57  ;;  %v2089_v30 = vmul.f32 %v6165_v39, %v4601_v4  ;;  %v6233_v18 = vld [vmem:[#allocation2 + $0x308] sm:$0xff] }
 0x2a1   :  { %v1956_v26 = vadd.f32 %v1892_v20, %v1760_v53  ;;  %v2810_v61 = vadd.f32 %v5681_v49, %v2739_v8  ;;  %v2286_v41 = vmul.f32 %v4609_v13, %v6211_v35  ;;  %v2482_v19 = vmul.f32 %v4603_v5, %v5808_v37  ;;  %v6235_v37 = vld [vmem:[#allocation2 + $0x309] sm:$0xff] }
 0x2a2   :  { %v1565_v22 = vadd.f32 %v1501_v27, %v1369_v34  ;;  %3990 = vmatprep.mubr.f32.mxu1 %v2937_v44  ;;  %v2544_v28 = vadd.f32 %v2480_v62, %v2348_v24  ;;  %v2678_v40 = vmul.f32 %v4606_v10, %v6216_v48  ;;  %v1174_v21 = vmul.f32 %v6132_v25, %v4579_v31  ;;  %v6241_v57 = vld [vmem:[#allocation2 + $0x30a] sm:$0xff] }
 0x2a3   :  { %v2152_v11 = vadd.f32 %v2088_v17, %v1956_v26  ;;  %v2874_v20 = vmax.f32 %v2810_v61, 0.0  ;;  %v1306_v49 = vmul.f32 %v6134_v32, %v4583_v36  ;;  %v1502_v12 = vmul.f32 %v6136_v15, %v4588_v43  ;;  %v1827_v26 = vld [vmem:[#allocation2 + $0x301] sm:$0xff] }
 0x2a4   :  { %v1761_v53 = vadd.f32 %v1697_v6, %v1565_v22  ;;  %v2740_v62 = vadd.f32 %v2676_v29, %v2544_v28  ;;  %v1698_v42 = vmul.f32 %v6181_v60, %v4599_v3  ;;  %v1894_v25 = vmul.f32 %v6187_v47, %v4597_v0  ;;  %v6247_v6 = vld [vmem:[#allocation11] ss:$0 sm:$0xff] }
 0x2a5   :  { %v2349_v17 = vadd.f32 %v2285_v9, %v2152_v11  ;;  %v2938_v27 = vmin.f32 %v2874_v20, 6.0  ;;  %v1370_v32 = vadd.f32 %v1306_v49, %v1174_v21  ;;  %v2090_v15 = vmul.f32 %v6191_v52, %v4601_v4  ;;  %v6263_v49 = vld [vmem:[#allocation2 + $0x318] sm:$0xff] }
 0x2a6   :  { %v1957_v8 = vadd.f32 %v1893_v56, %v1761_v53  ;;  %v6245_v34 = vpop.f32.mrb[8].mxu1  ;;  %v2811_v29 = vadd.f32 %v6247_v6, %v2740_v62  ;;  %v2287_v44 = vmul.f32 %v4609_v13, %v6233_v18  ;;  %v2483_v24 = vmul.f32 %v4603_v5, %v6235_v37 }
 0x2a7   :  { %v2545_v9 = vadd.f32 %v2481_v59, %v2349_v17  ;;  %v6254_v61 = vpop.f32.mrb[9].mxu1  ;;  %3991 = vmatmul.mubr.f32.gmra.mrb[46].mxu1 %v2938_v27  ;;  %v1566_v22 = vadd.f32 %v1502_v12, %v1370_v32  ;;  %v2679_v28 = vmul.f32 %v4606_v10, %v6241_v57  ;;  %v1175_v11 = vmul.f32 %v6157_v46, %v4579_v31  ;;  %v6268_v27 = vld [vmem:[#allocation2 + $0x31a] sm:$0xff] }
 0x2a8   :  { %6574 = vst [vmem:[#allocation24_spill] sm:$0xff] %v6254_v61  ;;  %v2153_v56 = vadd.f32 %v2089_v30, %v1957_v8  ;;  %v2875_v21 = vmax.f32 %v2811_v29, 0.0  ;;  %v1307_v20 = vmul.f32 %v1825_v2, %v4583_v36  ;;  %v1503_v53 = vmul.f32 %v6165_v39, %v4588_v43 }
 0x2a9   :  { %v2741_v59 = vadd.f32 %v2677_v50, %v2545_v9  ;;  %v1762_v17 = vadd.f32 %v1698_v42, %v1566_v22  ;;  %v1699_v30 = vmul.f32 %v6211_v35, %v4599_v3  ;;  %v1895_v12 = vmul.f32 %v4597_v0, %v1827_v26 }
 0x2aa   :  { %v2350_v62 = vadd.f32 %v2286_v41, %v2153_v56  ;;  %v2939_v8 = vmin.f32 %v2875_v21, 6.0  ;;  %v1371_v50 = vadd.f32 %v1307_v20, %v1175_v11  ;;  %v2091_v2 = vmul.f32 %v6216_v48, %v4601_v4  ;;  %v6289_v20 = vld [vmem:[#allocation2 + $0x322] sm:$0xff] }
 0x2ab   :  { %v2812_v46 = vadd.f32 %v6247_v6, %v2741_v59  ;;  %v1958_v39 = vadd.f32 %v1894_v25, %v1762_v17  ;;  %v2288_v41 = vmul.f32 %v4609_v13, %v6263_v49  ;;  %v2484_v42 = vmul.f32 %v4603_v5, %v5875_v63  ;;  %v6285_v59 = vld [vmem:[#allocation2 + $0x320] sm:$0xff] }
 0x2ac   :  { %v2546_v32 = vadd.f32 %v2482_v19, %v2350_v62  ;;  %3993 = vmatprep.mubr.f32.mxu1 %v2939_v8  ;;  %v1567_v9 = vadd.f32 %v1503_v53, %v1371_v50  ;;  %v2680_v56 = vmul.f32 %v4606_v10, %v6268_v27  ;;  %v1176_v22 = vmul.f32 %v6181_v60, %v4579_v31  ;;  %v6287_v63 = vld [vmem:[#allocation2 + $0x321] sm:$0xff] }
 0x2ad   :  { %v2876_v29 = vmax.f32 %v2812_v46, 0.0  ;;  %v2154_v21 = vadd.f32 %v2090_v15, %v1958_v39  ;;  %v1308_v19 = vmul.f32 %v6187_v47, %v4583_v36  ;;  %v1504_v25 = vmul.f32 %v6191_v52, %v4588_v43 }
 0x2ae   :  { %v2742_v11 = vadd.f32 %v2678_v40, %v2546_v32  ;;  %v1763_v62 = vadd.f32 %v1699_v30, %v1567_v9  ;;  %v1700_v17 = vmul.f32 %v6233_v18, %v4599_v3  ;;  %v1896_v60 = vmul.f32 %v6235_v37, %v4597_v0  ;;  %v1829_v32 = vld [vmem:[#allocation2 + $0x319] sm:$0xff] }
 0x2af   :  { %v2940_v53 = vmin.f32 %v2876_v29, 6.0  ;;  %v2351_v47 = vadd.f32 %v2287_v44, %v2154_v21  ;;  %v1372_v15 = vadd.f32 %v1308_v19, %v1176_v22  ;;  %v2092_v52 = vmul.f32 %v6241_v57, %v4601_v4  ;;  %v2222_v22 = vld [vmem:[#allocation2 + $0x330] sm:$0xff] }
 0x2b0   :  { %v2813_v40 = vadd.f32 %v6247_v6, %v2742_v11  ;;  %v1959_v8 = vadd.f32 %v1895_v12, %v1763_v62  ;;  %v2289_v46 = vmul.f32 %v4609_v13, %v6285_v59  ;;  %v2485_v30 = vmul.f32 %v4603_v5, %v6287_v63  ;;  %v2614_v62 = vld [vmem:[#allocation2 + $0x332] sm:$0xff] }
 0x2b1   :  { %3994 = vmatmul.mubr.f32.gmra.mrb[48].mxu1 %v2940_v53  ;;  %v6304_v50 = vmul.f32 %v4606_v10, %v6289_v20  ;;  %v2547_v29 = vadd.f32 %v2483_v24, %v2351_v47  ;;  %v1568_v44 = vadd.f32 %v1504_v25, %v1372_v15  ;;  %v1177_v9 = vmul.f32 %v6211_v35, %v4579_v31  ;;  %v6308_v11 = vpop.f32.mrb[10].mxu1 }
 0x2b2   :  { %v2877_v39 = vmax.f32 %v2813_v40, 0.0  ;;  %6575 = vst [vmem:[#allocation25_spill] sm:$0xff] %v6308_v11  ;;  %v2155_v12 = vadd.f32 %v2091_v2, %v1959_v8  ;;  %v1309_v21 = vmul.f32 %v1827_v26, %v4583_v36  ;;  %v1505_v19 = vmul.f32 %v6216_v48, %v4588_v43  ;;  %v6315_v61 = vpop.f32.mrb[11].mxu1 }
 0x2b3   :  { %v1701_v53 = vmul.f32 %v6263_v49, %v4599_v3  ;;  %v2743_v25 = vadd.f32 %v2679_v28, %v2547_v29  ;;  %v1764_v40 = vadd.f32 %v1700_v17, %v1568_v44  ;;  %v1897_v35 = vmul.f32 %v4597_v0, %v1829_v32  ;;  %v2223_v44 = vld [vmem:[#allocation2 + $0x338] sm:$0xff] }
 0x2b4   :  { %v2941_v24 = vmin.f32 %v2877_v39, 6.0  ;;  %v2352_v47 = vadd.f32 %v2288_v41, %v2155_v12  ;;  %v1373_v15 = vadd.f32 %v1309_v21, %v1177_v9  ;;  %v2093_v2 = vmul.f32 %v6268_v27, %v4601_v4 }
 0x2b5   :  { %v2290_v26 = vmul.f32 %v4609_v13, %v2222_v22  ;;  %v2814_v48 = vadd.f32 %v6247_v6, %v2743_v25  ;;  %v1960_v8 = vadd.f32 %v1896_v60, %v1764_v40  ;;  %v2486_v11 = vmul.f32 %v4603_v5, %v5930_v23  ;;  %v2419_v23 = vld [vmem:[#allocation2 + $0x339] sm:$0xff] }
 0x2b6   :  { %3996 = vmatprep.mubr.f32.mxu1 %v2941_v24  ;;  %v2682_v39 = vmul.f32 %v4606_v10, %v2614_v62  ;;  %v2548_v28 = vadd.f32 %v2484_v42, %v2352_v47  ;;  %v1569_v17 = vadd.f32 %v1505_v19, %v1373_v15  ;;  %v1178_v41 = vmul.f32 %v6233_v18, %v4579_v31  ;;  %v2615_v18 = vld [vmem:[#allocation2 + $0x33a] sm:$0xff] }
 0x2b7   :  { %v1310_v29 = vmul.f32 %v6235_v37, %v4583_v36  ;;  %v2878_v9 = vmax.f32 %v2814_v48, 0.0  ;;  %v2156_v12 = vadd.f32 %v2092_v52, %v1960_v8  ;;  %v1506_v21 = vmul.f32 %v6241_v57, %v4588_v43 }
 0x2b8   :  { %v1702_v60 = vmul.f32 %v6285_v59, %v4599_v3  ;;  %v2744_v24 = vadd.f32 %v2680_v56, %v2548_v28  ;;  %v1765_v25 = vadd.f32 %v1701_v53, %v1569_v17  ;;  %v1898_v19 = vmul.f32 %v6287_v63, %v4597_v0  ;;  %v1831_v56 = vld [vmem:[#allocation2 + $0x331] sm:$0xff] }
 0x2b9   :  { %v1374_v42 = vadd.f32 %v1310_v29, %v1178_v41  ;;  %v2942_v40 = vmin.f32 %v2878_v9, 6.0  ;;  %v2353_v47 = vadd.f32 %v2289_v46, %v2156_v12  ;;  %v2094_v37 = vmul.f32 %v6289_v20, %v4601_v4 }
 0x2ba   :  { %v2291_v52 = vmul.f32 %v4609_v13, %v2223_v44  ;;  %v2815_v57 = vadd.f32 %v6247_v6, %v2744_v24  ;;  %v1961_v15 = vadd.f32 %v1897_v35, %v1765_v25  ;;  %v2487_v8 = vmul.f32 %v4603_v5, %v2419_v23  ;;  %v2224_v35 = vld [vmem:[#allocation2 + $0x348] sm:$0xff] }
 0x2bb   :  { %v1570_v48 = vadd.f32 %v1506_v21, %v1374_v42  ;;  %3997 = vmatmul.mubr.f32.gmra.mrb[50].mxu1 %v2942_v40  ;;  %v2549_v53 = vadd.f32 %v2485_v30, %v2353_v47  ;;  %v2683_v28 = vmul.f32 %v4606_v10, %v2615_v18  ;;  %v1179_v17 = vmul.f32 %v6263_v49, %v4579_v31  ;;  %v2420_v21 = vld [vmem:[#allocation2 + $0x349] sm:$0xff] }
 0x2bc   :  { %v1311_v46 = vmul.f32 %v1829_v32, %v4583_v36  ;;  %v2879_v41 = vmax.f32 %v2815_v57, 0.0  ;;  %v2157_v29 = vadd.f32 %v2093_v2, %v1961_v15  ;;  %v1507_v12 = vmul.f32 %v6268_v27, %v4588_v43  ;;  %v2616_v49 = vld [vmem:[#allocation2 + $0x34a] sm:$0xff] }
 0x2bd   :  { %v1766_v9 = vadd.f32 %v1702_v60, %v1570_v48  ;;  %v6346_v24 = vpop.f32.mrb[12].mxu1  ;;  %v2745_v25 = vadd.f32 %v6304_v50, %v2549_v53  ;;  %v1703_v42 = vmul.f32 %v2222_v22, %v4599_v3  ;;  %v1899_v40 = vmul.f32 %v4597_v0, %v1831_v56 }
 0x2be   :  { %v1375_v30 = vadd.f32 %v1311_v46, %v1179_v17  ;;  %v6351_v47 = vpop.f32.mrb[13].mxu1  ;;  %v2943_v32 = vmin.f32 %v2879_v41, 6.0  ;;  %v2354_v2 = vadd.f32 %v2290_v26, %v2157_v29  ;;  %v2095_v57 = vmul.f32 %v2614_v62, %v4601_v4  ;;  %v2421_v41 = vld [vmem:[#allocation2 + $0x351] sm:$0xff] }
 0x2bf   :  { %v1962_v60 = vadd.f32 %v1898_v19, %v1766_v9  ;;  %v2816_v27 = vadd.f32 %v6247_v6, %v2745_v25  ;;  %v2292_v48 = vmul.f32 %v4609_v13, %v2224_v35  ;;  %v2488_v50 = vmul.f32 %v4603_v5, %v2420_v21  ;;  %v6366_v35 = vld [vmem:[#allocation14] ss:$0 sm:$0xff] }
 0x2c0   :  { %v1571_v15 = vadd.f32 %v1507_v12, %v1375_v30  ;;  %3999 = vmatprep.mubr.f32.mxu1 %v2943_v32  ;;  %v2550_v53 = vadd.f32 %v2486_v11, %v2354_v2  ;;  %v2684_v56 = vmul.f32 %v4606_v10, %v2616_v49  ;;  %v1180_v17 = vmul.f32 %v6285_v59, %v4579_v31  ;;  %v4075_v30 = vld [vmem:[#allocation2 + $0x8] sm:$0xff] }
 0x2c1   :  { %v2158_v22 = vadd.f32 %v2094_v37, %v1962_v60  ;;  %v2880_v46 = vmax.f32 %v2816_v27, 0.0  ;;  %v1312_v62 = vmul.f32 %v6287_v63, %v4583_v36  ;;  %v1508_v19 = vmul.f32 %v6289_v20, %v4588_v43  ;;  %v2617_v37 = vld [vmem:[#allocation2 + $0x352] sm:$0xff]  ;;  %v3362_v27 = vld [vmem:[#allocation3 + $0x28] sm:$0xff] }
 0x2c2   :  { %v1767_v26 = vadd.f32 %v1703_v42, %v1571_v15  ;;  %v2746_v29 = vadd.f32 %v2682_v39, %v2550_v53  ;;  %v1704_v12 = vmul.f32 %v2223_v44, %v4599_v3  ;;  %v1900_v11 = vmul.f32 %v2419_v23, %v4597_v0  ;;  %v3358_v3 = vld [vmem:[#allocation3 + $0x8] sm:$0xff]  ;;  %v3359_v42 = vld [vmem:[#allocation3 + $0x10] sm:$0xff]  ;;  %v3361_v53 = vld [vmem:[#allocation3 + $0x20] sm:$0xff] }
 0x2c3   :  { %v2355_v9 = vadd.f32 %v2291_v52, %v2158_v22  ;;  %v2944_v21 = vmin.f32 %v2880_v46, 6.0  ;;  %v1376_v59 = vadd.f32 %v1312_v62, %v1180_v17  ;;  %v2096_v25 = vmul.f32 %v2615_v18, %v4601_v4  ;;  %v3357_v4 = vld [vmem:[#allocation3] sm:$0xff]  ;;  %v3360_v18 = vld [vmem:[#allocation3 + $0x18] sm:$0xff]  ;;  %v3363_v17 = vld [vmem:[#allocation3 + $0x30] sm:$0xff] }
 0x2c4   :  { %v1963_v31 = vadd.f32 %v1899_v40, %v1767_v26  ;;  %v2817_v36 = vadd.f32 %v6247_v6, %v2746_v29  ;;  %v2293_v43 = vmul.f32 %v4075_v30, %v4609_v13  ;;  %v6372_v20 = vmul.f32 %v4603_v5, %v2421_v41  ;;  %v3364_v22 = vld [vmem:[#allocation3 + $0x38] sm:$0xff]  ;;  %v3366_v62 = vld [vmem:[#allocation3 + $0x48] sm:$0xff] }
 0x2c5   :  { %v2551_v63 = vadd.f32 %v2487_v8, %v2355_v9  ;;  %4000 = vmatmul.mubr.f32.gmra.mrb[52].mxu1 %v2944_v21  ;;  %v1572_v39 = vadd.f32 %v1508_v19, %v1376_v59  ;;  %v6375_v44 = vmul.f32 %v4606_v10, %v2617_v37  ;;  %v3044_v23 = vadd.f32 %v5844_v45, %v6366_v35 }
 0x2c6   :  { %v2159_v0 = vadd.f32 %v2095_v57, %v1963_v31  ;;  %v2881_v52 = vmax.f32 %v2817_v36, 0.0  ;;  %v3039_v13 = vadd.f32 %v6366_v35, %v5846_v54  ;;  %v3054_v5 = vadd.f32 %v5856_v33, %v6366_v35  ;;  %v3368_v31 = vld [vmem:[#allocation3 + $0x58] sm:$0xff]  ;;  %v3370_v36 = vld [vmem:[#allocation3 + $0x68] sm:$0xff] }
 0x2c7   :  { %v2747_v8 = vadd.f32 %v2683_v28, %v2551_v63  ;;  %v1768_v49 = vadd.f32 %v1704_v12, %v1572_v39  ;;  %v3422_v32 = vadd.f32 %v3358_v3, %v3044_v23  ;;  %v3049_v10 = vadd.f32 %v6366_v35, %v5865_v1  ;;  %v3369_v63 = vld [vmem:[#allocation3 + $0x60] sm:$0xff]  ;;  %v3372_v23 = vld [vmem:[#allocation3 + $0x78] sm:$0xff] }
 0x2c8   :  { %v2356_v40 = vadd.f32 %v2292_v48, %v2159_v0  ;;  %v2945_v2 = vmin.f32 %v2881_v52, 6.0  ;;  %v3421_v60 = vadd.f32 %v3357_v4, %v3039_v13  ;;  %v3424_v57 = vadd.f32 %v3360_v18, %v3054_v5  ;;  %v6386_v28 = vpop.f32.mrb[14].mxu1 }
 0x2c9   :  { %v2818_v45 = vadd.f32 %v6247_v6, %v2747_v8  ;;  %v1964_v54 = vadd.f32 %v1900_v11, %v1768_v49  ;;  %3486 = vst.msk [vmem:[#allocation15 + $0x8] sm:$0xff] %vm271_vm1, %v3422_v32  ;;  %v3423_v33 = vadd.f32 %v3359_v42, %v3049_v10  ;;  %v3064_v48 = vadd.f32 %v5947_v16, %v6366_v35  ;;  %v6391_v1 = vpop.f32.mrb[15].mxu1  ;;  %v3371_v49 = vld [vmem:[#allocation3 + $0x70] sm:$0xff]  ;;  %v3374_v32 = vld [vmem:[#allocation3 + $0x88] sm:$0xff] }
 0x2ca   :  { %v2552_v15 = vadd.f32 %v2488_v50, %v2356_v40  ;;  %4002 = vmatprep.mubr.f32.mxu1 %v2945_v2  ;;  %3485 = vst.msk [vmem:[#allocation15] sm:$0xff] %vm271_vm1, %v3421_v60  ;;  %3488 = vst.msk [vmem:[#allocation15 + $0x18] sm:$0xff] %vm271_vm1, %v3424_v57  ;;  %v3059_v50 = vadd.f32 %v6366_v35, %v5956_v51  ;;  %v3074_v26 = vadd.f32 %v6015_v58, %v6366_v35  ;;  %v3365_v51 = vld [vmem:[#allocation3 + $0x40] sm:$0xff]  ;;  %v3376_v57 = vld [vmem:[#allocation3 + $0x98] sm:$0xff] }
 0x2cb   :  { %v2882_v46 = vmax.f32 %v2818_v45, 0.0  ;;  %v3069_v16 = vadd.f32 %v6366_v35, %v6022_v55  ;;  %v2160_v41 = vadd.f32 %v2096_v25, %v1964_v54  ;;  %3487 = vst.msk [vmem:[#allocation15 + $0x10] sm:$0xff] %vm271_vm1, %v3423_v33  ;;  %v3426_v29 = vadd.f32 %v3362_v27, %v3064_v48  ;;  %v3367_v25 = vld [vmem:[#allocation3 + $0x50] sm:$0xff]  ;;  %v3373_v60 = vld [vmem:[#allocation3 + $0x80] sm:$0xff]  ;;  %v3378_v48 = vld [vmem:[#allocation3 + $0xa8] sm:$0xff] }
 0x2cc   :  { %v2748_v19 = vadd.f32 %v2684_v56, %v2552_v15  ;;  %v3084_v9 = vadd.f32 %v6072_v38, %v6366_v35  ;;  %v3425_v11 = vadd.f32 %v3361_v53, %v3059_v50  ;;  %v3428_v37 = vadd.f32 %v3364_v22, %v3074_v26  ;;  %v6576_v38 = vld [vmem:[#allocation21_spill] sm:$0xff]  ;;  %v6579_v45 = vld [vmem:[#allocation24_spill] sm:$0xff]  ;;  %v3377_v53 = vld [vmem:[#allocation3 + $0xa0] sm:$0xff] }
 0x2cd   :  { %v2946_v12 = vmin.f32 %v2882_v46, 6.0  ;;  %v3427_v21 = vadd.f32 %v3363_v17, %v3069_v16  ;;  %v2357_v59 = vadd.f32 %v2293_v43, %v2160_v41  ;;  %3490 = vst.msk [vmem:[#allocation15 + $0x28] sm:$0xff] %vm271_vm1, %v3426_v29  ;;  %v3079_v56 = vadd.f32 %v6366_v35, %v6078_v14  ;;  %v6577_v43 = vld [vmem:[#allocation22_spill] sm:$0xff]  ;;  %v6578_v14 = vld [vmem:[#allocation23_spill] sm:$0xff]  ;;  %v3375_v27 = vld [vmem:[#allocation3 + $0x90] sm:$0xff] }
 0x2ce   :  { %v2819_v58 = vadd.f32 %v6247_v6, %v2748_v19  ;;  %v3430_v55 = vadd.f32 %v3366_v62, %v3084_v9  ;;  %3489 = vst.msk [vmem:[#allocation15 + $0x20] sm:$0xff] %vm271_vm1, %v3425_v11  ;;  %3492 = vst.msk [vmem:[#allocation15 + $0x38] sm:$0xff] %vm271_vm1, %v3428_v37  ;;  %v3094_v30 = vadd.f32 %v6576_v38, %v6366_v35 }
 0x2cf   :  { %4003 = vmatmul.mubr.f32.gmra.mrb[54].mxu1 %v2946_v12  ;;  %3491 = vst.msk [vmem:[#allocation15 + $0x30] sm:$0xff] %vm271_vm1, %v3427_v21  ;;  %v3089_v3 = vadd.f32 %v6366_v35, %v6577_v43  ;;  %v3104_v0 = vadd.f32 %v6193_v7, %v6366_v35  ;;  %v3099_v39 = vadd.f32 %v6366_v35, %v6578_v14  ;;  %v3379_v12 = vld [vmem:[#allocation3 + $0xb0] sm:$0xff] }
 0x2d0   :  { %v2883_v4 = vmax.f32 %v2819_v58, 0.0  ;;  %v2553_v18 = vadd.f32 %v6372_v20, %v2357_v59  ;;  %3494 = vst.msk [vmem:[#allocation15 + $0x48] sm:$0xff] %vm271_vm1, %v3430_v55  ;;  %v3429_v52 = vadd.f32 %v3365_v51, %v3079_v56  ;;  %v3114_v8 = vadd.f32 %v6245_v34, %v6366_v35  ;;  %v6580_v34 = vld [vmem:[#allocation25_spill] sm:$0xff]  ;;  %v3382_v51 = vld [vmem:[#allocation3 + $0xc8] sm:$0xff]  ;;  %v3381_v59 = vld [vmem:[#allocation3 + $0xc0] sm:$0xff] }
 0x2d1   :  { %v3432_v13 = vadd.f32 %v3368_v31, %v3094_v30  ;;  %v3431_v5 = vadd.f32 %v3367_v25, %v3089_v3  ;;  %v3434_v42 = vadd.f32 %v3370_v36, %v3104_v0  ;;  %v3433_v40 = vadd.f32 %v3369_v63, %v3099_v39  ;;  %v3384_v63 = vld [vmem:[#allocation3 + $0xd8] sm:$0xff]  ;;  %v3383_v43 = vld [vmem:[#allocation3 + $0xd0] sm:$0xff] }
 0x2d2   :  { %v2947_v7 = vmin.f32 %v2883_v4, 6.0  ;;  %v2749_v10 = vadd.f32 %v6375_v44, %v2553_v18  ;;  %3493 = vst.msk [vmem:[#allocation15 + $0x40] sm:$0xff] %vm271_vm1, %v3429_v52  ;;  %v3436_v2 = vadd.f32 %v3372_v23, %v3114_v8  ;;  %v3109_v20 = vadd.f32 %v6366_v35, %v6579_v45  ;;  %v3386_v23 = vld [vmem:[#allocation3 + $0xe8] sm:$0xff]  ;;  %v3385_v52 = vld [vmem:[#allocation3 + $0xe0] sm:$0xff] }
 0x2d3   :  { %3496 = vst.msk [vmem:[#allocation15 + $0x58] sm:$0xff] %vm271_vm1, %v3432_v13  ;;  %3495 = vst.msk [vmem:[#allocation15 + $0x50] sm:$0xff] %vm271_vm1, %v3431_v5  ;;  %v3124_v44 = vadd.f32 %v6580_v34, %v6366_v35  ;;  %v3119_v15 = vadd.f32 %v6366_v35, %v6315_v61  ;;  %v3134_v54 = vadd.f32 %v6346_v24, %v6366_v35  ;;  %v3389_v34 = vld [vmem:[#allocation3 + $0x100] sm:$0xff] }
 0x2d4   :  { %3498 = vst.msk [vmem:[#allocation15 + $0x68] sm:$0xff] %vm271_vm1, %v3434_v42  ;;  %3497 = vst.msk [vmem:[#allocation15 + $0x60] sm:$0xff] %vm271_vm1, %v3433_v40  ;;  %v3129_v33 = vadd.f32 %v6366_v35, %v6351_v47  ;;  %4005 = vmatprep.mubr.f32.mxu1 %v2947_v7  ;;  %v2820_v22 = vadd.f32 %v6247_v6, %v2749_v10  ;;  %v3435_v17 = vadd.f32 %v3371_v49, %v3109_v20  ;;  %v3947_v50 = vpop.f32.mrb[16].mxu1  ;;  %v3380_v47 = vld [vmem:[#allocation3 + $0xb8] sm:$0xff]  ;;  %v3387_v7 = vld [vmem:[#allocation3 + $0xf0] sm:$0xff] }
 0x2d5   :  { %3500 = vst.msk [vmem:[#allocation15 + $0x78] sm:$0xff] %vm271_vm1, %v3436_v2  ;;  %v3144_v46 = vadd.f32 %v6386_v28, %v6366_v35  ;;  %v3139_v61 = vadd.f32 %v6366_v35, %v6391_v1  ;;  %v3438_v26 = vadd.f32 %v3374_v32, %v3124_v44  ;;  %v3437_v24 = vadd.f32 %v3373_v60, %v3119_v15  ;;  %v3148_v19 = vpop.f32.mrb[17].mxu1  ;;  %v3388_v40 = vld [vmem:[#allocation3 + $0xf8] sm:$0xff]  ;;  %v3390_v60 = vld [vmem:[#allocation3 + $0x108] sm:$0xff] }
 0x2d6   :  { %v3440_v16 = vadd.f32 %v3376_v57, %v3134_v54  ;;  %v3439_v62 = vadd.f32 %v3375_v27, %v3129_v33  ;;  %v2884_v41 = vmax.f32 %v2820_v22, 0.0  ;;  %3499 = vst.msk [vmem:[#allocation15 + $0x70] sm:$0xff] %vm271_vm1, %v3435_v17  ;;  %v3154_v9 = vadd.f32 %v3947_v50, %v6366_v35  ;;  %v3391_v17 = vld [vmem:[#allocation3 + $0x110] sm:$0xff] }
 0x2d7   :  { %v3442_v6 = vadd.f32 %v3378_v48, %v3144_v46  ;;  %v3441_v29 = vadd.f32 %v3377_v53, %v3139_v61  ;;  %3502 = vst.msk [vmem:[#allocation15 + $0x88] sm:$0xff] %vm271_vm1, %v3438_v26  ;;  %3501 = vst.msk [vmem:[#allocation15 + $0x80] sm:$0xff] %vm271_vm1, %v3437_v24  ;;  %v3149_v28 = vadd.f32 %v6366_v35, %v3148_v19  ;;  %v3392_v48 = vld [vmem:[#allocation3 + $0x118] sm:$0xff]  ;;  %v3394_v24 = vld [vmem:[#allocation3 + $0x128] sm:$0xff] }
 0x2d8   :  { %3504 = vst.msk [vmem:[#allocation15 + $0x98] sm:$0xff] %vm271_vm1, %v3440_v16  ;;  %3503 = vst.msk [vmem:[#allocation15 + $0x90] sm:$0xff] %vm271_vm1, %v3439_v62  ;;  %v2948_v1 = vmin.f32 %v2884_v41, 6.0  ;;  %v3444_v11 = vadd.f32 %v3380_v47, %v3154_v9  ;;  %v3393_v47 = vld [vmem:[#allocation3 + $0x120] sm:$0xff]  ;;  %v3396_v9 = vld [vmem:[#allocation3 + $0x138] sm:$0xff] }
 0x2d9   :  { %3506 = vst.msk [vmem:[#allocation15 + $0xa8] sm:$0xff] %vm271_vm1, %v3442_v6  ;;  %3505 = vst.msk [vmem:[#allocation15 + $0xa0] sm:$0xff] %vm271_vm1, %v3441_v29  ;;  %v3443_v37 = vadd.f32 %v3379_v12, %v3149_v28 }
 0x2da   :  { %4006 = vmatmul.mubr.f32.gmra.mrb[56].mxu1 %v2948_v1  ;;  %3508 = vst.msk [vmem:[#allocation15 + $0xb8] sm:$0xff] %vm271_vm1, %v3444_v11  ;;  %v3395_v1 = vld [vmem:[#allocation3 + $0x130] sm:$0xff] }
 0x2db   :  { %3507 = vst.msk [vmem:[#allocation15 + $0xb0] sm:$0xff] %vm271_vm1, %v3443_v37 }
 0x2df   :  { %v3950_v21 = vpop.f32.mrb[18].mxu1 }
 0x2e0   :  { %v3164_v31 = vadd.f32 %v3950_v21, %v6366_v35  ;;  %v3158_v58 = vpop.f32.mrb[19].mxu1 }
 0x2e1   :  { %v3159_v55 = vadd.f32 %v6366_v35, %v3158_v58 }
 0x2e2   :  { %v3446_v56 = vadd.f32 %v3382_v51, %v3164_v31  ;;  %v3398_v31 = vld [vmem:[#allocation3 + $0x148] sm:$0xff] }
 0x2e3   :  { %v3445_v25 = vadd.f32 %v3381_v59, %v3159_v55  ;;  %v3397_v55 = vld [vmem:[#allocation3 + $0x140] sm:$0xff] }
 0x2e4   :  { %3510 = vst.msk [vmem:[#allocation15 + $0xc8] sm:$0xff] %vm271_vm1, %v3446_v56 }
 0x2e5   :  { %3509 = vst.msk [vmem:[#allocation15 + $0xc0] sm:$0xff] %vm271_vm1, %v3445_v25 }
 0x2eb   :  { %v3953_v36 = vpop.f32.mrb[20].mxu1 }
 0x2ec   :  { %v3174_v38 = vadd.f32 %v3953_v36, %v6366_v35  ;;  %v3168_v30 = vpop.f32.mrb[21].mxu1 }
 0x2ed   :  { %v3169_v3 = vadd.f32 %v6366_v35, %v3168_v30 }
 0x2ee   :  { %v3448_v0 = vadd.f32 %v3384_v63, %v3174_v38  ;;  %v3400_v38 = vld [vmem:[#allocation3 + $0x158] sm:$0xff] }
 0x2ef   :  { %v3447_v14 = vadd.f32 %v3383_v43, %v3169_v3  ;;  %v3399_v3 = vld [vmem:[#allocation3 + $0x150] sm:$0xff] }
 0x2f0   :  { %3512 = vst.msk [vmem:[#allocation15 + $0xd8] sm:$0xff] %vm271_vm1, %v3448_v0 }
 0x2f1   :  { %3511 = vst.msk [vmem:[#allocation15 + $0xd0] sm:$0xff] %vm271_vm1, %v3447_v14 }
 0x2f6   :  { %v3956_v39 = vpop.f32.mrb[22].mxu1 }
 0x2f7   :  { %v3184_v4 = vadd.f32 %v3956_v39, %v6366_v35  ;;  %v3178_v18 = vpop.f32.mrb[23].mxu1 }
 0x2f8   :  { %v3179_v8 = vadd.f32 %v6366_v35, %v3178_v18 }
 0x2f9   :  { %v3450_v13 = vadd.f32 %v3386_v23, %v3184_v4  ;;  %v3402_v4 = vld [vmem:[#allocation3 + $0x168] sm:$0xff] }
 0x2fa   :  { %v3449_v5 = vadd.f32 %v3385_v52, %v3179_v8  ;;  %v3401_v8 = vld [vmem:[#allocation3 + $0x160] sm:$0xff] }
 0x2fb   :  { %3514 = vst.msk [vmem:[#allocation15 + $0xe8] sm:$0xff] %vm271_vm1, %v3450_v13 }
 0x2fc   :  { %3513 = vst.msk [vmem:[#allocation15 + $0xe0] sm:$0xff] %vm271_vm1, %v3449_v5 }
 0x302   :  { %v3959_v42 = vpop.f32.mrb[24].mxu1 }
 0x303   :  { %v3194_v49 = vadd.f32 %v3959_v42, %v6366_v35  ;;  %v3188_v32 = vpop.f32.mrb[25].mxu1 }
 0x304   :  { %v3189_v10 = vadd.f32 %v6366_v35, %v3188_v32 }
 0x305   :  { %v3452_v2 = vadd.f32 %v3388_v40, %v3194_v49  ;;  %v3404_v49 = vld [vmem:[#allocation3 + $0x178] sm:$0xff] }
 0x306   :  { %v3451_v45 = vadd.f32 %v3387_v7, %v3189_v10  ;;  %v3403_v10 = vld [vmem:[#allocation3 + $0x170] sm:$0xff] }
 0x307   :  { %3516 = vst.msk [vmem:[#allocation15 + $0xf8] sm:$0xff] %vm271_vm1, %v3452_v2 }
 0x308   :  { %3515 = vst.msk [vmem:[#allocation15 + $0xf0] sm:$0xff] %vm271_vm1, %v3451_v45 }
 0x30d   :  { %v3962_v20 = vpop.f32.mrb[26].mxu1 }
 0x30e   :  { %v3204_v57 = vadd.f32 %v3962_v20, %v6366_v35  ;;  %v3198_v27 = vpop.f32.mrb[27].mxu1 }
 0x30f   :  { %v3199_v44 = vadd.f32 %v6366_v35, %v3198_v27 }
 0x310   :  { %v3454_v15 = vadd.f32 %v3390_v60, %v3204_v57  ;;  %v3406_v57 = vld [vmem:[#allocation3 + $0x188] sm:$0xff] }
 0x311   :  { %v3453_v54 = vadd.f32 %v3389_v34, %v3199_v44  ;;  %v3405_v44 = vld [vmem:[#allocation3 + $0x180] sm:$0xff] }
 0x312   :  { %3518 = vst.msk [vmem:[#allocation15 + $0x108] sm:$0xff] %vm271_vm1, %v3454_v15 }
 0x313   :  { %3517 = vst.msk [vmem:[#allocation15 + $0x100] sm:$0xff] %vm271_vm1, %v3453_v54 }
 0x319   :  { %v3965_v33 = vpop.f32.mrb[28].mxu1 }
 0x31a   :  { %v3214_v53 = vadd.f32 %v3965_v33, %v6366_v35  ;;  %v3208_v22 = vpop.f32.mrb[29].mxu1 }
 0x31b   :  { %v3209_v46 = vadd.f32 %v6366_v35, %v3208_v22 }
 0x31c   :  { %v3456_v61 = vadd.f32 %v3392_v48, %v3214_v53  ;;  %v3408_v53 = vld [vmem:[#allocation3 + $0x198] sm:$0xff] }
 0x31d   :  { %v3455_v50 = vadd.f32 %v3391_v17, %v3209_v46  ;;  %v3407_v46 = vld [vmem:[#allocation3 + $0x190] sm:$0xff] }
 0x31e   :  { %3520 = vst.msk [vmem:[#allocation15 + $0x118] sm:$0xff] %vm271_vm1, %v3456_v61 }
 0x31f   :  { %3519 = vst.msk [vmem:[#allocation15 + $0x110] sm:$0xff] %vm271_vm1, %v3455_v50 }
 0x324   :  { %v3968_v26 = vpop.f32.mrb[30].mxu1 }
 0x325   :  { %v3224_v16 = vadd.f32 %v3968_v26, %v6366_v35  ;;  %v3218_v62 = vpop.f32.mrb[31].mxu1 }
 0x326   :  { %v3219_v19 = vadd.f32 %v6366_v35, %v3218_v62 }
 0x327   :  { %v3458_v41 = vadd.f32 %v3394_v24, %v3224_v16  ;;  %v3410_v16 = vld [vmem:[#allocation3 + $0x1a8] sm:$0xff] }
 0x328   :  { %v3457_v6 = vadd.f32 %v3393_v47, %v3219_v19  ;;  %v3409_v19 = vld [vmem:[#allocation3 + $0x1a0] sm:$0xff] }
 0x329   :  { %3522 = vst.msk [vmem:[#allocation15 + $0x128] sm:$0xff] %vm271_vm1, %v3458_v41 }
 0x32a   :  { %3521 = vst.msk [vmem:[#allocation15 + $0x120] sm:$0xff] %vm271_vm1, %v3457_v6 }
 0x330   :  { %v3971_v29 = vpop.f32.mrb[32].mxu1 }
 0x331   :  { %v3234_v12 = vadd.f32 %v3971_v29, %v6366_v35  ;;  %v3228_v28 = vpop.f32.mrb[33].mxu1 }
 0x332   :  { %v3229_v11 = vadd.f32 %v6366_v35, %v3228_v28 }
 0x333   :  { %v3460_v37 = vadd.f32 %v3396_v9, %v3234_v12  ;;  %v3412_v12 = vld [vmem:[#allocation3 + $0x1b8] sm:$0xff] }
 0x334   :  { %v3459_v21 = vadd.f32 %v3395_v1, %v3229_v11  ;;  %v3411_v11 = vld [vmem:[#allocation3 + $0x1b0] sm:$0xff] }
 0x335   :  { %3524 = vst.msk [vmem:[#allocation15 + $0x138] sm:$0xff] %vm271_vm1, %v3460_v37 }
 0x336   :  { %3523 = vst.msk [vmem:[#allocation15 + $0x130] sm:$0xff] %vm271_vm1, %v3459_v21 }
 0x33b   :  { %v3974_v51 = vpop.f32.mrb[34].mxu1 }
 0x33c   :  { %v3244_v58 = vadd.f32 %v3974_v51, %v6366_v35  ;;  %v3238_v59 = vpop.f32.mrb[35].mxu1 }
 0x33d   :  { %v3239_v56 = vadd.f32 %v6366_v35, %v3238_v59 }
 0x33e   :  { %v3462_v25 = vadd.f32 %v3398_v31, %v3244_v58  ;;  %v3414_v58 = vld [vmem:[#allocation3 + $0x1c8] sm:$0xff] }
 0x33f   :  { %v3461_v36 = vadd.f32 %v3397_v55, %v3239_v56  ;;  %v3413_v56 = vld [vmem:[#allocation3 + $0x1c0] sm:$0xff] }
 0x340   :  { %3526 = vst.msk [vmem:[#allocation15 + $0x148] sm:$0xff] %vm271_vm1, %v3462_v25 }
 0x341   :  { %3525 = vst.msk [vmem:[#allocation15 + $0x140] sm:$0xff] %vm271_vm1, %v3461_v36 }
 0x347   :  { %v3977_v63 = vpop.f32.mrb[36].mxu1 }
 0x348   :  { %v3254_v30 = vadd.f32 %v3977_v63, %v6366_v35  ;;  %v3248_v43 = vpop.f32.mrb[37].mxu1 }
 0x349   :  { %v3249_v0 = vadd.f32 %v6366_v35, %v3248_v43 }
 0x34a   :  { %v3464_v14 = vadd.f32 %v3400_v38, %v3254_v30  ;;  %v3416_v30 = vld [vmem:[#allocation3 + $0x1d8] sm:$0xff] }
 0x34b   :  { %v3463_v39 = vadd.f32 %v3399_v3, %v3249_v0  ;;  %v3415_v0 = vld [vmem:[#allocation3 + $0x1d0] sm:$0xff] }
 0x34c   :  { %3528 = vst.msk [vmem:[#allocation15 + $0x158] sm:$0xff] %vm271_vm1, %v3464_v14 }
 0x34d   :  { %3527 = vst.msk [vmem:[#allocation15 + $0x150] sm:$0xff] %vm271_vm1, %v3463_v39 }
 0x352   :  { %v3980_v23 = vpop.f32.mrb[38].mxu1 }
 0x353   :  { %v3264_v18 = vadd.f32 %v3980_v23, %v6366_v35  ;;  %v3258_v52 = vpop.f32.mrb[39].mxu1 }
 0x354   :  { %v3259_v13 = vadd.f32 %v6366_v35, %v3258_v52 }
 0x355   :  { %v3466_v5 = vadd.f32 %v3402_v4, %v3264_v18  ;;  %v3418_v18 = vld [vmem:[#allocation3 + $0x1e8] sm:$0xff] }
 0x356   :  { %v3465_v42 = vadd.f32 %v3401_v8, %v3259_v13  ;;  %v3417_v13 = vld [vmem:[#allocation3 + $0x1e0] sm:$0xff] }
 0x357   :  { %3530 = vst.msk [vmem:[#allocation15 + $0x168] sm:$0xff] %vm271_vm1, %v3466_v5 }
 0x358   :  { %3529 = vst.msk [vmem:[#allocation15 + $0x160] sm:$0xff] %vm271_vm1, %v3465_v42 }
 0x35c   :  { %v3983_v40 = vpop.f32.mrb[40].mxu1 }
 0x35d   :  { %v3274_v32 = vadd.f32 %v3983_v40, %v6366_v35  ;;  %v3268_v7 = vpop.f32.mrb[41].mxu1 }
 0x35e   :  { %v3269_v2 = vadd.f32 %v6366_v35, %v3268_v7 }
 0x35f   :  { %v3468_v45 = vadd.f32 %v3404_v49, %v3274_v32  ;;  %v3420_v32 = vld [vmem:[#allocation3 + $0x1f8] sm:$0xff] }
 0x360   :  { %v3467_v20 = vadd.f32 %v3403_v10, %v3269_v2  ;;  %v3419_v2 = vld [vmem:[#allocation3 + $0x1f0] sm:$0xff] }
 0x361   :  { %3532 = vst.msk [vmem:[#allocation15 + $0x178] sm:$0xff] %vm271_vm1, %v3468_v45 }
 0x362   :  { %3531 = vst.msk [vmem:[#allocation15 + $0x170] sm:$0xff] %vm271_vm1, %v3467_v20 }
 0x365   :  { %v3986_v60 = vpop.f32.mrb[42].mxu1 }
 0x366   :  { %v3284_v27 = vadd.f32 %v3986_v60, %v6366_v35  ;;  %v3278_v34 = vpop.f32.mrb[43].mxu1 }
 0x367   :  { %v3279_v15 = vadd.f32 %v6366_v35, %v3278_v34 }
 0x368   :  { %v3470_v54 = vadd.f32 %v3406_v57, %v3284_v27 }
 0x369   :  { %v3469_v33 = vadd.f32 %v3405_v44, %v3279_v15 }
 0x36a   :  { %3534 = vst.msk [vmem:[#allocation15 + $0x188] sm:$0xff] %vm271_vm1, %v3470_v54 }
 0x36b   :  { %3533 = vst.msk [vmem:[#allocation15 + $0x180] sm:$0xff] %vm271_vm1, %v3469_v33 }
 0x370   :  { %v3989_v48 = vpop.f32.mrb[44].mxu1 }
 0x371   :  { %v3294_v22 = vadd.f32 %v3989_v48, %v6366_v35  ;;  %v3288_v17 = vpop.f32.mrb[45].mxu1 }
 0x372   :  { %v3289_v61 = vadd.f32 %v6366_v35, %v3288_v17 }
 0x373   :  { %v3472_v50 = vadd.f32 %v3408_v53, %v3294_v22 }
 0x374   :  { %v3471_v26 = vadd.f32 %v3407_v46, %v3289_v61 }
 0x375   :  { %3536 = vst.msk [vmem:[#allocation15 + $0x198] sm:$0xff] %vm271_vm1, %v3472_v50 }
 0x376   :  { %3535 = vst.msk [vmem:[#allocation15 + $0x190] sm:$0xff] %vm271_vm1, %v3471_v26 }
 0x37a   :  { %v3992_v24 = vpop.f32.mrb[46].mxu1 }
 0x37b   :  { %v3304_v62 = vadd.f32 %v3992_v24, %v6366_v35  ;;  %v3298_v47 = vpop.f32.mrb[47].mxu1 }
 0x37c   :  { %v3299_v41 = vadd.f32 %v6366_v35, %v3298_v47 }
 0x37d   :  { %v3474_v6 = vadd.f32 %v3410_v16, %v3304_v62 }
 0x37e   :  { %v3473_v29 = vadd.f32 %v3409_v19, %v3299_v41 }
 0x37f   :  { %3538 = vst.msk [vmem:[#allocation15 + $0x1a8] sm:$0xff] %vm271_vm1, %v3474_v6 }
 0x380   :  { %3537 = vst.msk [vmem:[#allocation15 + $0x1a0] sm:$0xff] %vm271_vm1, %v3473_v29 }
 0x384   :  { %v3995_v9 = vpop.f32.mrb[48].mxu1 }
 0x385   :  { %v3314_v28 = vadd.f32 %v3995_v9, %v6366_v35  ;;  %v3308_v1 = vpop.f32.mrb[49].mxu1 }
 0x386   :  { %v3309_v37 = vadd.f32 %v6366_v35, %v3308_v1 }
 0x387   :  { %v3476_v21 = vadd.f32 %v3412_v12, %v3314_v28 }
 0x388   :  { %v3475_v51 = vadd.f32 %v3411_v11, %v3309_v37 }
 0x389   :  { %3540 = vst.msk [vmem:[#allocation15 + $0x1b8] sm:$0xff] %vm271_vm1, %v3476_v21 }
 0x38a   :  { %3539 = vst.msk [vmem:[#allocation15 + $0x1b0] sm:$0xff] %vm271_vm1, %v3475_v51 }
 0x38e   :  { %v3998_v31 = vpop.f32.mrb[50].mxu1 }
 0x38f   :  { %v3324_v59 = vadd.f32 %v3998_v31, %v6366_v35  ;;  %v3318_v55 = vpop.f32.mrb[51].mxu1 }
 0x390   :  { %v3319_v25 = vadd.f32 %v6366_v35, %v3318_v55 }
 0x391   :  { %v3478_v36 = vadd.f32 %v3414_v58, %v3324_v59 }
 0x392   :  { %v3477_v63 = vadd.f32 %v3413_v56, %v3319_v25 }
 0x393   :  { %3542 = vst.msk [vmem:[#allocation15 + $0x1c8] sm:$0xff] %vm271_vm1, %v3478_v36 }
 0x394   :  { %3541 = vst.msk [vmem:[#allocation15 + $0x1c0] sm:$0xff] %vm271_vm1, %v3477_v63 }
 0x398   :  { %v4001_v38 = vpop.f32.mrb[52].mxu1 }
 0x399   :  { %v3334_v43 = vadd.f32 %v4001_v38, %v6366_v35  ;;  %v3328_v3 = vpop.f32.mrb[53].mxu1 }
 0x39a   :  { %v3329_v14 = vadd.f32 %v6366_v35, %v3328_v3 }
 0x39b   :  { %v3480_v39 = vadd.f32 %v3416_v30, %v3334_v43 }
 0x39c   :  { %v3479_v23 = vadd.f32 %v3415_v0, %v3329_v14 }
 0x39d   :  { %3544 = vst.msk [vmem:[#allocation15 + $0x1d8] sm:$0xff] %vm271_vm1, %v3480_v39 }
 0x39e   :  { %3543 = vst.msk [vmem:[#allocation15 + $0x1d0] sm:$0xff] %vm271_vm1, %v3479_v23 }
 0x3a2   :  { %v4004_v4 = vpop.f32.mrb[54].mxu1 }
 0x3a3   :  { %v3344_v52 = vadd.f32 %v4004_v4, %v6366_v35  ;;  %v3338_v8 = vpop.f32.mrb[55].mxu1 }
 0x3a4   :  { %v3339_v5 = vadd.f32 %v6366_v35, %v3338_v8 }
 0x3a5   :  { %v3482_v42 = vadd.f32 %v3418_v18, %v3344_v52 }
 0x3a6   :  { %v3481_v40 = vadd.f32 %v3417_v13, %v3339_v5 }
 0x3a7   :  { %3546 = vst.msk [vmem:[#allocation15 + $0x1e8] sm:$0xff] %vm271_vm1, %v3482_v42 }
 0x3a8   :  { %3545 = vst.msk [vmem:[#allocation15 + $0x1e0] sm:$0xff] %vm271_vm1, %v3481_v40 }
 0x3ad   :  { %v4007_v49 = vpop.f32.mrb[56].mxu1 }
 0x3ae   :  { %v3354_v7 = vadd.f32 %v4007_v49, %v6366_v35  ;;  %v3348_v10 = vpop.f32.mrb[57].mxu1 }
 0x3af   :  { %v3349_v45 = vadd.f32 %v6366_v35, %v3348_v10 }
 0x3b0   :  { %v3484_v20 = vadd.f32 %v3420_v32, %v3354_v7 }
 0x3b1   :  { %v3483_v60 = vadd.f32 %v3419_v2, %v3349_v45 }
 0x3b2   :  { %3548 = vst.msk [vmem:[#allocation15 + $0x1f8] sm:$0xff] %vm271_vm1, %v3484_v20 }
 0x3b3   :  { %3547 = vst.msk [vmem:[#allocation15 + $0x1f0] sm:$0xff] %vm271_vm1, %v3483_v60 }
 0x3b4   :  { %4241 = shalt.err (!%p4238_p4)
}
 0x3b5   :  { %s4242_s19 = scalar_lea.hbm %s6558_s7, 8192 }
 0x3b6   :  { %p4243_p5 = scmp.ne.s32.totalorder %s6558_s7, %s4242_s19  ;;  %p4246_p6 = scmp.lt.u32.totalorder %s4242_s19, %s6558_s7 }
 0x3b8   :  { %p4248_p7 = pnand %p4246_p6, %p4243_p5 }
 0x3ba   :  { %4251 = shalt.err (!%p4248_p7)
}
 0x3bb   :  { %3560 = dma.vmem_to_hbm [thread:$0]  %s3555_s30, 8192, %s6558_s7, [#allocation5], %s4268_s27, %s4268_s27, %s4269_s15  }
 0x3bc   :  { %4260 = dma.done.wait [#allocation5], 8192  }
 0x3bd   :  { %4261 = vsyncadd [#allocation5], 4294959104 }
 0x3be   :  { %3564 = vsyncpa [#allocation4], 1 }
 0x3bf   :  { %3565 = vsyncpa [#allocation7], 1 }
 0x3c0   :  { %3566 = vsyncpa [#allocation10], 1 }
 0x3c1   :  { %3567 = vsyncpa [#allocation13], 1 }
 0x3c2   :  { %3568 = vsyncpa [#allocation5], 1 }

</bundles_post_ra>
